<compile_context>
chip_gen: v6e
topology: v6e:2x2x1
jax: 0.10.0
libtpu: 0.0.40
codegen_flags: <defaults>
</compile_context>

<pallas_src>
import functools
import math

import jax
import jax.numpy as jnp
from jax.experimental import pallas as pl
from jax.experimental.pallas import tpu as pltpu

# ----------------------------- config (small) --------------------------------
VOCAB = 128
NUM_LAYERS = 2
MODEL_DIM = 64
NUM_Q_HEADS = 4
NUM_KV_HEADS = 2
HEAD_DIM = MODEL_DIM // NUM_Q_HEADS          # 16
NUM_EXPERTS = 8
TOP_K = 2
EXPERT_DIM = 64
ROPE_THETA = 500000.0
RMS_EPS = 1e-5
BATCH = 2
SEQ = 16
DTYPE = jnp.bfloat16

NEG_BIG = -1e30  # finite causal-mask value (safe under softmax)


# ------------------------- fused whole-model kernel ---------------------------
def _forward_kernel(tok_ref, emb_ref, cos_ref, sin_ref,
                    attn_nw_ref, ffn_nw_ref, wqkv_ref, wo_ref, gate_ref,
                    wgu_ref, wd_ref, rwb_ref, fnw_ref, outw_ref,
                    logits_ref, attn_scratch,
                    *, L, B, S, H, Hkv, Dh, E, De, topk, eps, scale):
    T = B * S
    Dq = H * Dh
    Dkv = Hkv * Dh
    n_rep = H // Hkv
    f32 = jnp.float32

    # ---- token embedding as a one-hot MXU matmul (replaces XLA gather) ----
    tok = tok_ref[...]                                           # (T, 1) int32
    vocab = emb_ref.shape[0]
    vocab_iota = jax.lax.broadcasted_iota(jnp.int32, (T, vocab), 1)
    one_hot = (vocab_iota == tok).astype(emb_ref.dtype)          # (T, V) bf16
    h = jnp.dot(one_hot, emb_ref[...],
                preferred_element_type=f32).astype(emb_ref.dtype)  # (T, Dm) bf16

    # ---- hoisted constants (no per-head iota / compare) ----
    row = jax.lax.broadcasted_iota(jnp.int32, (S, S), 0)
    col = jax.lax.broadcasted_iota(jnp.int32, (S, S), 1)
    causal = col <= row                                          # (S, S) bool
    colE = jax.lax.broadcasted_iota(jnp.int32, (T, E), 1)        # (T, E) int32
    cosv = cos_ref[...]                                          # (T, Dq+Dkv) f32
    sinv = sin_ref[...]

    for l in range(L):                                           # layers unrolled
        # ---- attention RMSNorm (f32 math, single cast at matmul input) ----
        hf = h.astype(f32)
        var = jnp.mean(hf * hf, axis=-1, keepdims=True)
        normed = (hf * jax.lax.rsqrt(var + eps)
                  * attn_nw_ref[l].astype(f32)).astype(h.dtype)  # (T, Dm) bf16

        # ---- fused QKV + RoPE-partner projection: one (Dm, 224) MXU pass ----
        proj = jnp.dot(normed, wqkv_ref[l], preferred_element_type=f32)  # (T,224)
        qk = proj[:, :Dq + Dkv]                                  # (T, 96) f32
        v = proj[:, Dq + Dkv:Dq + 2 * Dkv].astype(h.dtype)       # (T, 32) bf16
        qk_sw = proj[:, Dq + 2 * Dkv:]                           # (T, 96) f32
        qk_rot = qk * cosv + qk_sw * sinv                        # RoPE in f32
        q = qk_rot[:, :Dq].astype(h.dtype)                       # (T, 64) bf16
        k = qk_rot[:, Dq:].astype(h.dtype)                       # (T, 32) bf16

        # ---- causal GQA attention, unrolled over (B, H); f32 scratch slab ----
        for b in range(B):
            qb = q[b * S:(b + 1) * S, :]
            kb = k[b * S:(b + 1) * S, :]
            vb = v[b * S:(b + 1) * S, :]
            for hh in range(H):
                g = hh // n_rep                                  # GQA mapping
                qh = qb[:, hh * Dh:(hh + 1) * Dh]
                kh = kb[:, g * Dh:(g + 1) * Dh]
                vh = vb[:, g * Dh:(g + 1) * Dh]
                s = jax.lax.dot_general(
                    qh, kh, dimension_numbers=(((1,), (1,)), ((), ())),
                    preferred_element_type=f32) * scale
                s = jnp.where(causal, s, NEG_BIG)
                m = jnp.max(s, axis=-1, keepdims=True)
                p_exp = jnp.exp(s - m)
                p = p_exp / jnp.sum(p_exp, axis=-1, keepdims=True)
                o = jnp.dot(p.astype(h.dtype), vh, preferred_element_type=f32)
                attn_scratch[b * S:(b + 1) * S, hh * Dh:(hh + 1) * Dh] = o

        attn = attn_scratch[...].astype(h.dtype)                 # (T, Dq) bf16
        attn_out = jnp.dot(attn, wo_ref[l], preferred_element_type=f32)
        h = (hf + attn_out).astype(h.dtype)                      # bf16 residual

        # ---- FFN RMSNorm + router gate (logits rounded to bf16 like the ref) --
        hrf = h.astype(f32)
        var2 = jnp.mean(hrf * hrf, axis=-1, keepdims=True)
        fnorm = (hrf * jax.lax.rsqrt(var2 + eps)
                 * ffn_nw_ref[l].astype(f32)).astype(h.dtype)    # (T, Dm) bf16
        glog = jnp.dot(fnorm, gate_ref[l], preferred_element_type=f32)
        glog = glog.astype(h.dtype).astype(f32)                  # (T, E)

        # ---- in-kernel softmax + top-k + renormalize, densified to (T, E) ----
        gmax = jnp.max(glog, axis=-1, keepdims=True)
        gexp = jnp.exp(glog - gmax)
        probs = gexp / jnp.sum(gexp, axis=-1, keepdims=True)
        remaining = probs
        rw = jnp.zeros_like(probs)
        total = jnp.zeros((T, 1), f32)
        for _ in range(topk):
            mk = jnp.max(remaining, axis=-1, keepdims=True)
            ik = jnp.min(jnp.where(remaining == mk, colE, E),
                         axis=-1, keepdims=True)
            ohk = colE == ik
            rw = jnp.where(ohk, mk, rw)
            total = total + mk
            remaining = jnp.where(ohk, -1.0, remaining)
        rw = (rw / total).astype(h.dtype)                        # (T, E) bf16

        # ---- MoE SwiGLU: two wide lane-dense matmuls over all experts ----
        gu = jnp.dot(fnorm, wgu_ref[l], preferred_element_type=f32)  # (T, 2*E*De)
        gpart = gu[:, :E * De]                                   # (T, 512) f32
        upart = gu[:, E * De:]                                   # (T, 512) f32
        rw_exp = jnp.dot(rw, rwb_ref[...], preferred_element_type=f32)  # (T, E*De)
        act = (gpart * jax.nn.sigmoid(gpart)) * upart * rw_exp   # SwiGLU * route
        ffn_out = jnp.dot(act.astype(h.dtype), wd_ref[l],
                          preferred_element_type=f32)            # (T, Dm) f32
        h = (hrf + ffn_out).astype(h.dtype)                      # bf16 residual

    # ---- final RMSNorm + LM head (lane-dense (T, 128) output) ----
    hf = h.astype(f32)
    var = jnp.mean(hf * hf, axis=-1, keepdims=True)
    normed = (hf * jax.lax.rsqrt(var + eps)
              * fnw_ref[...].astype(f32)).astype(h.dtype)
    logits_ref[...] = jnp.dot(normed, outw_ref[...],
                              preferred_element_type=f32).astype(logits_ref.dtype)


# ----------------------------- JAX wrapper ------------------------------------
@jax.jit
def forward(params, tokens):
    B, S = tokens.shape
    T = B * S
    kernel = functools.partial(
        _forward_kernel, L=NUM_LAYERS, B=B, S=S, H=NUM_Q_HEADS, Hkv=NUM_KV_HEADS,
        Dh=HEAD_DIM, E=NUM_EXPERTS, De=EXPERT_DIM, topk=TOP_K, eps=RMS_EPS,
        scale=1.0 / math.sqrt(HEAD_DIM))
    vmem = pl.BlockSpec(memory_space=pltpu.MemorySpace.VMEM)
    logits = pl.pallas_call(
        kernel,
        out_shape=jax.ShapeDtypeStruct((T, VOCAB), DTYPE),
        in_specs=[vmem] * 14,
        out_specs=vmem,
        scratch_shapes=[pltpu.VMEM((T, NUM_Q_HEADS * HEAD_DIM), jnp.float32)],
    )(tokens.reshape(T, 1).astype(jnp.int32),
      params["tok_emb"], params["cos_qk"], params["sin_qk"],
      params["attn_nw"], params["ffn_nw"], params["wqkv"], params["wo"],
      params["gate"], params["wgu"], params["wd"], params["rw_bcast"],
      params["norm_w"], params["out_w"])
    return logits.reshape(B, S, VOCAB)


# --------------------------- init-time weight fusion ---------------------------
def _swap_pairs(w):
    # swap columns (2i, 2i+1): applying this weight yields swap(x @ w)
    return w.reshape(w.shape[0], -1, 2)[:, :, ::-1].reshape(w.shape[0], -1)


def _rope_tables(B, S, head_dim, theta):
    # Interleaved (pairwise / complex) RoPE, matching torch.view_as_complex on
    # reshape(..., -1, 2).  Signed tables covering the fused q|k lanes.
    freqs = 1.0 / (theta ** (jnp.arange(0, head_dim, 2, dtype=jnp.float32) / head_dim))
    t = jnp.arange(S, dtype=jnp.float32)
    ang = jnp.outer(t, freqs)                                    # (S, Dh/2)
    cos, sin = jnp.cos(ang), jnp.sin(ang)
    cos_d = jnp.stack([cos, cos], axis=-1).reshape(S, head_dim)  # [c0,c0,c1,c1,..]
    sin_d = jnp.stack([-sin, sin], axis=-1).reshape(S, head_dim) # [-s0,s0,..]
    cos_qk = jnp.concatenate([jnp.tile(cos_d, (1, NUM_Q_HEADS)),
                              jnp.tile(cos_d, (1, NUM_KV_HEADS))], axis=1)
    sin_qk = jnp.concatenate([jnp.tile(sin_d, (1, NUM_Q_HEADS)),
                              jnp.tile(sin_d, (1, NUM_KV_HEADS))], axis=1)
    # token t = b*S + s -> row s
    return jnp.tile(cos_qk, (B, 1)), jnp.tile(sin_qk, (B, 1))    # (T, 96) f32


def init_params(key):
    def nrm(k, shape, scale=0.02):
        return (jax.random.normal(k, shape, jnp.float32) * scale).astype(DTYPE)

    keys = jax.random.split(key, 3 + NUM_LAYERS)
    E, De, Dm = NUM_EXPERTS, EXPERT_DIM, MODEL_DIM

    wqkv_l, wo_l, gate_l, wgu_l, wd_l, anw_l, fnw_l = [], [], [], [], [], [], []
    for li in range(NUM_LAYERS):
        lk = jax.random.split(keys[3 + li], 8)
        wq = nrm(lk[0], (Dm, NUM_Q_HEADS * HEAD_DIM))
        wk = nrm(lk[1], (Dm, NUM_KV_HEADS * HEAD_DIM))
        wv = nrm(lk[2], (Dm, NUM_KV_HEADS * HEAD_DIM))
        wo = nrm(lk[3], (NUM_Q_HEADS * HEAD_DIM, Dm))
        gate = nrm(lk[4], (Dm, E))
        wg = nrm(lk[5], (E, Dm, De))
        wu = nrm(lk[6], (E, Dm, De))
        wd = nrm(lk[7], (E, De, Dm))
        # fused [q | k | v | q_swap | k_swap] projection: (Dm, 224)
        wqkv_l.append(jnp.concatenate(
            [wq, wk, wv, _swap_pairs(wq), _swap_pairs(wk)], axis=1))
        wo_l.append(wo)
        gate_l.append(gate)
        # fused gate|up across experts: lanes [gate_0..gate_7 | up_0..up_7]
        wgu_l.append(jnp.concatenate(
            [jnp.transpose(wg, (1, 0, 2)).reshape(Dm, E * De),
             jnp.transpose(wu, (1, 0, 2)).reshape(Dm, E * De)], axis=1))
        # flattened down projection: rows [e*De:(e+1)*De) = expert e
        wd_l.append(wd.reshape(E * De, Dm))
        anw_l.append(jnp.ones((1, Dm), DTYPE))
        fnw_l.append(jnp.ones((1, Dm), DTYPE))

    cos_qk, sin_qk = _rope_tables(BATCH, SEQ, HEAD_DIM, ROPE_THETA)
    # routing-weight broadcast matrix: (E, E*De), 1 on expert e's 64-lane block
    rw_bcast = (jnp.arange(E)[:, None] ==
                (jnp.arange(E * De) // De)[None, :]).astype(DTYPE)

    return {
        "tok_emb": nrm(keys[0], (VOCAB, Dm)),
        "out_w": nrm(keys[1], (Dm, VOCAB)),
        "norm_w": jnp.ones((1, Dm), DTYPE),
        "attn_nw": jnp.stack(anw_l),      # (L, 1, Dm)
        "ffn_nw": jnp.stack(fnw_l),       # (L, 1, Dm)
        "wqkv": jnp.stack(wqkv_l),        # (L, Dm, 224)
        "wo": jnp.stack(wo_l),            # (L, Dm, Dm)
        "gate": jnp.stack(gate_l),        # (L, Dm, E)
        "wgu": jnp.stack(wgu_l),          # (L, Dm, 2*E*De)
        "wd": jnp.stack(wd_l),            # (L, E*De, Dm)
        "rw_bcast": rw_bcast,             # (E, E*De)
        "cos_qk": cos_qk,                 # (T, 96) f32
        "sin_qk": sin_qk,                 # (T, 96) f32
    }


# TODO(synk): flash_attn_varlen_func with cu_seqlens is realized as per-sequence
# causal attention (all sequences equal length here); torch.save / SAVE_DIR
# side-effects of the reference are omitted.

if __name__ == "__main__":
    key = jax.random.PRNGKey(0)
    pkey, tkey = jax.random.split(key)
    params = init_params(pkey)
    tokens = jax.random.randint(tkey, (BATCH, SEQ), 0, VOCAB, dtype=jnp.int32)

    out = forward(params, tokens)
    out = jax.block_until_ready(out)
    assert out.shape == (BATCH, SEQ, VOCAB) and out.dtype == DTYPE
    assert bool(jnp.all(jnp.isfinite(out.astype(jnp.float32))))
    print("KERNEL_OK")
</pallas_src>

<mosaic_0001>
module attributes {stable_mosaic.version = 11 : i64} {
  func.func @_forward_kernel(%arg0: memref<32x1xi32, #tpu.memory_space<vmem>>, %arg1: memref<128x64xbf16, #tpu.memory_space<vmem>>, %arg2: memref<32x96xf32, #tpu.memory_space<vmem>>, %arg3: memref<32x96xf32, #tpu.memory_space<vmem>>, %arg4: memref<2x1x64xbf16, #tpu.memory_space<vmem>>, %arg5: memref<2x1x64xbf16, #tpu.memory_space<vmem>>, %arg6: memref<2x64x224xbf16, #tpu.memory_space<vmem>>, %arg7: memref<2x64x64xbf16, #tpu.memory_space<vmem>>, %arg8: memref<2x64x8xbf16, #tpu.memory_space<vmem>>, %arg9: memref<2x64x1024xbf16, #tpu.memory_space<vmem>>, %arg10: memref<2x512x64xbf16, #tpu.memory_space<vmem>>, %arg11: memref<8x512xbf16, #tpu.memory_space<vmem>>, %arg12: memref<1x64xbf16, #tpu.memory_space<vmem>>, %arg13: memref<64x128xbf16, #tpu.memory_space<vmem>>, %arg14: memref<32x128xbf16, #tpu.memory_space<vmem>>, %arg15: memref<32x64xf32, #tpu.memory_space<vmem>>) attributes {dimension_semantics = [], scalar_prefetch = 0 : i64, scratch_operands = 1 : i64, tpu.core_type = #tpu.core_type<tc>} {
    %c0 = arith.constant 0 : index
    %c0_0 = arith.constant 0 : index
    %0 = vector.load %arg0[%c0, %c0_0] : memref<32x1xi32, #tpu.memory_space<vmem>>, vector<32x1xi32>
    %1 = tpu.iota {dimensions = array<i32: 1>} : vector<32x128xi32>
    %2 = vector.broadcast %0 : vector<32x1xi32> to vector<32x128xi32>
    %3 = arith.cmpi eq, %1, %2 : vector<32x128xi32>
    %4 = arith.extui %3 : vector<32x128xi1> to vector<32x128xi32>
    %5 = arith.sitofp %4 : vector<32x128xi32> to vector<32x128xf32>
    %6 = arith.truncf %5 : vector<32x128xf32> to vector<32x128xbf16>
    %c0_1 = arith.constant 0 : index
    %c0_2 = arith.constant 0 : index
    %7 = vector.load %arg1[%c0_1, %c0_2] : memref<128x64xbf16, #tpu.memory_space<vmem>>, vector<128x64xbf16>
    %cst = arith.constant dense<0.000000e+00> : vector<32x64xf32>
    %8 = tpu.matmul %6, %7, %cst {dimension_numbers = #tpu.dot_dimension_numbers<[1], [0], [0], [1], [0, 0, 1, 1], [], []>} : vector<32x128xbf16>, vector<128x64xbf16>, vector<32x64xf32> -> vector<32x64xf32>
    %9 = arith.truncf %8 : vector<32x64xf32> to vector<32x64xbf16>
    %10 = tpu.iota {dimensions = array<i32: 0>} : vector<16x16xi32>
    %11 = tpu.iota {dimensions = array<i32: 1>} : vector<16x16xi32>
    %12 = arith.cmpi sle, %11, %10 : vector<16x16xi32>
    %13 = tpu.iota {dimensions = array<i32: 1>} : vector<32x8xi32>
    %c0_3 = arith.constant 0 : index
    %c0_4 = arith.constant 0 : index
    %14 = vector.load %arg2[%c0_3, %c0_4] : memref<32x96xf32, #tpu.memory_space<vmem>>, vector<32x96xf32>
    %c0_5 = arith.constant 0 : index
    %c0_6 = arith.constant 0 : index
    %15 = vector.load %arg3[%c0_5, %c0_6] : memref<32x96xf32, #tpu.memory_space<vmem>>, vector<32x96xf32>
    %16 = arith.extf %9 : vector<32x64xbf16> to vector<32x64xf32>
    %17 = arith.mulf %16, %16 : vector<32x64xf32>
    %cst_7 = arith.constant dense<0.000000e+00> : vector<32xf32>
    %18 = vector.multi_reduction <add>, %17, %cst_7 [1] : vector<32x64xf32> to vector<32xf32>
    %19 = vector.shape_cast %18 : vector<32xf32> to vector<32x1xf32>
    %cst_8 = arith.constant 6.400000e+01 : f32
    %20 = vector.broadcast %cst_8 : f32 to vector<32x1xf32>
    %21 = arith.divf %19, %20 : vector<32x1xf32>
    %cst_9 = arith.constant 9.99999974E-6 : f32
    %22 = vector.broadcast %cst_9 : f32 to vector<32x1xf32>
    %23 = arith.addf %21, %22 : vector<32x1xf32>
    %24 = math.rsqrt %23 : vector<32x1xf32>
    %25 = vector.broadcast %24 : vector<32x1xf32> to vector<32x64xf32>
    %26 = arith.mulf %16, %25 : vector<32x64xf32>
    %c0_10 = arith.constant 0 : index
    %c0_11 = arith.constant 0 : index
    %c0_12 = arith.constant 0 : index
    %27 = vector.load %arg4[%c0_10, %c0_11, %c0_12] : memref<2x1x64xbf16, #tpu.memory_space<vmem>>, vector<1x1x64xbf16>
    %28 = vector.shape_cast %27 : vector<1x1x64xbf16> to vector<1x64xbf16>
    %29 = arith.extf %28 : vector<1x64xbf16> to vector<1x64xf32>
    %30 = vector.broadcast %29 : vector<1x64xf32> to vector<32x64xf32>
    %31 = arith.mulf %26, %30 : vector<32x64xf32>
    %32 = arith.truncf %31 : vector<32x64xf32> to vector<32x64xbf16>
    %c0_13 = arith.constant 0 : index
    %c0_14 = arith.constant 0 : index
    %c0_15 = arith.constant 0 : index
    %33 = vector.load %arg6[%c0_13, %c0_14, %c0_15] : memref<2x64x224xbf16, #tpu.memory_space<vmem>>, vector<1x64x224xbf16>
    %34 = vector.shape_cast %33 : vector<1x64x224xbf16> to vector<64x224xbf16>
    %cst_16 = arith.constant dense<0.000000e+00> : vector<32x224xf32>
    %35 = tpu.matmul %32, %34, %cst_16 {dimension_numbers = #tpu.dot_dimension_numbers<[1], [0], [0], [1], [0, 0, 1, 1], [], []>} : vector<32x64xbf16>, vector<64x224xbf16>, vector<32x224xf32> -> vector<32x224xf32>
    %36 = vector.extract_strided_slice %35 {offsets = [0, 0], sizes = [32, 96], strides = [1, 1]} : vector<32x224xf32> to vector<32x96xf32>
    %37 = vector.extract_strided_slice %35 {offsets = [0, 96], sizes = [32, 32], strides = [1, 1]} : vector<32x224xf32> to vector<32x32xf32>
    %38 = arith.truncf %37 : vector<32x32xf32> to vector<32x32xbf16>
    %39 = vector.extract_strided_slice %35 {offsets = [0, 128], sizes = [32, 96], strides = [1, 1]} : vector<32x224xf32> to vector<32x96xf32>
    %40 = arith.mulf %36, %14 : vector<32x96xf32>
    %41 = arith.mulf %39, %15 : vector<32x96xf32>
    %42 = arith.addf %40, %41 : vector<32x96xf32>
    %43 = vector.extract_strided_slice %42 {offsets = [0, 0], sizes = [32, 64], strides = [1, 1]} : vector<32x96xf32> to vector<32x64xf32>
    %44 = arith.truncf %43 : vector<32x64xf32> to vector<32x64xbf16>
    %45 = vector.extract_strided_slice %42 {offsets = [0, 64], sizes = [32, 32], strides = [1, 1]} : vector<32x96xf32> to vector<32x32xf32>
    %46 = arith.truncf %45 : vector<32x32xf32> to vector<32x32xbf16>
    %47 = vector.extract_strided_slice %44 {offsets = [0, 0], sizes = [16, 64], strides = [1, 1]} : vector<32x64xbf16> to vector<16x64xbf16>
    %48 = vector.extract_strided_slice %46 {offsets = [0, 0], sizes = [16, 32], strides = [1, 1]} : vector<32x32xbf16> to vector<16x32xbf16>
    %49 = vector.extract_strided_slice %38 {offsets = [0, 0], sizes = [16, 32], strides = [1, 1]} : vector<32x32xbf16> to vector<16x32xbf16>
    %50 = vector.extract_strided_slice %47 {offsets = [0, 0], sizes = [16, 16], strides = [1, 1]} : vector<16x64xbf16> to vector<16x16xbf16>
    %51 = vector.extract_strided_slice %48 {offsets = [0, 0], sizes = [16, 16], strides = [1, 1]} : vector<16x32xbf16> to vector<16x16xbf16>
    %52 = vector.extract_strided_slice %49 {offsets = [0, 0], sizes = [16, 16], strides = [1, 1]} : vector<16x32xbf16> to vector<16x16xbf16>
    %cst_17 = arith.constant dense<0.000000e+00> : vector<16x16xf32>
    %53 = tpu.matmul %50, %51, %cst_17 {dimension_numbers = #tpu.dot_dimension_numbers<[1], [1], [0], [0], [0, 0, 1, 0], [], []>} : vector<16x16xbf16>, vector<16x16xbf16>, vector<16x16xf32> -> vector<16x16xf32>
    %cst_18 = arith.constant 2.500000e-01 : f32
    %54 = vector.broadcast %cst_18 : f32 to vector<16x16xf32>
    %55 = arith.mulf %53, %54 : vector<16x16xf32>
    %cst_19 = arith.constant -1.000000e+30 : f32
    %56 = vector.broadcast %cst_19 : f32 to vector<16x16xf32>
    %57 = arith.select %12, %55, %56 : vector<16x16xi1>, vector<16x16xf32>
    %cst_20 = arith.constant dense<0xFF800000> : vector<16xf32>
    %58 = vector.multi_reduction <maximumf>, %57, %cst_20 [1] : vector<16x16xf32> to vector<16xf32>
    %59 = vector.shape_cast %58 : vector<16xf32> to vector<16x1xf32>
    %60 = vector.broadcast %59 : vector<16x1xf32> to vector<16x16xf32>
    %61 = arith.subf %57, %60 : vector<16x16xf32>
    %62 = math.exp %61 : vector<16x16xf32>
    %cst_21 = arith.constant dense<0.000000e+00> : vector<16xf32>
    %63 = vector.multi_reduction <add>, %62, %cst_21 [1] : vector<16x16xf32> to vector<16xf32>
    %64 = vector.shape_cast %63 : vector<16xf32> to vector<16x1xf32>
    %65 = vector.broadcast %64 : vector<16x1xf32> to vector<16x16xf32>
    %66 = arith.divf %62, %65 : vector<16x16xf32>
    %67 = arith.truncf %66 : vector<16x16xf32> to vector<16x16xbf16>
    %cst_22 = arith.constant dense<0.000000e+00> : vector<16x16xf32>
    %68 = tpu.matmul %67, %52, %cst_22 {dimension_numbers = #tpu.dot_dimension_numbers<[1], [0], [0], [1], [0, 0, 1, 1], [], []>} : vector<16x16xbf16>, vector<16x16xbf16>, vector<16x16xf32> -> vector<16x16xf32>
    %c0_23 = arith.constant 0 : index
    %c0_24 = arith.constant 0 : index
    %69 = vector.load %arg15[%c0_23, %c0_24] : memref<32x64xf32, #tpu.memory_space<vmem>>, vector<16x16xf32>
    tpu.vector_store %arg15[%c0_23, %c0_24], %68 {strides = array<i32>} : memref<32x64xf32, #tpu.memory_space<vmem>>, vector<16x16xf32>,
    %70 = vector.extract_strided_slice %47 {offsets = [0, 16], sizes = [16, 16], strides = [1, 1]} : vector<16x64xbf16> to vector<16x16xbf16>
    %71 = vector.extract_strided_slice %48 {offsets = [0, 0], sizes = [16, 16], strides = [1, 1]} : vector<16x32xbf16> to vector<16x16xbf16>
    %72 = vector.extract_strided_slice %49 {offsets = [0, 0], sizes = [16, 16], strides = [1, 1]} : vector<16x32xbf16> to vector<16x16xbf16>
    %cst_25 = arith.constant dense<0.000000e+00> : vector<16x16xf32>
    %73 = tpu.matmul %70, %71, %cst_25 {dimension_numbers = #tpu.dot_dimension_numbers<[1], [1], [0], [0], [0, 0, 1, 0], [], []>} : vector<16x16xbf16>, vector<16x16xbf16>, vector<16x16xf32> -> vector<16x16xf32>
    %cst_26 = arith.constant 2.500000e-01 : f32
    %74 = vector.broadcast %cst_26 : f32 to vector<16x16xf32>
    %75 = arith.mulf %73, %74 : vector<16x16xf32>
    %cst_27 = arith.constant -1.000000e+30 : f32
    %76 = vector.broadcast %cst_27 : f32 to vector<16x16xf32>
    %77 = arith.select %12, %75, %76 : vector<16x16xi1>, vector<16x16xf32>
    %cst_28 = arith.constant dense<0xFF800000> : vector<16xf32>
    %78 = vector.multi_reduction <maximumf>, %77, %cst_28 [1] : vector<16x16xf32> to vector<16xf32>
    %79 = vector.shape_cast %78 : vector<16xf32> to vector<16x1xf32>
    %80 = vector.broadcast %79 : vector<16x1xf32> to vector<16x16xf32>
    %81 = arith.subf %77, %80 : vector<16x16xf32>
    %82 = math.exp %81 : vector<16x16xf32>
    %cst_29 = arith.constant dense<0.000000e+00> : vector<16xf32>
    %83 = vector.multi_reduction <add>, %82, %cst_29 [1] : vector<16x16xf32> to vector<16xf32>
    %84 = vector.shape_cast %83 : vector<16xf32> to vector<16x1xf32>
    %85 = vector.broadcast %84 : vector<16x1xf32> to vector<16x16xf32>
    %86 = arith.divf %82, %85 : vector<16x16xf32>
    %87 = arith.truncf %86 : vector<16x16xf32> to vector<16x16xbf16>
    %cst_30 = arith.constant dense<0.000000e+00> : vector<16x16xf32>
    %88 = tpu.matmul %87, %72, %cst_30 {dimension_numbers = #tpu.dot_dimension_numbers<[1], [0], [0], [1], [0, 0, 1, 1], [], []>} : vector<16x16xbf16>, vector<16x16xbf16>, vector<16x16xf32> -> vector<16x16xf32>
    %c0_31 = arith.constant 0 : index
    %c16 = arith.constant 16 : index
    %89 = vector.load %arg15[%c0_31, %c16] : memref<32x64xf32, #tpu.memory_space<vmem>>, vector<16x16xf32>
    tpu.vector_store %arg15[%c0_31, %c16], %88 {strides = array<i32>} : memref<32x64xf32, #tpu.memory_space<vmem>>, vector<16x16xf32>,
    %90 = vector.extract_strided_slice %47 {offsets = [0, 32], sizes = [16, 16], strides = [1, 1]} : vector<16x64xbf16> to vector<16x16xbf16>
    %91 = vector.extract_strided_slice %48 {offsets = [0, 16], sizes = [16, 16], strides = [1, 1]} : vector<16x32xbf16> to vector<16x16xbf16>
    %92 = vector.extract_strided_slice %49 {offsets = [0, 16], sizes = [16, 16], strides = [1, 1]} : vector<16x32xbf16> to vector<16x16xbf16>
    %cst_32 = arith.constant dense<0.000000e+00> : vector<16x16xf32>
    %93 = tpu.matmul %90, %91, %cst_32 {dimension_numbers = #tpu.dot_dimension_numbers<[1], [1], [0], [0], [0, 0, 1, 0], [], []>} : vector<16x16xbf16>, vector<16x16xbf16>, vector<16x16xf32> -> vector<16x16xf32>
    %cst_33 = arith.constant 2.500000e-01 : f32
    %94 = vector.broadcast %cst_33 : f32 to vector<16x16xf32>
    %95 = arith.mulf %93, %94 : vector<16x16xf32>
    %cst_34 = arith.constant -1.000000e+30 : f32
    %96 = vector.broadcast %cst_34 : f32 to vector<16x16xf32>
    %97 = arith.select %12, %95, %96 : vector<16x16xi1>, vector<16x16xf32>
    %cst_35 = arith.constant dense<0xFF800000> : vector<16xf32>
    %98 = vector.multi_reduction <maximumf>, %97, %cst_35 [1] : vector<16x16xf32> to vector<16xf32>
    %99 = vector.shape_cast %98 : vector<16xf32> to vector<16x1xf32>
    %100 = vector.broadcast %99 : vector<16x1xf32> to vector<16x16xf32>
    %101 = arith.subf %97, %100 : vector<16x16xf32>
    %102 = math.exp %101 : vector<16x16xf32>
    %cst_36 = arith.constant dense<0.000000e+00> : vector<16xf32>
    %103 = vector.multi_reduction <add>, %102, %cst_36 [1] : vector<16x16xf32> to vector<16xf32>
    %104 = vector.shape_cast %103 : vector<16xf32> to vector<16x1xf32>
    %105 = vector.broadcast %104 : vector<16x1xf32> to vector<16x16xf32>
    %106 = arith.divf %102, %105 : vector<16x16xf32>
    %107 = arith.truncf %106 : vector<16x16xf32> to vector<16x16xbf16>
    %cst_37 = arith.constant dense<0.000000e+00> : vector<16x16xf32>
    %108 = tpu.matmul %107, %92, %cst_37 {dimension_numbers = #tpu.dot_dimension_numbers<[1], [0], [0], [1], [0, 0, 1, 1], [], []>} : vector<16x16xbf16>, vector<16x16xbf16>, vector<16x16xf32> -> vector<16x16xf32>
    %c0_38 = arith.constant 0 : index
    %c32 = arith.constant 32 : index
    %109 = vector.load %arg15[%c0_38, %c32] : memref<32x64xf32, #tpu.memory_space<vmem>>, vector<16x16xf32>
    tpu.vector_store %arg15[%c0_38, %c32], %108 {strides = array<i32>} : memref<32x64xf32, #tpu.memory_space<vmem>>, vector<16x16xf32>,
    %110 = vector.extract_strided_slice %47 {offsets = [0, 48], sizes = [16, 16], strides = [1, 1]} : vector<16x64xbf16> to vector<16x16xbf16>
    %111 = vector.extract_strided_slice %48 {offsets = [0, 16], sizes = [16, 16], strides = [1, 1]} : vector<16x32xbf16> to vector<16x16xbf16>
    %112 = vector.extract_strided_slice %49 {offsets = [0, 16], sizes = [16, 16], strides = [1, 1]} : vector<16x32xbf16> to vector<16x16xbf16>
    %cst_39 = arith.constant dense<0.000000e+00> : vector<16x16xf32>
    %113 = tpu.matmul %110, %111, %cst_39 {dimension_numbers = #tpu.dot_dimension_numbers<[1], [1], [0], [0], [0, 0, 1, 0], [], []>} : vector<16x16xbf16>, vector<16x16xbf16>, vector<16x16xf32> -> vector<16x16xf32>
    %cst_40 = arith.constant 2.500000e-01 : f32
    %114 = vector.broadcast %cst_40 : f32 to vector<16x16xf32>
    %115 = arith.mulf %113, %114 : vector<16x16xf32>
    %cst_41 = arith.constant -1.000000e+30 : f32
    %116 = vector.broadcast %cst_41 : f32 to vector<16x16xf32>
    %117 = arith.select %12, %115, %116 : vector<16x16xi1>, vector<16x16xf32>
    %cst_42 = arith.constant dense<0xFF800000> : vector<16xf32>
    %118 = vector.multi_reduction <maximumf>, %117, %cst_42 [1] : vector<16x16xf32> to vector<16xf32>
    %119 = vector.shape_cast %118 : vector<16xf32> to vector<16x1xf32>
    %120 = vector.broadcast %119 : vector<16x1xf32> to vector<16x16xf32>
    %121 = arith.subf %117, %120 : vector<16x16xf32>
    %122 = math.exp %121 : vector<16x16xf32>
    %cst_43 = arith.constant dense<0.000000e+00> : vector<16xf32>
    %123 = vector.multi_reduction <add>, %122, %cst_43 [1] : vector<16x16xf32> to vector<16xf32>
    %124 = vector.shape_cast %123 : vector<16xf32> to vector<16x1xf32>
    %125 = vector.broadcast %124 : vector<16x1xf32> to vector<16x16xf32>
    %126 = arith.divf %122, %125 : vector<16x16xf32>
    %127 = arith.truncf %126 : vector<16x16xf32> to vector<16x16xbf16>
    %cst_44 = arith.constant dense<0.000000e+00> : vector<16x16xf32>
    %128 = tpu.matmul %127, %112, %cst_44 {dimension_numbers = #tpu.dot_dimension_numbers<[1], [0], [0], [1], [0, 0, 1, 1], [], []>} : vector<16x16xbf16>, vector<16x16xbf16>, vector<16x16xf32> -> vector<16x16xf32>
    %c0_45 = arith.constant 0 : index
    %c48 = arith.constant 48 : index
    %129 = vector.load %arg15[%c0_45, %c48] : memref<32x64xf32, #tpu.memory_space<vmem>>, vector<16x16xf32>
    tpu.vector_store %arg15[%c0_45, %c48], %128 {strides = array<i32>} : memref<32x64xf32, #tpu.memory_space<vmem>>, vector<16x16xf32>,
    %130 = vector.extract_strided_slice %44 {offsets = [16, 0], sizes = [16, 64], strides = [1, 1]} : vector<32x64xbf16> to vector<16x64xbf16>
    %131 = vector.extract_strided_slice %46 {offsets = [16, 0], sizes = [16, 32], strides = [1, 1]} : vector<32x32xbf16> to vector<16x32xbf16>
    %132 = vector.extract_strided_slice %38 {offsets = [16, 0], sizes = [16, 32], strides = [1, 1]} : vector<32x32xbf16> to vector<16x32xbf16>
    %133 = vector.extract_strided_slice %130 {offsets = [0, 0], sizes = [16, 16], strides = [1, 1]} : vector<16x64xbf16> to vector<16x16xbf16>
    %134 = vector.extract_strided_slice %131 {offsets = [0, 0], sizes = [16, 16], strides = [1, 1]} : vector<16x32xbf16> to vector<16x16xbf16>
    %135 = vector.extract_strided_slice %132 {offsets = [0, 0], sizes = [16, 16], strides = [1, 1]} : vector<16x32xbf16> to vector<16x16xbf16>
    %cst_46 = arith.constant dense<0.000000e+00> : vector<16x16xf32>
    %136 = tpu.matmul %133, %134, %cst_46 {dimension_numbers = #tpu.dot_dimension_numbers<[1], [1], [0], [0], [0, 0, 1, 0], [], []>} : vector<16x16xbf16>, vector<16x16xbf16>, vector<16x16xf32> -> vector<16x16xf32>
    %cst_47 = arith.constant 2.500000e-01 : f32
    %137 = vector.broadcast %cst_47 : f32 to vector<16x16xf32>
    %138 = arith.mulf %136, %137 : vector<16x16xf32>
    %cst_48 = arith.constant -1.000000e+30 : f32
    %139 = vector.broadcast %cst_48 : f32 to vector<16x16xf32>
    %140 = arith.select %12, %138, %139 : vector<16x16xi1>, vector<16x16xf32>
    %cst_49 = arith.constant dense<0xFF800000> : vector<16xf32>
    %141 = vector.multi_reduction <maximumf>, %140, %cst_49 [1] : vector<16x16xf32> to vector<16xf32>
    %142 = vector.shape_cast %141 : vector<16xf32> to vector<16x1xf32>
    %143 = vector.broadcast %142 : vector<16x1xf32> to vector<16x16xf32>
    %144 = arith.subf %140, %143 : vector<16x16xf32>
    %145 = math.exp %144 : vector<16x16xf32>
    %cst_50 = arith.constant dense<0.000000e+00> : vector<16xf32>
    %146 = vector.multi_reduction <add>, %145, %cst_50 [1] : vector<16x16xf32> to vector<16xf32>
    %147 = vector.shape_cast %146 : vector<16xf32> to vector<16x1xf32>
    %148 = vector.broadcast %147 : vector<16x1xf32> to vector<16x16xf32>
    %149 = arith.divf %145, %148 : vector<16x16xf32>
    %150 = arith.truncf %149 : vector<16x16xf32> to vector<16x16xbf16>
    %cst_51 = arith.constant dense<0.000000e+00> : vector<16x16xf32>
    %151 = tpu.matmul %150, %135, %cst_51 {dimension_numbers = #tpu.dot_dimension_numbers<[1], [0], [0], [1], [0, 0, 1, 1], [], []>} : vector<16x16xbf16>, vector<16x16xbf16>, vector<16x16xf32> -> vector<16x16xf32>
    %c16_52 = arith.constant 16 : index
    %c0_53 = arith.constant 0 : index
    %152 = vector.load %arg15[%c16_52, %c0_53] : memref<32x64xf32, #tpu.memory_space<vmem>>, vector<16x16xf32>
    tpu.vector_store %arg15[%c16_52, %c0_53], %151 {strides = array<i32>} : memref<32x64xf32, #tpu.memory_space<vmem>>, vector<16x16xf32>,
    %153 = vector.extract_strided_slice %130 {offsets = [0, 16], sizes = [16, 16], strides = [1, 1]} : vector<16x64xbf16> to vector<16x16xbf16>
    %154 = vector.extract_strided_slice %131 {offsets = [0, 0], sizes = [16, 16], strides = [1, 1]} : vector<16x32xbf16> to vector<16x16xbf16>
    %155 = vector.extract_strided_slice %132 {offsets = [0, 0], sizes = [16, 16], strides = [1, 1]} : vector<16x32xbf16> to vector<16x16xbf16>
    %cst_54 = arith.constant dense<0.000000e+00> : vector<16x16xf32>
    %156 = tpu.matmul %153, %154, %cst_54 {dimension_numbers = #tpu.dot_dimension_numbers<[1], [1], [0], [0], [0, 0, 1, 0], [], []>} : vector<16x16xbf16>, vector<16x16xbf16>, vector<16x16xf32> -> vector<16x16xf32>
    %cst_55 = arith.constant 2.500000e-01 : f32
    %157 = vector.broadcast %cst_55 : f32 to vector<16x16xf32>
    %158 = arith.mulf %156, %157 : vector<16x16xf32>
    %cst_56 = arith.constant -1.000000e+30 : f32
    %159 = vector.broadcast %cst_56 : f32 to vector<16x16xf32>
    %160 = arith.select %12, %158, %159 : vector<16x16xi1>, vector<16x16xf32>
    %cst_57 = arith.constant dense<0xFF800000> : vector<16xf32>
    %161 = vector.multi_reduction <maximumf>, %160, %cst_57 [1] : vector<16x16xf32> to vector<16xf32>
    %162 = vector.shape_cast %161 : vector<16xf32> to vector<16x1xf32>
    %163 = vector.broadcast %162 : vector<16x1xf32> to vector<16x16xf32>
    %164 = arith.subf %160, %163 : vector<16x16xf32>
    %165 = math.exp %164 : vector<16x16xf32>
    %cst_58 = arith.constant dense<0.000000e+00> : vector<16xf32>
    %166 = vector.multi_reduction <add>, %165, %cst_58 [1] : vector<16x16xf32> to vector<16xf32>
    %167 = vector.shape_cast %166 : vector<16xf32> to vector<16x1xf32>
    %168 = vector.broadcast %167 : vector<16x1xf32> to vector<16x16xf32>
    %169 = arith.divf %165, %168 : vector<16x16xf32>
    %170 = arith.truncf %169 : vector<16x16xf32> to vector<16x16xbf16>
    %cst_59 = arith.constant dense<0.000000e+00> : vector<16x16xf32>
    %171 = tpu.matmul %170, %155, %cst_59 {dimension_numbers = #tpu.dot_dimension_numbers<[1], [0], [0], [1], [0, 0, 1, 1], [], []>} : vector<16x16xbf16>, vector<16x16xbf16>, vector<16x16xf32> -> vector<16x16xf32>
    %c16_60 = arith.constant 16 : index
    %c16_61 = arith.constant 16 : index
    %172 = vector.load %arg15[%c16_60, %c16_61] : memref<32x64xf32, #tpu.memory_space<vmem>>, vector<16x16xf32>
    tpu.vector_store %arg15[%c16_60, %c16_61], %171 {strides = array<i32>} : memref<32x64xf32, #tpu.memory_space<vmem>>, vector<16x16xf32>,
    %173 = vector.extract_strided_slice %130 {offsets = [0, 32], sizes = [16, 16], strides = [1, 1]} : vector<16x64xbf16> to vector<16x16xbf16>
    %174 = vector.extract_strided_slice %131 {offsets = [0, 16], sizes = [16, 16], strides = [1, 1]} : vector<16x32xbf16> to vector<16x16xbf16>
    %175 = vector.extract_strided_slice %132 {offsets = [0, 16], sizes = [16, 16], strides = [1, 1]} : vector<16x32xbf16> to vector<16x16xbf16>
    %cst_62 = arith.constant dense<0.000000e+00> : vector<16x16xf32>
    %176 = tpu.matmul %173, %174, %cst_62 {dimension_numbers = #tpu.dot_dimension_numbers<[1], [1], [0], [0], [0, 0, 1, 0], [], []>} : vector<16x16xbf16>, vector<16x16xbf16>, vector<16x16xf32> -> vector<16x16xf32>
    %cst_63 = arith.constant 2.500000e-01 : f32
    %177 = vector.broadcast %cst_63 : f32 to vector<16x16xf32>
    %178 = arith.mulf %176, %177 : vector<16x16xf32>
    %cst_64 = arith.constant -1.000000e+30 : f32
    %179 = vector.broadcast %cst_64 : f32 to vector<16x16xf32>
    %180 = arith.select %12, %178, %179 : vector<16x16xi1>, vector<16x16xf32>
    %cst_65 = arith.constant dense<0xFF800000> : vector<16xf32>
    %181 = vector.multi_reduction <maximumf>, %180, %cst_65 [1] : vector<16x16xf32> to vector<16xf32>
    %182 = vector.shape_cast %181 : vector<16xf32> to vector<16x1xf32>
    %183 = vector.broadcast %182 : vector<16x1xf32> to vector<16x16xf32>
    %184 = arith.subf %180, %183 : vector<16x16xf32>
    %185 = math.exp %184 : vector<16x16xf32>
    %cst_66 = arith.constant dense<0.000000e+00> : vector<16xf32>
    %186 = vector.multi_reduction <add>, %185, %cst_66 [1] : vector<16x16xf32> to vector<16xf32>
    %187 = vector.shape_cast %186 : vector<16xf32> to vector<16x1xf32>
    %188 = vector.broadcast %187 : vector<16x1xf32> to vector<16x16xf32>
    %189 = arith.divf %185, %188 : vector<16x16xf32>
    %190 = arith.truncf %189 : vector<16x16xf32> to vector<16x16xbf16>
    %cst_67 = arith.constant dense<0.000000e+00> : vector<16x16xf32>
    %191 = tpu.matmul %190, %175, %cst_67 {dimension_numbers = #tpu.dot_dimension_numbers<[1], [0], [0], [1], [0, 0, 1, 1], [], []>} : vector<16x16xbf16>, vector<16x16xbf16>, vector<16x16xf32> -> vector<16x16xf32>
    %c16_68 = arith.constant 16 : index
    %c32_69 = arith.constant 32 : index
    %192 = vector.load %arg15[%c16_68, %c32_69] : memref<32x64xf32, #tpu.memory_space<vmem>>, vector<16x16xf32>
    tpu.vector_store %arg15[%c16_68, %c32_69], %191 {strides = array<i32>} : memref<32x64xf32, #tpu.memory_space<vmem>>, vector<16x16xf32>,
    %193 = vector.extract_strided_slice %130 {offsets = [0, 48], sizes = [16, 16], strides = [1, 1]} : vector<16x64xbf16> to vector<16x16xbf16>
    %194 = vector.extract_strided_slice %131 {offsets = [0, 16], sizes = [16, 16], strides = [1, 1]} : vector<16x32xbf16> to vector<16x16xbf16>
    %195 = vector.extract_strided_slice %132 {offsets = [0, 16], sizes = [16, 16], strides = [1, 1]} : vector<16x32xbf16> to vector<16x16xbf16>
    %cst_70 = arith.constant dense<0.000000e+00> : vector<16x16xf32>
    %196 = tpu.matmul %193, %194, %cst_70 {dimension_numbers = #tpu.dot_dimension_numbers<[1], [1], [0], [0], [0, 0, 1, 0], [], []>} : vector<16x16xbf16>, vector<16x16xbf16>, vector<16x16xf32> -> vector<16x16xf32>
    %cst_71 = arith.constant 2.500000e-01 : f32
    %197 = vector.broadcast %cst_71 : f32 to vector<16x16xf32>
    %198 = arith.mulf %196, %197 : vector<16x16xf32>
    %cst_72 = arith.constant -1.000000e+30 : f32
    %199 = vector.broadcast %cst_72 : f32 to vector<16x16xf32>
    %200 = arith.select %12, %198, %199 : vector<16x16xi1>, vector<16x16xf32>
    %cst_73 = arith.constant dense<0xFF800000> : vector<16xf32>
    %201 = vector.multi_reduction <maximumf>, %200, %cst_73 [1] : vector<16x16xf32> to vector<16xf32>
    %202 = vector.shape_cast %201 : vector<16xf32> to vector<16x1xf32>
    %203 = vector.broadcast %202 : vector<16x1xf32> to vector<16x16xf32>
    %204 = arith.subf %200, %203 : vector<16x16xf32>
    %205 = math.exp %204 : vector<16x16xf32>
    %cst_74 = arith.constant dense<0.000000e+00> : vector<16xf32>
    %206 = vector.multi_reduction <add>, %205, %cst_74 [1] : vector<16x16xf32> to vector<16xf32>
    %207 = vector.shape_cast %206 : vector<16xf32> to vector<16x1xf32>
    %208 = vector.broadcast %207 : vector<16x1xf32> to vector<16x16xf32>
    %209 = arith.divf %205, %208 : vector<16x16xf32>
    %210 = arith.truncf %209 : vector<16x16xf32> to vector<16x16xbf16>
    %cst_75 = arith.constant dense<0.000000e+00> : vector<16x16xf32>
    %211 = tpu.matmul %210, %195, %cst_75 {dimension_numbers = #tpu.dot_dimension_numbers<[1], [0], [0], [1], [0, 0, 1, 1], [], []>} : vector<16x16xbf16>, vector<16x16xbf16>, vector<16x16xf32> -> vector<16x16xf32>
    %c16_76 = arith.constant 16 : index
    %c48_77 = arith.constant 48 : index
    %212 = vector.load %arg15[%c16_76, %c48_77] : memref<32x64xf32, #tpu.memory_space<vmem>>, vector<16x16xf32>
    tpu.vector_store %arg15[%c16_76, %c48_77], %211 {strides = array<i32>} : memref<32x64xf32, #tpu.memory_space<vmem>>, vector<16x16xf32>,
    %c0_78 = arith.constant 0 : index
    %c0_79 = arith.constant 0 : index
    %213 = vector.load %arg15[%c0_78, %c0_79] : memref<32x64xf32, #tpu.memory_space<vmem>>, vector<32x64xf32>
    %214 = arith.truncf %213 : vector<32x64xf32> to vector<32x64xbf16>
    %c0_80 = arith.constant 0 : index
    %c0_81 = arith.constant 0 : index
    %c0_82 = arith.constant 0 : index
    %215 = vector.load %arg7[%c0_80, %c0_81, %c0_82] : memref<2x64x64xbf16, #tpu.memory_space<vmem>>, vector<1x64x64xbf16>
    %216 = vector.shape_cast %215 : vector<1x64x64xbf16> to vector<64x64xbf16>
    %cst_83 = arith.constant dense<0.000000e+00> : vector<32x64xf32>
    %217 = tpu.matmul %214, %216, %cst_83 {dimension_numbers = #tpu.dot_dimension_numbers<[1], [0], [0], [1], [0, 0, 1, 1], [], []>} : vector<32x64xbf16>, vector<64x64xbf16>, vector<32x64xf32> -> vector<32x64xf32>
    %218 = arith.addf %16, %217 : vector<32x64xf32>
    %219 = arith.truncf %218 : vector<32x64xf32> to vector<32x64xbf16>
    %220 = arith.extf %219 : vector<32x64xbf16> to vector<32x64xf32>
    %221 = arith.mulf %220, %220 : vector<32x64xf32>
    %cst_84 = arith.constant dense<0.000000e+00> : vector<32xf32>
    %222 = vector.multi_reduction <add>, %221, %cst_84 [1] : vector<32x64xf32> to vector<32xf32>
    %223 = vector.shape_cast %222 : vector<32xf32> to vector<32x1xf32>
    %cst_85 = arith.constant 6.400000e+01 : f32
    %224 = vector.broadcast %cst_85 : f32 to vector<32x1xf32>
    %225 = arith.divf %223, %224 : vector<32x1xf32>
    %cst_86 = arith.constant 9.99999974E-6 : f32
    %226 = vector.broadcast %cst_86 : f32 to vector<32x1xf32>
    %227 = arith.addf %225, %226 : vector<32x1xf32>
    %228 = math.rsqrt %227 : vector<32x1xf32>
    %229 = vector.broadcast %228 : vector<32x1xf32> to vector<32x64xf32>
    %230 = arith.mulf %220, %229 : vector<32x64xf32>
    %c0_87 = arith.constant 0 : index
    %c0_88 = arith.constant 0 : index
    %c0_89 = arith.constant 0 : index
    %231 = vector.load %arg5[%c0_87, %c0_88, %c0_89] : memref<2x1x64xbf16, #tpu.memory_space<vmem>>, vector<1x1x64xbf16>
    %232 = vector.shape_cast %231 : vector<1x1x64xbf16> to vector<1x64xbf16>
    %233 = arith.extf %232 : vector<1x64xbf16> to vector<1x64xf32>
    %234 = vector.broadcast %233 : vector<1x64xf32> to vector<32x64xf32>
    %235 = arith.mulf %230, %234 : vector<32x64xf32>
    %236 = arith.truncf %235 : vector<32x64xf32> to vector<32x64xbf16>
    %c0_90 = arith.constant 0 : index
    %c0_91 = arith.constant 0 : index
    %c0_92 = arith.constant 0 : index
    %237 = vector.load %arg8[%c0_90, %c0_91, %c0_92] : memref<2x64x8xbf16, #tpu.memory_space<vmem>>, vector<1x64x8xbf16>
    %238 = vector.shape_cast %237 : vector<1x64x8xbf16> to vector<64x8xbf16>
    %cst_93 = arith.constant dense<0.000000e+00> : vector<32x8xf32>
    %239 = tpu.matmul %236, %238, %cst_93 {dimension_numbers = #tpu.dot_dimension_numbers<[1], [0], [0], [1], [0, 0, 1, 1], [], []>} : vector<32x64xbf16>, vector<64x8xbf16>, vector<32x8xf32> -> vector<32x8xf32>
    %240 = arith.truncf %239 : vector<32x8xf32> to vector<32x8xbf16>
    %241 = arith.extf %240 : vector<32x8xbf16> to vector<32x8xf32>
    %cst_94 = arith.constant dense<0xFF800000> : vector<32xf32>
    %242 = vector.multi_reduction <maximumf>, %241, %cst_94 [1] : vector<32x8xf32> to vector<32xf32>
    %243 = vector.shape_cast %242 : vector<32xf32> to vector<32x1xf32>
    %244 = vector.broadcast %243 : vector<32x1xf32> to vector<32x8xf32>
    %245 = arith.subf %241, %244 : vector<32x8xf32>
    %246 = math.exp %245 : vector<32x8xf32>
    %cst_95 = arith.constant dense<0.000000e+00> : vector<32xf32>
    %247 = vector.multi_reduction <add>, %246, %cst_95 [1] : vector<32x8xf32> to vector<32xf32>
    %248 = vector.shape_cast %247 : vector<32xf32> to vector<32x1xf32>
    %249 = vector.broadcast %248 : vector<32x1xf32> to vector<32x8xf32>
    %250 = arith.divf %246, %249 : vector<32x8xf32>
    %cst_96 = arith.constant 0.000000e+00 : f32
    %251 = vector.broadcast %cst_96 : f32 to vector<32x8xf32>
    %cst_97 = arith.constant 0.000000e+00 : f32
    %252 = vector.broadcast %cst_97 : f32 to vector<32x1xf32>
    %cst_98 = arith.constant dense<0xFF800000> : vector<32xf32>
    %253 = vector.multi_reduction <maximumf>, %250, %cst_98 [1] : vector<32x8xf32> to vector<32xf32>
    %254 = vector.shape_cast %253 : vector<32xf32> to vector<32x1xf32>
    %255 = vector.broadcast %254 : vector<32x1xf32> to vector<32x8xf32>
    %256 = arith.cmpf oeq, %250, %255 : vector<32x8xf32>
    %c8_i32 = arith.constant 8 : i32
    %257 = vector.broadcast %c8_i32 : i32 to vector<32x8xi32>
    %258 = arith.select %256, %13, %257 : vector<32x8xi1>, vector<32x8xi32>
    %cst_99 = arith.constant dense<2147483647> : vector<32xi32>
    %259 = vector.multi_reduction <minsi>, %258, %cst_99 [1] : vector<32x8xi32> to vector<32xi32>
    %260 = vector.shape_cast %259 : vector<32xi32> to vector<32x1xi32>
    %261 = vector.broadcast %260 : vector<32x1xi32> to vector<32x8xi32>
    %262 = arith.cmpi eq, %13, %261 : vector<32x8xi32>
    %263 = vector.shape_cast %254 : vector<32x1xf32> to vector<32x1xf32>
    %264 = vector.broadcast %263 : vector<32x1xf32> to vector<32x8xf32>
    %265 = arith.select %262, %264, %251 : vector<32x8xi1>, vector<32x8xf32>
    %266 = arith.addf %252, %254 : vector<32x1xf32>
    %cst_100 = arith.constant -1.000000e+00 : f32
    %267 = vector.broadcast %cst_100 : f32 to vector<32x8xf32>
    %268 = arith.select %262, %267, %250 : vector<32x8xi1>, vector<32x8xf32>
    %cst_101 = arith.constant dense<0xFF800000> : vector<32xf32>
    %269 = vector.multi_reduction <maximumf>, %268, %cst_101 [1] : vector<32x8xf32> to vector<32xf32>
    %270 = vector.shape_cast %269 : vector<32xf32> to vector<32x1xf32>
    %271 = vector.broadcast %270 : vector<32x1xf32> to vector<32x8xf32>
    %272 = arith.cmpf oeq, %268, %271 : vector<32x8xf32>
    %c8_i32_102 = arith.constant 8 : i32
    %273 = vector.broadcast %c8_i32_102 : i32 to vector<32x8xi32>
    %274 = arith.select %272, %13, %273 : vector<32x8xi1>, vector<32x8xi32>
    %cst_103 = arith.constant dense<2147483647> : vector<32xi32>
    %275 = vector.multi_reduction <minsi>, %274, %cst_103 [1] : vector<32x8xi32> to vector<32xi32>
    %276 = vector.shape_cast %275 : vector<32xi32> to vector<32x1xi32>
    %277 = vector.broadcast %276 : vector<32x1xi32> to vector<32x8xi32>
    %278 = arith.cmpi eq, %13, %277 : vector<32x8xi32>
    %279 = vector.shape_cast %270 : vector<32x1xf32> to vector<32x1xf32>
    %280 = vector.broadcast %279 : vector<32x1xf32> to vector<32x8xf32>
    %281 = arith.select %278, %280, %265 : vector<32x8xi1>, vector<32x8xf32>
    %282 = arith.addf %266, %270 : vector<32x1xf32>
    %283 = vector.broadcast %282 : vector<32x1xf32> to vector<32x8xf32>
    %284 = arith.divf %281, %283 : vector<32x8xf32>
    %285 = arith.truncf %284 : vector<32x8xf32> to vector<32x8xbf16>
    %c0_104 = arith.constant 0 : index
    %c0_105 = arith.constant 0 : index
    %c0_106 = arith.constant 0 : index
    %286 = vector.load %arg9[%c0_104, %c0_105, %c0_106] : memref<2x64x1024xbf16, #tpu.memory_space<vmem>>, vector<1x64x1024xbf16>
    %287 = vector.shape_cast %286 : vector<1x64x1024xbf16> to vector<64x1024xbf16>
    %cst_107 = arith.constant dense<0.000000e+00> : vector<32x1024xf32>
    %288 = tpu.matmul %236, %287, %cst_107 {dimension_numbers = #tpu.dot_dimension_numbers<[1], [0], [0], [1], [0, 0, 1, 1], [], []>} : vector<32x64xbf16>, vector<64x1024xbf16>, vector<32x1024xf32> -> vector<32x1024xf32>
    %289 = vector.extract_strided_slice %288 {offsets = [0, 0], sizes = [32, 512], strides = [1, 1]} : vector<32x1024xf32> to vector<32x512xf32>
    %290 = vector.extract_strided_slice %288 {offsets = [0, 512], sizes = [32, 512], strides = [1, 1]} : vector<32x1024xf32> to vector<32x512xf32>
    %c0_108 = arith.constant 0 : index
    %c0_109 = arith.constant 0 : index
    %291 = vector.load %arg11[%c0_108, %c0_109] : memref<8x512xbf16, #tpu.memory_space<vmem>>, vector<8x512xbf16>
    %cst_110 = arith.constant dense<0.000000e+00> : vector<32x512xf32>
    %292 = tpu.matmul %285, %291, %cst_110 {dimension_numbers = #tpu.dot_dimension_numbers<[1], [0], [0], [1], [0, 0, 1, 1], [], []>} : vector<32x8xbf16>, vector<8x512xbf16>, vector<32x512xf32> -> vector<32x512xf32>
    %293 = arith.negf %289 : vector<32x512xf32>
    %294 = math.exp %293 : vector<32x512xf32>
    %cst_111 = arith.constant 1.000000e+00 : f32
    %295 = vector.broadcast %cst_111 : f32 to vector<32x512xf32>
    %296 = arith.addf %295, %294 : vector<32x512xf32>
    %297 = arith.divf %295, %296 : vector<32x512xf32>
    %298 = arith.mulf %289, %297 : vector<32x512xf32>
    %299 = arith.mulf %298, %290 : vector<32x512xf32>
    %300 = arith.mulf %299, %292 : vector<32x512xf32>
    %301 = arith.truncf %300 : vector<32x512xf32> to vector<32x512xbf16>
    %c0_112 = arith.constant 0 : index
    %c0_113 = arith.constant 0 : index
    %c0_114 = arith.constant 0 : index
    %302 = vector.load %arg10[%c0_112, %c0_113, %c0_114] : memref<2x512x64xbf16, #tpu.memory_space<vmem>>, vector<1x512x64xbf16>
    %303 = vector.shape_cast %302 : vector<1x512x64xbf16> to vector<512x64xbf16>
    %cst_115 = arith.constant dense<0.000000e+00> : vector<32x64xf32>
    %304 = tpu.matmul %301, %303, %cst_115 {dimension_numbers = #tpu.dot_dimension_numbers<[1], [0], [0], [1], [0, 0, 1, 1], [], []>} : vector<32x512xbf16>, vector<512x64xbf16>, vector<32x64xf32> -> vector<32x64xf32>
    %305 = arith.addf %220, %304 : vector<32x64xf32>
    %306 = arith.truncf %305 : vector<32x64xf32> to vector<32x64xbf16>
    %307 = arith.extf %306 : vector<32x64xbf16> to vector<32x64xf32>
    %308 = arith.mulf %307, %307 : vector<32x64xf32>
    %cst_116 = arith.constant dense<0.000000e+00> : vector<32xf32>
    %309 = vector.multi_reduction <add>, %308, %cst_116 [1] : vector<32x64xf32> to vector<32xf32>
    %310 = vector.shape_cast %309 : vector<32xf32> to vector<32x1xf32>
    %cst_117 = arith.constant 6.400000e+01 : f32
    %311 = vector.broadcast %cst_117 : f32 to vector<32x1xf32>
    %312 = arith.divf %310, %311 : vector<32x1xf32>
    %cst_118 = arith.constant 9.99999974E-6 : f32
    %313 = vector.broadcast %cst_118 : f32 to vector<32x1xf32>
    %314 = arith.addf %312, %313 : vector<32x1xf32>
    %315 = math.rsqrt %314 : vector<32x1xf32>
    %316 = vector.broadcast %315 : vector<32x1xf32> to vector<32x64xf32>
    %317 = arith.mulf %307, %316 : vector<32x64xf32>
    %c1 = arith.constant 1 : index
    %c0_119 = arith.constant 0 : index
    %c0_120 = arith.constant 0 : index
    %318 = vector.load %arg4[%c1, %c0_119, %c0_120] : memref<2x1x64xbf16, #tpu.memory_space<vmem>>, vector<1x1x64xbf16>
    %319 = vector.shape_cast %318 : vector<1x1x64xbf16> to vector<1x64xbf16>
    %320 = arith.extf %319 : vector<1x64xbf16> to vector<1x64xf32>
    %321 = vector.broadcast %320 : vector<1x64xf32> to vector<32x64xf32>
    %322 = arith.mulf %317, %321 : vector<32x64xf32>
    %323 = arith.truncf %322 : vector<32x64xf32> to vector<32x64xbf16>
    %c1_121 = arith.constant 1 : index
    %c0_122 = arith.constant 0 : index
    %c0_123 = arith.constant 0 : index
    %324 = vector.load %arg6[%c1_121, %c0_122, %c0_123] : memref<2x64x224xbf16, #tpu.memory_space<vmem>>, vector<1x64x224xbf16>
    %325 = vector.shape_cast %324 : vector<1x64x224xbf16> to vector<64x224xbf16>
    %cst_124 = arith.constant dense<0.000000e+00> : vector<32x224xf32>
    %326 = tpu.matmul %323, %325, %cst_124 {dimension_numbers = #tpu.dot_dimension_numbers<[1], [0], [0], [1], [0, 0, 1, 1], [], []>} : vector<32x64xbf16>, vector<64x224xbf16>, vector<32x224xf32> -> vector<32x224xf32>
    %327 = vector.extract_strided_slice %326 {offsets = [0, 0], sizes = [32, 96], strides = [1, 1]} : vector<32x224xf32> to vector<32x96xf32>
    %328 = vector.extract_strided_slice %326 {offsets = [0, 96], sizes = [32, 32], strides = [1, 1]} : vector<32x224xf32> to vector<32x32xf32>
    %329 = arith.truncf %328 : vector<32x32xf32> to vector<32x32xbf16>
    %330 = vector.extract_strided_slice %326 {offsets = [0, 128], sizes = [32, 96], strides = [1, 1]} : vector<32x224xf32> to vector<32x96xf32>
    %331 = arith.mulf %327, %14 : vector<32x96xf32>
    %332 = arith.mulf %330, %15 : vector<32x96xf32>
    %333 = arith.addf %331, %332 : vector<32x96xf32>
    %334 = vector.extract_strided_slice %333 {offsets = [0, 0], sizes = [32, 64], strides = [1, 1]} : vector<32x96xf32> to vector<32x64xf32>
    %335 = arith.truncf %334 : vector<32x64xf32> to vector<32x64xbf16>
    %336 = vector.extract_strided_slice %333 {offsets = [0, 64], sizes = [32, 32], strides = [1, 1]} : vector<32x96xf32> to vector<32x32xf32>
    %337 = arith.truncf %336 : vector<32x32xf32> to vector<32x32xbf16>
    %338 = vector.extract_strided_slice %335 {offsets = [0, 0], sizes = [16, 64], strides = [1, 1]} : vector<32x64xbf16> to vector<16x64xbf16>
    %339 = vector.extract_strided_slice %337 {offsets = [0, 0], sizes = [16, 32], strides = [1, 1]} : vector<32x32xbf16> to vector<16x32xbf16>
    %340 = vector.extract_strided_slice %329 {offsets = [0, 0], sizes = [16, 32], strides = [1, 1]} : vector<32x32xbf16> to vector<16x32xbf16>
    %341 = vector.extract_strided_slice %338 {offsets = [0, 0], sizes = [16, 16], strides = [1, 1]} : vector<16x64xbf16> to vector<16x16xbf16>
    %342 = vector.extract_strided_slice %339 {offsets = [0, 0], sizes = [16, 16], strides = [1, 1]} : vector<16x32xbf16> to vector<16x16xbf16>
    %343 = vector.extract_strided_slice %340 {offsets = [0, 0], sizes = [16, 16], strides = [1, 1]} : vector<16x32xbf16> to vector<16x16xbf16>
    %cst_125 = arith.constant dense<0.000000e+00> : vector<16x16xf32>
    %344 = tpu.matmul %341, %342, %cst_125 {dimension_numbers = #tpu.dot_dimension_numbers<[1], [1], [0], [0], [0, 0, 1, 0], [], []>} : vector<16x16xbf16>, vector<16x16xbf16>, vector<16x16xf32> -> vector<16x16xf32>
    %cst_126 = arith.constant 2.500000e-01 : f32
    %345 = vector.broadcast %cst_126 : f32 to vector<16x16xf32>
    %346 = arith.mulf %344, %345 : vector<16x16xf32>
    %cst_127 = arith.constant -1.000000e+30 : f32
    %347 = vector.broadcast %cst_127 : f32 to vector<16x16xf32>
    %348 = arith.select %12, %346, %347 : vector<16x16xi1>, vector<16x16xf32>
    %cst_128 = arith.constant dense<0xFF800000> : vector<16xf32>
    %349 = vector.multi_reduction <maximumf>, %348, %cst_128 [1] : vector<16x16xf32> to vector<16xf32>
    %350 = vector.shape_cast %349 : vector<16xf32> to vector<16x1xf32>
    %351 = vector.broadcast %350 : vector<16x1xf32> to vector<16x16xf32>
    %352 = arith.subf %348, %351 : vector<16x16xf32>
    %353 = math.exp %352 : vector<16x16xf32>
    %cst_129 = arith.constant dense<0.000000e+00> : vector<16xf32>
    %354 = vector.multi_reduction <add>, %353, %cst_129 [1] : vector<16x16xf32> to vector<16xf32>
    %355 = vector.shape_cast %354 : vector<16xf32> to vector<16x1xf32>
    %356 = vector.broadcast %355 : vector<16x1xf32> to vector<16x16xf32>
    %357 = arith.divf %353, %356 : vector<16x16xf32>
    %358 = arith.truncf %357 : vector<16x16xf32> to vector<16x16xbf16>
    %cst_130 = arith.constant dense<0.000000e+00> : vector<16x16xf32>
    %359 = tpu.matmul %358, %343, %cst_130 {dimension_numbers = #tpu.dot_dimension_numbers<[1], [0], [0], [1], [0, 0, 1, 1], [], []>} : vector<16x16xbf16>, vector<16x16xbf16>, vector<16x16xf32> -> vector<16x16xf32>
    %c0_131 = arith.constant 0 : index
    %c0_132 = arith.constant 0 : index
    %360 = vector.load %arg15[%c0_131, %c0_132] : memref<32x64xf32, #tpu.memory_space<vmem>>, vector<16x16xf32>
    tpu.vector_store %arg15[%c0_131, %c0_132], %359 {strides = array<i32>} : memref<32x64xf32, #tpu.memory_space<vmem>>, vector<16x16xf32>,
    %361 = vector.extract_strided_slice %338 {offsets = [0, 16], sizes = [16, 16], strides = [1, 1]} : vector<16x64xbf16> to vector<16x16xbf16>
    %362 = vector.extract_strided_slice %339 {offsets = [0, 0], sizes = [16, 16], strides = [1, 1]} : vector<16x32xbf16> to vector<16x16xbf16>
    %363 = vector.extract_strided_slice %340 {offsets = [0, 0], sizes = [16, 16], strides = [1, 1]} : vector<16x32xbf16> to vector<16x16xbf16>
    %cst_133 = arith.constant dense<0.000000e+00> : vector<16x16xf32>
    %364 = tpu.matmul %361, %362, %cst_133 {dimension_numbers = #tpu.dot_dimension_numbers<[1], [1], [0], [0], [0, 0, 1, 0], [], []>} : vector<16x16xbf16>, vector<16x16xbf16>, vector<16x16xf32> -> vector<16x16xf32>
    %cst_134 = arith.constant 2.500000e-01 : f32
    %365 = vector.broadcast %cst_134 : f32 to vector<16x16xf32>
    %366 = arith.mulf %364, %365 : vector<16x16xf32>
    %cst_135 = arith.constant -1.000000e+30 : f32
    %367 = vector.broadcast %cst_135 : f32 to vector<16x16xf32>
    %368 = arith.select %12, %366, %367 : vector<16x16xi1>, vector<16x16xf32>
    %cst_136 = arith.constant dense<0xFF800000> : vector<16xf32>
    %369 = vector.multi_reduction <maximumf>, %368, %cst_136 [1] : vector<16x16xf32> to vector<16xf32>
    %370 = vector.shape_cast %369 : vector<16xf32> to vector<16x1xf32>
    %371 = vector.broadcast %370 : vector<16x1xf32> to vector<16x16xf32>
    %372 = arith.subf %368, %371 : vector<16x16xf32>
    %373 = math.exp %372 : vector<16x16xf32>
    %cst_137 = arith.constant dense<0.000000e+00> : vector<16xf32>
    %374 = vector.multi_reduction <add>, %373, %cst_137 [1] : vector<16x16xf32> to vector<16xf32>
    %375 = vector.shape_cast %374 : vector<16xf32> to vector<16x1xf32>
    %376 = vector.broadcast %375 : vector<16x1xf32> to vector<16x16xf32>
    %377 = arith.divf %373, %376 : vector<16x16xf32>
    %378 = arith.truncf %377 : vector<16x16xf32> to vector<16x16xbf16>
    %cst_138 = arith.constant dense<0.000000e+00> : vector<16x16xf32>
    %379 = tpu.matmul %378, %363, %cst_138 {dimension_numbers = #tpu.dot_dimension_numbers<[1], [0], [0], [1], [0, 0, 1, 1], [], []>} : vector<16x16xbf16>, vector<16x16xbf16>, vector<16x16xf32> -> vector<16x16xf32>
    %c0_139 = arith.constant 0 : index
    %c16_140 = arith.constant 16 : index
    %380 = vector.load %arg15[%c0_139, %c16_140] : memref<32x64xf32, #tpu.memory_space<vmem>>, vector<16x16xf32>
    tpu.vector_store %arg15[%c0_139, %c16_140], %379 {strides = array<i32>} : memref<32x64xf32, #tpu.memory_space<vmem>>, vector<16x16xf32>,
    %381 = vector.extract_strided_slice %338 {offsets = [0, 32], sizes = [16, 16], strides = [1, 1]} : vector<16x64xbf16> to vector<16x16xbf16>
    %382 = vector.extract_strided_slice %339 {offsets = [0, 16], sizes = [16, 16], strides = [1, 1]} : vector<16x32xbf16> to vector<16x16xbf16>
    %383 = vector.extract_strided_slice %340 {offsets = [0, 16], sizes = [16, 16], strides = [1, 1]} : vector<16x32xbf16> to vector<16x16xbf16>
    %cst_141 = arith.constant dense<0.000000e+00> : vector<16x16xf32>
    %384 = tpu.matmul %381, %382, %cst_141 {dimension_numbers = #tpu.dot_dimension_numbers<[1], [1], [0], [0], [0, 0, 1, 0], [], []>} : vector<16x16xbf16>, vector<16x16xbf16>, vector<16x16xf32> -> vector<16x16xf32>
    %cst_142 = arith.constant 2.500000e-01 : f32
    %385 = vector.broadcast %cst_142 : f32 to vector<16x16xf32>
    %386 = arith.mulf %384, %385 : vector<16x16xf32>
    %cst_143 = arith.constant -1.000000e+30 : f32
    %387 = vector.broadcast %cst_143 : f32 to vector<16x16xf32>
    %388 = arith.select %12, %386, %387 : vector<16x16xi1>, vector<16x16xf32>
    %cst_144 = arith.constant dense<0xFF800000> : vector<16xf32>
    %389 = vector.multi_reduction <maximumf>, %388, %cst_144 [1] : vector<16x16xf32> to vector<16xf32>
    %390 = vector.shape_cast %389 : vector<16xf32> to vector<16x1xf32>
    %391 = vector.broadcast %390 : vector<16x1xf32> to vector<16x16xf32>
    %392 = arith.subf %388, %391 : vector<16x16xf32>
    %393 = math.exp %392 : vector<16x16xf32>
    %cst_145 = arith.constant dense<0.000000e+00> : vector<16xf32>
    %394 = vector.multi_reduction <add>, %393, %cst_145 [1] : vector<16x16xf32> to vector<16xf32>
    %395 = vector.shape_cast %394 : vector<16xf32> to vector<16x1xf32>
    %396 = vector.broadcast %395 : vector<16x1xf32> to vector<16x16xf32>
    %397 = arith.divf %393, %396 : vector<16x16xf32>
    %398 = arith.truncf %397 : vector<16x16xf32> to vector<16x16xbf16>
    %cst_146 = arith.constant dense<0.000000e+00> : vector<16x16xf32>
    %399 = tpu.matmul %398, %383, %cst_146 {dimension_numbers = #tpu.dot_dimension_numbers<[1], [0], [0], [1], [0, 0, 1, 1], [], []>} : vector<16x16xbf16>, vector<16x16xbf16>, vector<16x16xf32> -> vector<16x16xf32>
    %c0_147 = arith.constant 0 : index
    %c32_148 = arith.constant 32 : index
    %400 = vector.load %arg15[%c0_147, %c32_148] : memref<32x64xf32, #tpu.memory_space<vmem>>, vector<16x16xf32>
    tpu.vector_store %arg15[%c0_147, %c32_148], %399 {strides = array<i32>} : memref<32x64xf32, #tpu.memory_space<vmem>>, vector<16x16xf32>,
    %401 = vector.extract_strided_slice %338 {offsets = [0, 48], sizes = [16, 16], strides = [1, 1]} : vector<16x64xbf16> to vector<16x16xbf16>
    %402 = vector.extract_strided_slice %339 {offsets = [0, 16], sizes = [16, 16], strides = [1, 1]} : vector<16x32xbf16> to vector<16x16xbf16>
    %403 = vector.extract_strided_slice %340 {offsets = [0, 16], sizes = [16, 16], strides = [1, 1]} : vector<16x32xbf16> to vector<16x16xbf16>
    %cst_149 = arith.constant dense<0.000000e+00> : vector<16x16xf32>
    %404 = tpu.matmul %401, %402, %cst_149 {dimension_numbers = #tpu.dot_dimension_numbers<[1], [1], [0], [0], [0, 0, 1, 0], [], []>} : vector<16x16xbf16>, vector<16x16xbf16>, vector<16x16xf32> -> vector<16x16xf32>
    %cst_150 = arith.constant 2.500000e-01 : f32
    %405 = vector.broadcast %cst_150 : f32 to vector<16x16xf32>
    %406 = arith.mulf %404, %405 : vector<16x16xf32>
    %cst_151 = arith.constant -1.000000e+30 : f32
    %407 = vector.broadcast %cst_151 : f32 to vector<16x16xf32>
    %408 = arith.select %12, %406, %407 : vector<16x16xi1>, vector<16x16xf32>
    %cst_152 = arith.constant dense<0xFF800000> : vector<16xf32>
    %409 = vector.multi_reduction <maximumf>, %408, %cst_152 [1] : vector<16x16xf32> to vector<16xf32>
    %410 = vector.shape_cast %409 : vector<16xf32> to vector<16x1xf32>
    %411 = vector.broadcast %410 : vector<16x1xf32> to vector<16x16xf32>
    %412 = arith.subf %408, %411 : vector<16x16xf32>
    %413 = math.exp %412 : vector<16x16xf32>
    %cst_153 = arith.constant dense<0.000000e+00> : vector<16xf32>
    %414 = vector.multi_reduction <add>, %413, %cst_153 [1] : vector<16x16xf32> to vector<16xf32>
    %415 = vector.shape_cast %414 : vector<16xf32> to vector<16x1xf32>
    %416 = vector.broadcast %415 : vector<16x1xf32> to vector<16x16xf32>
    %417 = arith.divf %413, %416 : vector<16x16xf32>
    %418 = arith.truncf %417 : vector<16x16xf32> to vector<16x16xbf16>
    %cst_154 = arith.constant dense<0.000000e+00> : vector<16x16xf32>
    %419 = tpu.matmul %418, %403, %cst_154 {dimension_numbers = #tpu.dot_dimension_numbers<[1], [0], [0], [1], [0, 0, 1, 1], [], []>} : vector<16x16xbf16>, vector<16x16xbf16>, vector<16x16xf32> -> vector<16x16xf32>
    %c0_155 = arith.constant 0 : index
    %c48_156 = arith.constant 48 : index
    %420 = vector.load %arg15[%c0_155, %c48_156] : memref<32x64xf32, #tpu.memory_space<vmem>>, vector<16x16xf32>
    tpu.vector_store %arg15[%c0_155, %c48_156], %419 {strides = array<i32>} : memref<32x64xf32, #tpu.memory_space<vmem>>, vector<16x16xf32>,
    %421 = vector.extract_strided_slice %335 {offsets = [16, 0], sizes = [16, 64], strides = [1, 1]} : vector<32x64xbf16> to vector<16x64xbf16>
    %422 = vector.extract_strided_slice %337 {offsets = [16, 0], sizes = [16, 32], strides = [1, 1]} : vector<32x32xbf16> to vector<16x32xbf16>
    %423 = vector.extract_strided_slice %329 {offsets = [16, 0], sizes = [16, 32], strides = [1, 1]} : vector<32x32xbf16> to vector<16x32xbf16>
    %424 = vector.extract_strided_slice %421 {offsets = [0, 0], sizes = [16, 16], strides = [1, 1]} : vector<16x64xbf16> to vector<16x16xbf16>
    %425 = vector.extract_strided_slice %422 {offsets = [0, 0], sizes = [16, 16], strides = [1, 1]} : vector<16x32xbf16> to vector<16x16xbf16>
    %426 = vector.extract_strided_slice %423 {offsets = [0, 0], sizes = [16, 16], strides = [1, 1]} : vector<16x32xbf16> to vector<16x16xbf16>
    %cst_157 = arith.constant dense<0.000000e+00> : vector<16x16xf32>
    %427 = tpu.matmul %424, %425, %cst_157 {dimension_numbers = #tpu.dot_dimension_numbers<[1], [1], [0], [0], [0, 0, 1, 0], [], []>} : vector<16x16xbf16>, vector<16x16xbf16>, vector<16x16xf32> -> vector<16x16xf32>
    %cst_158 = arith.constant 2.500000e-01 : f32
    %428 = vector.broadcast %cst_158 : f32 to vector<16x16xf32>
    %429 = arith.mulf %427, %428 : vector<16x16xf32>
    %cst_159 = arith.constant -1.000000e+30 : f32
    %430 = vector.broadcast %cst_159 : f32 to vector<16x16xf32>
    %431 = arith.select %12, %429, %430 : vector<16x16xi1>, vector<16x16xf32>
    %cst_160 = arith.constant dense<0xFF800000> : vector<16xf32>
    %432 = vector.multi_reduction <maximumf>, %431, %cst_160 [1] : vector<16x16xf32> to vector<16xf32>
    %433 = vector.shape_cast %432 : vector<16xf32> to vector<16x1xf32>
    %434 = vector.broadcast %433 : vector<16x1xf32> to vector<16x16xf32>
    %435 = arith.subf %431, %434 : vector<16x16xf32>
    %436 = math.exp %435 : vector<16x16xf32>
    %cst_161 = arith.constant dense<0.000000e+00> : vector<16xf32>
    %437 = vector.multi_reduction <add>, %436, %cst_161 [1] : vector<16x16xf32> to vector<16xf32>
    %438 = vector.shape_cast %437 : vector<16xf32> to vector<16x1xf32>
    %439 = vector.broadcast %438 : vector<16x1xf32> to vector<16x16xf32>
    %440 = arith.divf %436, %439 : vector<16x16xf32>
    %441 = arith.truncf %440 : vector<16x16xf32> to vector<16x16xbf16>
    %cst_162 = arith.constant dense<0.000000e+00> : vector<16x16xf32>
    %442 = tpu.matmul %441, %426, %cst_162 {dimension_numbers = #tpu.dot_dimension_numbers<[1], [0], [0], [1], [0, 0, 1, 1], [], []>} : vector<16x16xbf16>, vector<16x16xbf16>, vector<16x16xf32> -> vector<16x16xf32>
    %c16_163 = arith.constant 16 : index
    %c0_164 = arith.constant 0 : index
    %443 = vector.load %arg15[%c16_163, %c0_164] : memref<32x64xf32, #tpu.memory_space<vmem>>, vector<16x16xf32>
    tpu.vector_store %arg15[%c16_163, %c0_164], %442 {strides = array<i32>} : memref<32x64xf32, #tpu.memory_space<vmem>>, vector<16x16xf32>,
    %444 = vector.extract_strided_slice %421 {offsets = [0, 16], sizes = [16, 16], strides = [1, 1]} : vector<16x64xbf16> to vector<16x16xbf16>
    %445 = vector.extract_strided_slice %422 {offsets = [0, 0], sizes = [16, 16], strides = [1, 1]} : vector<16x32xbf16> to vector<16x16xbf16>
    %446 = vector.extract_strided_slice %423 {offsets = [0, 0], sizes = [16, 16], strides = [1, 1]} : vector<16x32xbf16> to vector<16x16xbf16>
    %cst_165 = arith.constant dense<0.000000e+00> : vector<16x16xf32>
    %447 = tpu.matmul %444, %445, %cst_165 {dimension_numbers = #tpu.dot_dimension_numbers<[1], [1], [0], [0], [0, 0, 1, 0], [], []>} : vector<16x16xbf16>, vector<16x16xbf16>, vector<16x16xf32> -> vector<16x16xf32>
    %cst_166 = arith.constant 2.500000e-01 : f32
    %448 = vector.broadcast %cst_166 : f32 to vector<16x16xf32>
    %449 = arith.mulf %447, %448 : vector<16x16xf32>
    %cst_167 = arith.constant -1.000000e+30 : f32
    %450 = vector.broadcast %cst_167 : f32 to vector<16x16xf32>
    %451 = arith.select %12, %449, %450 : vector<16x16xi1>, vector<16x16xf32>
    %cst_168 = arith.constant dense<0xFF800000> : vector<16xf32>
    %452 = vector.multi_reduction <maximumf>, %451, %cst_168 [1] : vector<16x16xf32> to vector<16xf32>
    %453 = vector.shape_cast %452 : vector<16xf32> to vector<16x1xf32>
    %454 = vector.broadcast %453 : vector<16x1xf32> to vector<16x16xf32>
    %455 = arith.subf %451, %454 : vector<16x16xf32>
    %456 = math.exp %455 : vector<16x16xf32>
    %cst_169 = arith.constant dense<0.000000e+00> : vector<16xf32>
    %457 = vector.multi_reduction <add>, %456, %cst_169 [1] : vector<16x16xf32> to vector<16xf32>
    %458 = vector.shape_cast %457 : vector<16xf32> to vector<16x1xf32>
    %459 = vector.broadcast %458 : vector<16x1xf32> to vector<16x16xf32>
    %460 = arith.divf %456, %459 : vector<16x16xf32>
    %461 = arith.truncf %460 : vector<16x16xf32> to vector<16x16xbf16>
    %cst_170 = arith.constant dense<0.000000e+00> : vector<16x16xf32>
    %462 = tpu.matmul %461, %446, %cst_170 {dimension_numbers = #tpu.dot_dimension_numbers<[1], [0], [0], [1], [0, 0, 1, 1], [], []>} : vector<16x16xbf16>, vector<16x16xbf16>, vector<16x16xf32> -> vector<16x16xf32>
    %c16_171 = arith.constant 16 : index
    %c16_172 = arith.constant 16 : index
    %463 = vector.load %arg15[%c16_171, %c16_172] : memref<32x64xf32, #tpu.memory_space<vmem>>, vector<16x16xf32>
    tpu.vector_store %arg15[%c16_171, %c16_172], %462 {strides = array<i32>} : memref<32x64xf32, #tpu.memory_space<vmem>>, vector<16x16xf32>,
    %464 = vector.extract_strided_slice %421 {offsets = [0, 32], sizes = [16, 16], strides = [1, 1]} : vector<16x64xbf16> to vector<16x16xbf16>
    %465 = vector.extract_strided_slice %422 {offsets = [0, 16], sizes = [16, 16], strides = [1, 1]} : vector<16x32xbf16> to vector<16x16xbf16>
    %466 = vector.extract_strided_slice %423 {offsets = [0, 16], sizes = [16, 16], strides = [1, 1]} : vector<16x32xbf16> to vector<16x16xbf16>
    %cst_173 = arith.constant dense<0.000000e+00> : vector<16x16xf32>
    %467 = tpu.matmul %464, %465, %cst_173 {dimension_numbers = #tpu.dot_dimension_numbers<[1], [1], [0], [0], [0, 0, 1, 0], [], []>} : vector<16x16xbf16>, vector<16x16xbf16>, vector<16x16xf32> -> vector<16x16xf32>
    %cst_174 = arith.constant 2.500000e-01 : f32
    %468 = vector.broadcast %cst_174 : f32 to vector<16x16xf32>
    %469 = arith.mulf %467, %468 : vector<16x16xf32>
    %cst_175 = arith.constant -1.000000e+30 : f32
    %470 = vector.broadcast %cst_175 : f32 to vector<16x16xf32>
    %471 = arith.select %12, %469, %470 : vector<16x16xi1>, vector<16x16xf32>
    %cst_176 = arith.constant dense<0xFF800000> : vector<16xf32>
    %472 = vector.multi_reduction <maximumf>, %471, %cst_176 [1] : vector<16x16xf32> to vector<16xf32>
    %473 = vector.shape_cast %472 : vector<16xf32> to vector<16x1xf32>
    %474 = vector.broadcast %473 : vector<16x1xf32> to vector<16x16xf32>
    %475 = arith.subf %471, %474 : vector<16x16xf32>
    %476 = math.exp %475 : vector<16x16xf32>
    %cst_177 = arith.constant dense<0.000000e+00> : vector<16xf32>
    %477 = vector.multi_reduction <add>, %476, %cst_177 [1] : vector<16x16xf32> to vector<16xf32>
    %478 = vector.shape_cast %477 : vector<16xf32> to vector<16x1xf32>
    %479 = vector.broadcast %478 : vector<16x1xf32> to vector<16x16xf32>
    %480 = arith.divf %476, %479 : vector<16x16xf32>
    %481 = arith.truncf %480 : vector<16x16xf32> to vector<16x16xbf16>
    %cst_178 = arith.constant dense<0.000000e+00> : vector<16x16xf32>
    %482 = tpu.matmul %481, %466, %cst_178 {dimension_numbers = #tpu.dot_dimension_numbers<[1], [0], [0], [1], [0, 0, 1, 1], [], []>} : vector<16x16xbf16>, vector<16x16xbf16>, vector<16x16xf32> -> vector<16x16xf32>
    %c16_179 = arith.constant 16 : index
    %c32_180 = arith.constant 32 : index
    %483 = vector.load %arg15[%c16_179, %c32_180] : memref<32x64xf32, #tpu.memory_space<vmem>>, vector<16x16xf32>
    tpu.vector_store %arg15[%c16_179, %c32_180], %482 {strides = array<i32>} : memref<32x64xf32, #tpu.memory_space<vmem>>, vector<16x16xf32>,
    %484 = vector.extract_strided_slice %421 {offsets = [0, 48], sizes = [16, 16], strides = [1, 1]} : vector<16x64xbf16> to vector<16x16xbf16>
    %485 = vector.extract_strided_slice %422 {offsets = [0, 16], sizes = [16, 16], strides = [1, 1]} : vector<16x32xbf16> to vector<16x16xbf16>
    %486 = vector.extract_strided_slice %423 {offsets = [0, 16], sizes = [16, 16], strides = [1, 1]} : vector<16x32xbf16> to vector<16x16xbf16>
    %cst_181 = arith.constant dense<0.000000e+00> : vector<16x16xf32>
    %487 = tpu.matmul %484, %485, %cst_181 {dimension_numbers = #tpu.dot_dimension_numbers<[1], [1], [0], [0], [0, 0, 1, 0], [], []>} : vector<16x16xbf16>, vector<16x16xbf16>, vector<16x16xf32> -> vector<16x16xf32>
    %cst_182 = arith.constant 2.500000e-01 : f32
    %488 = vector.broadcast %cst_182 : f32 to vector<16x16xf32>
    %489 = arith.mulf %487, %488 : vector<16x16xf32>
    %cst_183 = arith.constant -1.000000e+30 : f32
    %490 = vector.broadcast %cst_183 : f32 to vector<16x16xf32>
    %491 = arith.select %12, %489, %490 : vector<16x16xi1>, vector<16x16xf32>
    %cst_184 = arith.constant dense<0xFF800000> : vector<16xf32>
    %492 = vector.multi_reduction <maximumf>, %491, %cst_184 [1] : vector<16x16xf32> to vector<16xf32>
    %493 = vector.shape_cast %492 : vector<16xf32> to vector<16x1xf32>
    %494 = vector.broadcast %493 : vector<16x1xf32> to vector<16x16xf32>
    %495 = arith.subf %491, %494 : vector<16x16xf32>
    %496 = math.exp %495 : vector<16x16xf32>
    %cst_185 = arith.constant dense<0.000000e+00> : vector<16xf32>
    %497 = vector.multi_reduction <add>, %496, %cst_185 [1] : vector<16x16xf32> to vector<16xf32>
    %498 = vector.shape_cast %497 : vector<16xf32> to vector<16x1xf32>
    %499 = vector.broadcast %498 : vector<16x1xf32> to vector<16x16xf32>
    %500 = arith.divf %496, %499 : vector<16x16xf32>
    %501 = arith.truncf %500 : vector<16x16xf32> to vector<16x16xbf16>
    %cst_186 = arith.constant dense<0.000000e+00> : vector<16x16xf32>
    %502 = tpu.matmul %501, %486, %cst_186 {dimension_numbers = #tpu.dot_dimension_numbers<[1], [0], [0], [1], [0, 0, 1, 1], [], []>} : vector<16x16xbf16>, vector<16x16xbf16>, vector<16x16xf32> -> vector<16x16xf32>
    %c16_187 = arith.constant 16 : index
    %c48_188 = arith.constant 48 : index
    %503 = vector.load %arg15[%c16_187, %c48_188] : memref<32x64xf32, #tpu.memory_space<vmem>>, vector<16x16xf32>
    tpu.vector_store %arg15[%c16_187, %c48_188], %502 {strides = array<i32>} : memref<32x64xf32, #tpu.memory_space<vmem>>, vector<16x16xf32>,
    %c0_189 = arith.constant 0 : index
    %c0_190 = arith.constant 0 : index
    %504 = vector.load %arg15[%c0_189, %c0_190] : memref<32x64xf32, #tpu.memory_space<vmem>>, vector<32x64xf32>
    %505 = arith.truncf %504 : vector<32x64xf32> to vector<32x64xbf16>
    %c1_191 = arith.constant 1 : index
    %c0_192 = arith.constant 0 : index
    %c0_193 = arith.constant 0 : index
    %506 = vector.load %arg7[%c1_191, %c0_192, %c0_193] : memref<2x64x64xbf16, #tpu.memory_space<vmem>>, vector<1x64x64xbf16>
    %507 = vector.shape_cast %506 : vector<1x64x64xbf16> to vector<64x64xbf16>
    %cst_194 = arith.constant dense<0.000000e+00> : vector<32x64xf32>
    %508 = tpu.matmul %505, %507, %cst_194 {dimension_numbers = #tpu.dot_dimension_numbers<[1], [0], [0], [1], [0, 0, 1, 1], [], []>} : vector<32x64xbf16>, vector<64x64xbf16>, vector<32x64xf32> -> vector<32x64xf32>
    %509 = arith.addf %307, %508 : vector<32x64xf32>
    %510 = arith.truncf %509 : vector<32x64xf32> to vector<32x64xbf16>
    %511 = arith.extf %510 : vector<32x64xbf16> to vector<32x64xf32>
    %512 = arith.mulf %511, %511 : vector<32x64xf32>
    %cst_195 = arith.constant dense<0.000000e+00> : vector<32xf32>
    %513 = vector.multi_reduction <add>, %512, %cst_195 [1] : vector<32x64xf32> to vector<32xf32>
    %514 = vector.shape_cast %513 : vector<32xf32> to vector<32x1xf32>
    %cst_196 = arith.constant 6.400000e+01 : f32
    %515 = vector.broadcast %cst_196 : f32 to vector<32x1xf32>
    %516 = arith.divf %514, %515 : vector<32x1xf32>
    %cst_197 = arith.constant 9.99999974E-6 : f32
    %517 = vector.broadcast %cst_197 : f32 to vector<32x1xf32>
    %518 = arith.addf %516, %517 : vector<32x1xf32>
    %519 = math.rsqrt %518 : vector<32x1xf32>
    %520 = vector.broadcast %519 : vector<32x1xf32> to vector<32x64xf32>
    %521 = arith.mulf %511, %520 : vector<32x64xf32>
    %c1_198 = arith.constant 1 : index
    %c0_199 = arith.constant 0 : index
    %c0_200 = arith.constant 0 : index
    %522 = vector.load %arg5[%c1_198, %c0_199, %c0_200] : memref<2x1x64xbf16, #tpu.memory_space<vmem>>, vector<1x1x64xbf16>
    %523 = vector.shape_cast %522 : vector<1x1x64xbf16> to vector<1x64xbf16>
    %524 = arith.extf %523 : vector<1x64xbf16> to vector<1x64xf32>
    %525 = vector.broadcast %524 : vector<1x64xf32> to vector<32x64xf32>
    %526 = arith.mulf %521, %525 : vector<32x64xf32>
    %527 = arith.truncf %526 : vector<32x64xf32> to vector<32x64xbf16>
    %c1_201 = arith.constant 1 : index
    %c0_202 = arith.constant 0 : index
    %c0_203 = arith.constant 0 : index
    %528 = vector.load %arg8[%c1_201, %c0_202, %c0_203] : memref<2x64x8xbf16, #tpu.memory_space<vmem>>, vector<1x64x8xbf16>
    %529 = vector.shape_cast %528 : vector<1x64x8xbf16> to vector<64x8xbf16>
    %cst_204 = arith.constant dense<0.000000e+00> : vector<32x8xf32>
    %530 = tpu.matmul %527, %529, %cst_204 {dimension_numbers = #tpu.dot_dimension_numbers<[1], [0], [0], [1], [0, 0, 1, 1], [], []>} : vector<32x64xbf16>, vector<64x8xbf16>, vector<32x8xf32> -> vector<32x8xf32>
    %531 = arith.truncf %530 : vector<32x8xf32> to vector<32x8xbf16>
    %532 = arith.extf %531 : vector<32x8xbf16> to vector<32x8xf32>
    %cst_205 = arith.constant dense<0xFF800000> : vector<32xf32>
    %533 = vector.multi_reduction <maximumf>, %532, %cst_205 [1] : vector<32x8xf32> to vector<32xf32>
    %534 = vector.shape_cast %533 : vector<32xf32> to vector<32x1xf32>
    %535 = vector.broadcast %534 : vector<32x1xf32> to vector<32x8xf32>
    %536 = arith.subf %532, %535 : vector<32x8xf32>
    %537 = math.exp %536 : vector<32x8xf32>
    %cst_206 = arith.constant dense<0.000000e+00> : vector<32xf32>
    %538 = vector.multi_reduction <add>, %537, %cst_206 [1] : vector<32x8xf32> to vector<32xf32>
    %539 = vector.shape_cast %538 : vector<32xf32> to vector<32x1xf32>
    %540 = vector.broadcast %539 : vector<32x1xf32> to vector<32x8xf32>
    %541 = arith.divf %537, %540 : vector<32x8xf32>
    %cst_207 = arith.constant 0.000000e+00 : f32
    %542 = vector.broadcast %cst_207 : f32 to vector<32x8xf32>
    %cst_208 = arith.constant 0.000000e+00 : f32
    %543 = vector.broadcast %cst_208 : f32 to vector<32x1xf32>
    %cst_209 = arith.constant dense<0xFF800000> : vector<32xf32>
    %544 = vector.multi_reduction <maximumf>, %541, %cst_209 [1] : vector<32x8xf32> to vector<32xf32>
    %545 = vector.shape_cast %544 : vector<32xf32> to vector<32x1xf32>
    %546 = vector.broadcast %545 : vector<32x1xf32> to vector<32x8xf32>
    %547 = arith.cmpf oeq, %541, %546 : vector<32x8xf32>
    %c8_i32_210 = arith.constant 8 : i32
    %548 = vector.broadcast %c8_i32_210 : i32 to vector<32x8xi32>
    %549 = arith.select %547, %13, %548 : vector<32x8xi1>, vector<32x8xi32>
    %cst_211 = arith.constant dense<2147483647> : vector<32xi32>
    %550 = vector.multi_reduction <minsi>, %549, %cst_211 [1] : vector<32x8xi32> to vector<32xi32>
    %551 = vector.shape_cast %550 : vector<32xi32> to vector<32x1xi32>
    %552 = vector.broadcast %551 : vector<32x1xi32> to vector<32x8xi32>
    %553 = arith.cmpi eq, %13, %552 : vector<32x8xi32>
    %554 = vector.shape_cast %545 : vector<32x1xf32> to vector<32x1xf32>
    %555 = vector.broadcast %554 : vector<32x1xf32> to vector<32x8xf32>
    %556 = arith.select %553, %555, %542 : vector<32x8xi1>, vector<32x8xf32>
    %557 = arith.addf %543, %545 : vector<32x1xf32>
    %cst_212 = arith.constant -1.000000e+00 : f32
    %558 = vector.broadcast %cst_212 : f32 to vector<32x8xf32>
    %559 = arith.select %553, %558, %541 : vector<32x8xi1>, vector<32x8xf32>
    %cst_213 = arith.constant dense<0xFF800000> : vector<32xf32>
    %560 = vector.multi_reduction <maximumf>, %559, %cst_213 [1] : vector<32x8xf32> to vector<32xf32>
    %561 = vector.shape_cast %560 : vector<32xf32> to vector<32x1xf32>
    %562 = vector.broadcast %561 : vector<32x1xf32> to vector<32x8xf32>
    %563 = arith.cmpf oeq, %559, %562 : vector<32x8xf32>
    %c8_i32_214 = arith.constant 8 : i32
    %564 = vector.broadcast %c8_i32_214 : i32 to vector<32x8xi32>
    %565 = arith.select %563, %13, %564 : vector<32x8xi1>, vector<32x8xi32>
    %cst_215 = arith.constant dense<2147483647> : vector<32xi32>
    %566 = vector.multi_reduction <minsi>, %565, %cst_215 [1] : vector<32x8xi32> to vector<32xi32>
    %567 = vector.shape_cast %566 : vector<32xi32> to vector<32x1xi32>
    %568 = vector.broadcast %567 : vector<32x1xi32> to vector<32x8xi32>
    %569 = arith.cmpi eq, %13, %568 : vector<32x8xi32>
    %570 = vector.shape_cast %561 : vector<32x1xf32> to vector<32x1xf32>
    %571 = vector.broadcast %570 : vector<32x1xf32> to vector<32x8xf32>
    %572 = arith.select %569, %571, %556 : vector<32x8xi1>, vector<32x8xf32>
    %573 = arith.addf %557, %561 : vector<32x1xf32>
    %574 = vector.broadcast %573 : vector<32x1xf32> to vector<32x8xf32>
    %575 = arith.divf %572, %574 : vector<32x8xf32>
    %576 = arith.truncf %575 : vector<32x8xf32> to vector<32x8xbf16>
    %c1_216 = arith.constant 1 : index
    %c0_217 = arith.constant 0 : index
    %c0_218 = arith.constant 0 : index
    %577 = vector.load %arg9[%c1_216, %c0_217, %c0_218] : memref<2x64x1024xbf16, #tpu.memory_space<vmem>>, vector<1x64x1024xbf16>
    %578 = vector.shape_cast %577 : vector<1x64x1024xbf16> to vector<64x1024xbf16>
    %cst_219 = arith.constant dense<0.000000e+00> : vector<32x1024xf32>
    %579 = tpu.matmul %527, %578, %cst_219 {dimension_numbers = #tpu.dot_dimension_numbers<[1], [0], [0], [1], [0, 0, 1, 1], [], []>} : vector<32x64xbf16>, vector<64x1024xbf16>, vector<32x1024xf32> -> vector<32x1024xf32>
    %580 = vector.extract_strided_slice %579 {offsets = [0, 0], sizes = [32, 512], strides = [1, 1]} : vector<32x1024xf32> to vector<32x512xf32>
    %581 = vector.extract_strided_slice %579 {offsets = [0, 512], sizes = [32, 512], strides = [1, 1]} : vector<32x1024xf32> to vector<32x512xf32>
    %c0_220 = arith.constant 0 : index
    %c0_221 = arith.constant 0 : index
    %582 = vector.load %arg11[%c0_220, %c0_221] : memref<8x512xbf16, #tpu.memory_space<vmem>>, vector<8x512xbf16>
    %cst_222 = arith.constant dense<0.000000e+00> : vector<32x512xf32>
    %583 = tpu.matmul %576, %582, %cst_222 {dimension_numbers = #tpu.dot_dimension_numbers<[1], [0], [0], [1], [0, 0, 1, 1], [], []>} : vector<32x8xbf16>, vector<8x512xbf16>, vector<32x512xf32> -> vector<32x512xf32>
    %584 = arith.negf %580 : vector<32x512xf32>
    %585 = math.exp %584 : vector<32x512xf32>
    %cst_223 = arith.constant 1.000000e+00 : f32
    %586 = vector.broadcast %cst_223 : f32 to vector<32x512xf32>
    %587 = arith.addf %586, %585 : vector<32x512xf32>
    %588 = arith.divf %586, %587 : vector<32x512xf32>
    %589 = arith.mulf %580, %588 : vector<32x512xf32>
    %590 = arith.mulf %589, %581 : vector<32x512xf32>
    %591 = arith.mulf %590, %583 : vector<32x512xf32>
    %592 = arith.truncf %591 : vector<32x512xf32> to vector<32x512xbf16>
    %c1_224 = arith.constant 1 : index
    %c0_225 = arith.constant 0 : index
    %c0_226 = arith.constant 0 : index
    %593 = vector.load %arg10[%c1_224, %c0_225, %c0_226] : memref<2x512x64xbf16, #tpu.memory_space<vmem>>, vector<1x512x64xbf16>
    %594 = vector.shape_cast %593 : vector<1x512x64xbf16> to vector<512x64xbf16>
    %cst_227 = arith.constant dense<0.000000e+00> : vector<32x64xf32>
    %595 = tpu.matmul %592, %594, %cst_227 {dimension_numbers = #tpu.dot_dimension_numbers<[1], [0], [0], [1], [0, 0, 1, 1], [], []>} : vector<32x512xbf16>, vector<512x64xbf16>, vector<32x64xf32> -> vector<32x64xf32>
    %596 = arith.addf %511, %595 : vector<32x64xf32>
    %597 = arith.truncf %596 : vector<32x64xf32> to vector<32x64xbf16>
    %598 = arith.extf %597 : vector<32x64xbf16> to vector<32x64xf32>
    %599 = arith.mulf %598, %598 : vector<32x64xf32>
    %cst_228 = arith.constant dense<0.000000e+00> : vector<32xf32>
    %600 = vector.multi_reduction <add>, %599, %cst_228 [1] : vector<32x64xf32> to vector<32xf32>
    %601 = vector.shape_cast %600 : vector<32xf32> to vector<32x1xf32>
    %cst_229 = arith.constant 6.400000e+01 : f32
    %602 = vector.broadcast %cst_229 : f32 to vector<32x1xf32>
    %603 = arith.divf %601, %602 : vector<32x1xf32>
    %cst_230 = arith.constant 9.99999974E-6 : f32
    %604 = vector.broadcast %cst_230 : f32 to vector<32x1xf32>
    %605 = arith.addf %603, %604 : vector<32x1xf32>
    %606 = math.rsqrt %605 : vector<32x1xf32>
    %607 = vector.broadcast %606 : vector<32x1xf32> to vector<32x64xf32>
    %608 = arith.mulf %598, %607 : vector<32x64xf32>
    %c0_231 = arith.constant 0 : index
    %c0_232 = arith.constant 0 : index
    %609 = vector.load %arg12[%c0_231, %c0_232] : memref<1x64xbf16, #tpu.memory_space<vmem>>, vector<1x64xbf16>
    %610 = arith.extf %609 : vector<1x64xbf16> to vector<1x64xf32>
    %611 = vector.broadcast %610 : vector<1x64xf32> to vector<32x64xf32>
    %612 = arith.mulf %608, %611 : vector<32x64xf32>
    %613 = arith.truncf %612 : vector<32x64xf32> to vector<32x64xbf16>
    %c0_233 = arith.constant 0 : index
    %c0_234 = arith.constant 0 : index
    %614 = vector.load %arg13[%c0_233, %c0_234] : memref<64x128xbf16, #tpu.memory_space<vmem>>, vector<64x128xbf16>
    %cst_235 = arith.constant dense<0.000000e+00> : vector<32x128xf32>
    %615 = tpu.matmul %613, %614, %cst_235 {dimension_numbers = #tpu.dot_dimension_numbers<[1], [0], [0], [1], [0, 0, 1, 1], [], []>} : vector<32x64xbf16>, vector<64x128xbf16>, vector<32x128xf32> -> vector<32x128xf32>
    %616 = arith.truncf %615 : vector<32x128xf32> to vector<32x128xbf16>
    %c0_236 = arith.constant 0 : index
    %c0_237 = arith.constant 0 : index
    %617 = vector.load %arg14[%c0_236, %c0_237] : memref<32x128xbf16, #tpu.memory_space<vmem>>, vector<32x128xbf16>
    tpu.vector_store %arg14[%c0_236, %c0_237], %616 {strides = array<i32>} : memref<32x128xbf16, #tpu.memory_space<vmem>>, vector<32x128xbf16>,
    return
  }
}

</mosaic_0001>

<bundles_post_ra>
// kernel: forward.1
= control target key start
LH: loop header
LB: loop body
LE: loop exit
PB: predicated region body
PF: predicated region fallthrough
CT: control target
= control target key end

     0   :  { %v7305_v2 = vmov 0   ;;  %s9367_s0 = inlined_call_operand.vmem [shape: s32[32,1], index: 0, kind: input, shape index: {}]   ;;  %s9368_s1 = inlined_call_operand.vmem [shape: bf16[128,64], index: 1, kind: input, shape index: {}]   ;;  %s9369_s2 = inlined_call_operand.vmem [shape: f32[32,96], index: 2, kind: input, shape index: {}]   ;;  %s9370_s3 = inlined_call_operand.vmem [shape: f32[32,96], index: 3, kind: input, shape index: {}]   ;;  %s9371_s4 = inlined_call_operand.vmem [shape: bf16[2,1,64], index: 4, kind: input, shape index: {}]   ;;  %s9372_s5 = inlined_call_operand.vmem [shape: bf16[2,1,64], index: 5, kind: input, shape index: {}]   ;;  %s9373_s6 = inlined_call_operand.vmem [shape: bf16[2,64,224], index: 6, kind: input, shape index: {}]   ;;  %s9374_s7 = inlined_call_operand.vmem [shape: bf16[2,64,64], index: 7, kind: input, shape index: {}]   ;;  %s9375_s8 = inlined_call_operand.vmem [shape: bf16[2,64,8], index: 8, kind: input, shape index: {}]   ;;  %s9376_s9 = inlined_call_operand.vmem [shape: bf16[2,64,1024], index: 9, kind: input, shape index: {}]   ;;  %s9377_s10 = inlined_call_operand.vmem [shape: bf16[2,512,64], index: 10, kind: input, shape index: {}]   ;;  %s9378_s11 = inlined_call_operand.vmem [shape: bf16[8,512], index: 11, kind: input, shape index: {}]   ;;  %s9379_s12 = inlined_call_operand.vmem [shape: bf16[1,64], index: 12, kind: input, shape index: {}]   ;;  %s9380_s13 = inlined_call_operand.vmem [shape: bf16[64,128], index: 13, kind: input, shape index: {}]   ;;  %s9381_s14 = inlined_call_operand.hbm [shape: bf16[32,128], index: 14, kind: output, shape index: {}]  }
   0x1   :  { %v51_v0 = vld [vmem:[%s9367_s0 + $0x10] sm:$0xff]  ;;  %v49_v1 = vld [vmem:[%s9367_s0] sm:$0xff]  ;;  %6806 = vset.pattern.permute.xlu1 %v7305_v2  ;;  %6805 = vset.pattern.permute.xlu0 %v7305_v2  ;;  %v52_v3 = vld [vmem:[%s9367_s0 + $0x18] sm:$0xff] }
   0x2   :  { %v50_v4 = vld [vmem:[%s9367_s0 + $0x8] sm:$0xff]  ;;  %62 = vperm.xlu1 %6806, %v51_v0   ;;  %56 = vperm.xlu0 %6805, %v49_v1   ;;  %v6807_v5 = vld [vmem:[%s9368_s1 + $0x38] sm:$0xff]   ;;  %v6808_v6 = vld [vmem:[%s9368_s1 + $0x30] sm:$0xff]  }
   0x3   :  { %345 = vmatprep.mubr.bf16.mxu1 %v7305_v2  ;;  %6520 = vmatprep.subr.bf16.mxu0 %v6807_v5  ;;  %v6809_v7 = vld [vmem:[%s9368_s1 + $0x28] sm:$0xff]   ;;  %v6810_v8 = vld [vmem:[%s9368_s1 + $0x20] sm:$0xff]   ;;  %v6811_v9 = vld [vmem:[%s9368_s1 + $0x18] sm:$0xff]  }
   0x4   :  { %6521 = vmatpush3.bf16.msra.mxu0 %v6807_v5  ;;  %v6812_v10 = vld [vmem:[%s9368_s1 + $0x10] sm:$0xff]   ;;  %v6813_v11 = vld [vmem:[%s9368_s1 + $0x8] sm:$0xff]   ;;  %v6814_v12 = vld [vmem:[%s9368_s1] sm:$0xff]  }
   0x5   :  { %6522 = vmatprep.subr.bf16.mxu0 %v6808_v6 }
   0x6   :  { %65 = vperm.xlu1 %6806, %v52_v3   ;;  %59 = vperm.xlu0 %6805, %v50_v4  }
   0x8   :  { %6523 = vmatpush3.bf16.msra.mxu0 %v6808_v6 }
   0x9   :  { %6524 = vmatprep.subr.bf16.mxu0 %v6809_v7 }
   0xc   :  { %6525 = vmatpush3.bf16.msra.mxu0 %v6809_v7 }
   0xd   :  { %6526 = vmatprep.subr.bf16.mxu0 %v6810_v8 }
  0x10   :  { %6527 = vmatpush3.bf16.msra.mxu0 %v6810_v8 }
  0x11   :  { %6528 = vmatprep.subr.bf16.mxu0 %v6811_v9 }
  0x14   :  { %6529 = vmatpush3.bf16.msra.mxu0 %v6811_v9 }
  0x15   :  { %6530 = vmatprep.subr.bf16.mxu0 %v6812_v10 }
  0x18   :  { %6531 = vmatpush3.bf16.msra.mxu0 %v6812_v10 }
  0x19   :  { %6532 = vmatprep.subr.bf16.mxu0 %v6813_v11 }
  0x1c   :  { %6533 = vmatpush3.bf16.msra.mxu0 %v6813_v11 }
  0x1d   :  { %6534 = vmatprep.subr.bf16.mxu0 %v6814_v12 }
  0x20   :  { %6535 = vmatpush3.bf16.msra.mxu0 %v6814_v12 }
  0x21   :  { %19 = vsyncpa [#allocation4], 0  ;;  %v53_v13 = vlaneseq  ;;  %v7306_v19 = vmov 1.0|1.0   ;;  %vm217_vm6 = vcmask 523264   ;;  %vm7308_vm7 = vmmov 0  }
  0x22   :  { %v6815_v38 = vld [vmem:[%s9373_s6 + $0x34] ss:$8 sps:$4 sm:$0xff]   ;;  %v6817_v39 = vld [vmem:[%s9373_s6 + $0x30] ss:$8 sps:$4 sm:$0xff]   ;;  %v6818_v40 = vld [vmem:[%s9373_s6 + $0x24] ss:$8 sps:$4 sm:$0xff]  }
  0x23   :  { %v7433_v16 = vand.u32 127, %v53_v13  ;;  %321 = vmatprep.subr.bf16.mxu1 %v6815_v38  ;;  %v6820_v41 = vld [vmem:[%s9373_s6 + $0x20] ss:$8 sps:$4 sm:$0xff]   ;;  %v6821_v42 = vld [vmem:[%s9373_s6 + $0x14] ss:$8 sps:$4 sm:$0xff]   ;;  %v7484_v57 = vshrl.u32 %v53_v13, 7 }
  0x24   :  { %322 = vmatpush1.bf16.msra.mxu1 %v6817_v39  ;;  %v6823_v43 = vld [vmem:[%s9373_s6 + $0x10] ss:$8 sps:$4 sm:$0xff]   ;;  %v6824_v44 = vld [vmem:[%s9373_s6 + $0x4] ss:$8 sps:$4 sm:$0xff]   ;;  %v6826_v45 = vld [vmem:[%s9373_s6] ss:$8 sps:$4 sm:$0xff]  }
  0x25   :  { %323 = vmatprep.subr.bf16.mxu1 %v6818_v40  ;;  %v247_v58 = vld [vmem:[%s9371_s4] sm:$0x1]  ;;  %v7490_v61 = vsub.s32 0, %v7484_v57  ;;  %v203_v39 = vld [vmem:[%s9369_s2 + $0x10] sm:$0xff]  ;;  %v204_v40 = vld [vmem:[%s9369_s2 + $0x18] sm:$0xff]  ;;  %s7309_s18 = smov 112   ;;  %vm7580_vm9 = vcmp.le.s32.totalorder %v7433_v16, %v7484_v57 }
  0x26   :  { %v248_v60 = vunpack.c.l.bf16 %v247_v58  ;;  %s7310_s19 = smov 64   ;;  %s7311_s1 = smov 80   ;;  %vm385_vm8 = vcmask 130048   ;;  %vm635_vm11 = vcmask 261248   ;;  %vm771_vm12 = vcmask 392448  }
  0x27   :  { %s7312_s20 = smov 48   ;;  %s7313_s21 = smov 96   ;;  %vm9382_vm13 = vcmask 523648   ;;  %vm1658_vm14 = vcmask 64512  }
  0x28   :  { %324 = vmatpush1.bf16.msra.mxu1 %v6820_v41  ;;  %v252_v62 = vrot.slane %v248_v60, %v7490_v61  ;;  %s7314_s22 = smov 32   ;;  %s7315_s23 = smov 16  }
  0x29   :  { %325 = vmatprep.subr.bf16.mxu1 %v6821_v42  ;;  %v208_v42 = vld [vmem:[%s9370_s3 + $0x18] sm:$0xff] }
  0x2c   :  { %326 = vmatpush1.bf16.msra.mxu1 %v6823_v43 }
  0x2d   :  { %327 = vmatprep.subr.bf16.mxu1 %v6824_v44 }
  0x30   :  { %328 = vmatpush1.bf16.msra.mxu1 %v6826_v45 }
  0x7d   :  { %v63_v14 = vpop.permute.xlu1 %62  ;;  %v57_v15 = vpop.permute.xlu0 %56 }
  0x7e   :  { %vm69_vm0 = vcmp.eq.s32.totalorder %v7433_v16, %v63_v14  ;;  %vm67_vm4 = vcmp.eq.s32.totalorder %v7433_v16, %v57_v15  ;;  %v9383_v15 = vmov 0.0  }
  0x7f   :  { %6540 = vmatprep.subr.bf16.mxu1 %v9383_v15  ;;  %6546 = vmatprep.subr.bf16.mxu0 %v9383_v15 }
  0x81   :  { %v66_v17 = vpop.permute.xlu1 %65  ;;  %v60_v18 = vpop.permute.xlu0 %59 }
  0x82   :  { %vm70_vm1 = vcmp.eq.s32.totalorder %v7433_v16, %v66_v17  ;;  %vm68_vm2 = vcmp.eq.s32.totalorder %v7433_v16, %v60_v18  ;;  %v205_v17 = vld [vmem:[%s9370_s3] sm:$0xff] }
  0x83   :  { %vm5883_vm3 = vmpackc.low %vm70_vm1, %vm69_vm0 }
  0x84   :  { %vm5881_vm5 = vmpackc.low %vm68_vm2, %vm67_vm4 }
  0x85   :  { %6536 = vmatprep.mubr.msk.bf16.mxu0 %vm5881_vm5, %v7306_v19 }
  0x86   :  { %6537 = vmatmul.mubr.msk.bf16.vlgmr.msra.gmra.mxu0 %vm5883_vm3, %v7306_v19  ;;  %v201_v19 = vld [vmem:[%s9369_s2] sm:$0xff] }
  0x87   :  { %6548 = vmatprep.mubr.msk.bf16.mxu0 %vm7308_vm7, %v9383_v15 }
 0x146   :  { %v6538_v20 = vpop.f32.mrf.mxu0 }
 0x148   :  { %v179_v21 = vpop.f32.mrf.mxu0 }
 0x14a   :  { %v6539_v22 = vpop.f32.mrf.mxu0 }
 0x14b   :  { %v195_v23 = vpack.c.bf16 %v6539_v22, %v6538_v20  ;;  %v202_v20 = vld [vmem:[%s9369_s2 + $0x8] sm:$0xff] }
 0x14c   :  { %v182_v24 = vpop.f32.mrf.mxu0  ;;  %v206_v22 = vld [vmem:[%s9370_s3 + $0x8] sm:$0xff] }
 0x14d   :  { %v194_v25 = vpack.c.bf16 %v182_v24, %v179_v21  ;;  %v7439_v26 = vunpack.c.l.bf16 %v195_v23  ;;  %v7449_v31 = vunpack.c.h.bf16 %v195_v23 }
 0x14f   :  { %v7441_v27 = vunpack.c.l.bf16 %v194_v25  ;;  %v7443_v28 = vunpack.c.h.bf16 %v194_v25  ;;  %v215_v34 = vmul.f32 %v7439_v26, %v7439_v26  ;;  %v216_v36 = vmul.f32 %v7449_v31, %v7449_v31 }
 0x151   :  { %v214_v29 = vmul.f32 %v7443_v28, %v7443_v28  ;;  %v213_v30 = vmul.f32 %v7441_v27, %v7441_v27  ;;  %v224_v35 = vsel %vm217_vm6, %v215_v34, 0.0  ;;  %v227_v37 = vsel %vm217_vm6, %v216_v36, 0.0  ;;  %v207_v36 = vld [vmem:[%s9370_s3 + $0x10] sm:$0xff] }
 0x153   :  { %v221_v32 = vsel %vm217_vm6, %v214_v29, 0.0  ;;  %v218_v33 = vsel %vm217_vm6, %v213_v30, 0.0 }
 0x154   :  { %222 = vadd.xlane.f32.xlu1 %v221_v32  ;;  %219 = vadd.xlane.f32.xlu0 %v218_v33 }
 0x158   :  { %225 = vadd.xlane.f32.xlu0 %v224_v35 }
 0x15c   :  { %228 = vadd.xlane.f32.xlu0 %v227_v37 }
 0x1dd   :  { %v223_v46 = vpop.xlane.xlu1 %222  ;;  %v220_v47 = vpop.xlane.xlu0 %219 }
 0x1de   :  { %v232_v48 = vmul.f32 0.015625, %v223_v46  ;;  %v231_v49 = vmul.f32 0.015625, %v220_v47 }
 0x1e0   :  { %v236_v50 = vadd.f32 1e-05, %v232_v48  ;;  %v235_v51 = vadd.f32 1e-05, %v231_v49 }
 0x1e1   :  { %v226_v52 = vpop.xlane.xlu0 %225 }
 0x1e2   :  { %6931 = vrsqrt.f32 %v236_v50  ;;  %v233_v53 = vmul.f32 0.015625, %v226_v52 }
 0x1e3   :  { %6933 = vrsqrt.f32 %v235_v51 }
 0x1e4   :  { %v237_v54 = vadd.f32 1e-05, %v233_v53 }
 0x1e5   :  { %v229_v55 = vpop.xlane.xlu0 %228 }
 0x1e6   :  { %6935 = vrsqrt.f32 %v237_v54  ;;  %v234_v56 = vmul.f32 0.015625, %v229_v55 }
 0x1e8   :  { %v238_v59 = vadd.f32 1e-05, %v234_v56 }
 0x1ea   :  { %6937 = vrsqrt.f32 %v238_v59 }
 0x1ef   :  { %v6932_v63 = vpop.eup %6931 }
 0x1f0   :  { %v6934_v0 = vpop.eup %6933  ;;  %v244_v1 = vmul.f32 %v6932_v63, %v7443_v28 }
 0x1f1   :  { %v243_v3 = vmul.f32 %v6934_v0, %v7441_v27 }
 0x1f2   :  { %v254_v4 = vmul.f32 %v252_v62, %v244_v1 }
 0x1f3   :  { %v6936_v5 = vpop.eup %6935  ;;  %v253_v6 = vmul.f32 %v252_v62, %v243_v3 }
 0x1f4   :  { %v245_v8 = vmul.f32 %v6936_v5, %v7439_v26  ;;  %v198_v5 = vadd.s32 8, %v7484_v57 }
 0x1f5   :  { %v257_v7 = vpack.c.bf16 %v254_v4, %v253_v6 }
 0x1f6   :  { %v255_v11 = vmul.f32 %v252_v62, %v245_v8  ;;  %vm7589_vm10 = vcmp.le.s32.totalorder %v7433_v16, %v198_v5 }
 0x1f7   :  { %v6938_v9 = vpop.eup %6937  ;;  %5893 = vmatmul.mubr.msk.bf16.vlgmr.msra.gmra.mxu1 %vm217_vm6, %v257_v7 }
 0x1f8   :  { %355 = vmatprep.mubr.bf16.mxu1 %v7305_v2  ;;  %v246_v10 = vmul.f32 %v6938_v9, %v7449_v31 }
 0x1fa   :  { %v256_v12 = vmul.f32 %v252_v62, %v246_v10 }
 0x1fc   :  { %v258_v13 = vpack.c.bf16 %v256_v12, %v255_v11 }
 0x1ff   :  { %5894 = vmatmul.mubr.msk.bf16.gmra.mxu1 %vm217_vm6, %v258_v13 }
 0x200   :  { %6542 = vmatprep.mubr.msk.bf16.mxu1 %vm7308_vm7, %v9383_v15 }
 0x2b7   :  { %v347_v14 = vpop.f32.mrf.mxu1 }
 0x2b8   :  { %v368_v29 = vmul.f32 %v347_v14, %v201_v19 }
 0x2b9   :  { %v349_v18 = vpop.f32.mrf.mxu1 }
 0x2ba   :  { %v372_v23 = vmul.f32 %v349_v18, %v205_v17 }
 0x2bb   :  { %v351_v21 = vpop.f32.mrf.mxu1 }
 0x2bc   :  { %v7514_v24 = vpack.c.bf16 %v351_v21, %v347_v14  ;;  %v369_v30 = vmul.f32 %v351_v21, %v202_v20  ;;  %v376_v34 = vadd.f32 %v372_v23, %v368_v29 }
 0x2bd   :  { %v353_v25 = vpop.f32.mrf.mxu1 }
 0x2be   :  { %v373_v32 = vmul.f32 %v353_v25, %v206_v22 }
 0x2bf   :  { %v357_v33 = vpop.f32.mrf.mxu1 }
 0x2c0   :  { %v377_v35 = vadd.f32 %v373_v32, %v369_v30  ;;  %v370_v46 = vmul.f32 %v357_v33, %v203_v39 }
 0x2c1   :  { %v359_v37 = vpop.f32.mrf.mxu1 }
 0x2c2   :  { %v380_v38 = vpack.c.bf16 %v377_v35, %v376_v34  ;;  %v374_v43 = vmul.f32 %v359_v37, %v207_v36 }
 0x2c3   :  { %v361_v41 = vpop.f32.mrf.mxu1 }
 0x2c4   :  { %v7532_v44 = vpack.c.bf16 %v361_v41, %v357_v33  ;;  %510 = vrot.lane.b32.xlu0 %v380_v38, %s7309_s18  ;;  %383 = vrot.lane.b32.xlu1 %v380_v38, %s7310_s19  ;;  %v371_v47 = vmul.f32 %v361_v41, %v204_v40  ;;  %v378_v49 = vadd.f32 %v374_v43, %v370_v46 }
 0x2c5   :  { %v363_v45 = vpop.f32.mrf.mxu1 }
 0x2c6   :  { %v375_v48 = vmul.f32 %v363_v45, %v208_v42 }
 0x2c8   :  { %v379_v50 = vadd.f32 %v375_v48, %v371_v47  ;;  %774 = vrot.lane.b32.xlu0 %v380_v38, %s7311_s1  ;;  %640 = vrot.lane.b32.xlu1 %v380_v38, %s7312_s20 }
 0x2ca   :  { %v381_v51 = vpack.c.bf16 %v379_v50, %v378_v49 }
 0x2cc   :  { %638 = vrot.lane.b32.xlu1 %v380_v38, %s7313_s21  ;;  %1029 = vrot.lane.b32.xlu0 %v381_v51, %s7309_s18 }
 0x2d0   :  { %1156 = vrot.lane.b32.xlu0 %v381_v51, %s7313_s21  ;;  %903 = vrot.lane.b32.xlu1 %v381_v51, %s7310_s19 }
 0x2d4   :  { %1158 = vrot.lane.b32.xlu1 %v381_v51, %s7312_s20 }
 0x2d8   :  { %1291 = vrot.lane.b32.xlu1 %v381_v51, %s7311_s1 }
 0x336   :  { %v384_v52 = vpop.permute.xlu1 %383  ;;  %v511_v55 = vpop.permute.xlu0 %510 }
 0x337   :  { %v390_v53 = vsel %vm385_vm8, %v384_v52, 0 }
 0x338   :  { %6541 = vmatpush3.bf16.xpose.msra.mxu1 %v390_v53 }
 0x339   :  { %6552 = vmatprep.subr.bf16.mxu1 %v9383_v15 }
 0x33a   :  { %v641_v54 = vpop.permute.xlu1 %640  ;;  %v775_v60 = vpop.permute.xlu0 %774 }
 0x33b   :  { %v646_v56 = vsel %vm385_vm8, %v641_v54, 0 }
 0x33e   :  { %v639_v58 = vpop.permute.xlu1 %638  ;;  %v1030_v0 = vpop.permute.xlu0 %1029 }
 0x33f   :  { %6543 = vmatmul.mubr.msk.bf16.vlgmr.msra.gmra.mxu1 %vm385_vm8, %v380_v38 }
 0x340   :  { %6553 = vmatpush3.bf16.xpose.msra.mxu1 %v390_v53  ;;  %6554 = vmatprep.mubr.msk.bf16.mxu1 %vm7308_vm7, %v9383_v15 }
 0x341   :  { %6564 = vmatprep.subr.bf16.mxu1 %v9383_v15 }
 0x342   :  { %v904_v59 = vpop.permute.xlu1 %903  ;;  %v1157_v3 = vpop.permute.xlu0 %1156 }
 0x343   :  { %v909_v62 = vsel %vm385_vm8, %v904_v59, 0 }
 0x346   :  { %v1159_v63 = vpop.permute.xlu1 %1158 }
 0x347   :  { %6555 = vmatmul.mubr.msk.bf16.vlgmr.msra.gmra.mxu1 %vm385_vm8, %v511_v55  ;;  %v1164_v1 = vsel %vm385_vm8, %v1159_v63, 0 }
 0x348   :  { %6565 = vmatpush3.bf16.xpose.msra.mxu1 %v646_v56  ;;  %6566 = vmatprep.mubr.msk.bf16.mxu1 %vm7308_vm7, %v9383_v15 }
 0x349   :  { %6576 = vmatprep.subr.bf16.mxu1 %v9383_v15 }
 0x34a   :  { %v1292_v4 = vpop.permute.xlu1 %1291 }
 0x34f   :  { %6567 = vmatmul.mubr.msk.bf16.vlgmr.msra.gmra.mxu1 %vm385_vm8, %v639_v58 }
 0x350   :  { %6577 = vmatpush3.bf16.xpose.msra.mxu1 %v646_v56  ;;  %6578 = vmatprep.mubr.msk.bf16.mxu1 %vm7308_vm7, %v9383_v15 }
 0x351   :  { %6588 = vmatprep.subr.bf16.mxu1 %v9383_v15 }
 0x357   :  { %6579 = vmatmul.mubr.msk.bf16.vlgmr.msra.gmra.mxu1 %vm385_vm8, %v775_v60 }
 0x358   :  { %6589 = vmatpush3.bf16.xpose.msra.mxu1 %v909_v62  ;;  %6590 = vmatprep.mubr.msk.bf16.mxu1 %vm7308_vm7, %v9383_v15 }
 0x359   :  { %6600 = vmatprep.subr.bf16.mxu1 %v9383_v15 }
 0x35f   :  { %6591 = vmatmul.mubr.msk.bf16.vlgmr.msra.gmra.mxu1 %vm385_vm8, %v381_v51 }
 0x360   :  { %6601 = vmatpush3.bf16.xpose.msra.mxu1 %v909_v62  ;;  %6602 = vmatprep.mubr.msk.bf16.mxu1 %vm7308_vm7, %v9383_v15 }
 0x361   :  { %6612 = vmatprep.subr.bf16.mxu1 %v9383_v15 }
 0x367   :  { %6603 = vmatmul.mubr.msk.bf16.vlgmr.msra.gmra.mxu1 %vm385_vm8, %v1030_v0 }
 0x368   :  { %6613 = vmatpush3.bf16.xpose.msra.mxu1 %v1164_v1  ;;  %6614 = vmatprep.mubr.msk.bf16.mxu1 %vm7308_vm7, %v9383_v15 }
 0x369   :  { %6624 = vmatprep.subr.bf16.mxu1 %v9383_v15 }
 0x36f   :  { %6615 = vmatmul.mubr.msk.bf16.vlgmr.msra.gmra.mxu1 %vm385_vm8, %v1157_v3 }
 0x370   :  { %6625 = vmatpush3.bf16.xpose.msra.mxu1 %v1164_v1  ;;  %6626 = vmatprep.mubr.msk.bf16.mxu1 %vm7308_vm7, %v9383_v15 }
 0x377   :  { %6627 = vmatmul.mubr.msk.bf16.vlgmr.msra.gmra.mxu1 %vm385_vm8, %v1292_v4 }
 0x3ff   :  { %v426_v7 = vpop.f32.mrf.mxu1 }
 0x400   :  { %v433_v8 = vmul.f32 0.25, %v426_v7 }
 0x401   :  { %v6544_v9 = vpop.f32.mrf.mxu1 }
 0x402   :  { %v7586_v10 = vsel %vm7580_vm9, %v433_v8, -1e+30 }
 0x403   :  { %v429_v12 = vpop.f32.mrf.mxu1  ;;  %v437_v13 = vsel %vm385_vm8, %v7586_v10, -inf }
 0x404   :  { %v434_v57 = vmul.f32 0.25, %v429_v12  ;;  %438 = vmax.xlane.f32.xlu0 %v437_v13 }
 0x405   :  { %v6545_v14 = vpop.f32.mrf.mxu1 }
 0x406   :  { %v7597_v17 = vsel %vm7589_vm10, %v434_v57, -1e+30 }
 0x407   :  { %v549_v18 = vpop.f32.mrf.mxu1  ;;  %v440_v19 = vsel %vm385_vm8, %v7597_v17, -inf }
 0x408   :  { %v556_v20 = vmul.f32 0.25, %v549_v18  ;;  %441 = vmax.xlane.f32.xlu1 %v440_v19 }
 0x409   :  { %v6556_v21 = vpop.f32.mrf.mxu1 }
 0x40a   :  { %v7603_v22 = vsel %vm7580_vm9, %v556_v20, -1e+30 }
 0x40b   :  { %v552_v23 = vpop.f32.mrf.mxu1  ;;  %v560_v25 = vsel %vm385_vm8, %v7603_v22, -inf }
 0x40c   :  { %v557_v29 = vmul.f32 0.25, %v552_v23  ;;  %561 = vmax.xlane.f32.xlu0 %v560_v25 }
 0x40d   :  { %v6557_v30 = vpop.f32.mrf.mxu1 }
 0x40e   :  { %v7609_v32 = vsel %vm7589_vm10, %v557_v29, -1e+30 }
 0x40f   :  { %v682_v33 = vpop.f32.mrf.mxu1  ;;  %v563_v34 = vsel %vm385_vm8, %v7609_v32, -inf }
 0x410   :  { %v689_v35 = vmul.f32 0.25, %v682_v33  ;;  %564 = vmax.xlane.f32.xlu0 %v563_v34 }
 0x411   :  { %v6568_v36 = vpop.f32.mrf.mxu1 }
 0x412   :  { %v7615_v37 = vsel %vm7580_vm9, %v689_v35, -1e+30 }
 0x413   :  { %v685_v38 = vpop.f32.mrf.mxu1  ;;  %v693_v39 = vsel %vm385_vm8, %v7615_v37, -inf }
 0x414   :  { %v690_v40 = vmul.f32 0.25, %v685_v38  ;;  %694 = vmax.xlane.f32.xlu1 %v693_v39 }
 0x415   :  { %v6569_v41 = vpop.f32.mrf.mxu1 }
 0x416   :  { %v7621_v42 = vsel %vm7589_vm10, %v690_v40, -1e+30 }
 0x417   :  { %v813_v43 = vpop.f32.mrf.mxu1  ;;  %v696_v45 = vsel %vm385_vm8, %v7621_v42, -inf }
 0x418   :  { %v820_v46 = vmul.f32 0.25, %v813_v43  ;;  %697 = vmax.xlane.f32.xlu0 %v696_v45 }
 0x419   :  { %v6580_v47 = vpop.f32.mrf.mxu1 }
 0x41a   :  { %v7627_v48 = vsel %vm7580_vm9, %v820_v46, -1e+30 }
 0x41b   :  { %v816_v49 = vpop.f32.mrf.mxu1  ;;  %v824_v50 = vsel %vm385_vm8, %v7627_v48, -inf }
 0x41c   :  { %v821_v51 = vmul.f32 0.25, %v816_v49  ;;  %825 = vmax.xlane.f32.xlu1 %v824_v50 }
 0x41d   :  { %v6581_v52 = vpop.f32.mrf.mxu1 }
 0x41e   :  { %v7633_v53 = vsel %vm7589_vm10, %v821_v51, -1e+30 }
 0x41f   :  { %v945_v54 = vpop.f32.mrf.mxu1  ;;  %v827_v55 = vsel %vm385_vm8, %v7633_v53, -inf }
 0x420   :  { %v952_v56 = vmul.f32 0.25, %v945_v54  ;;  %828 = vmax.xlane.f32.xlu0 %v827_v55 }
 0x421   :  { %v6592_v58 = vpop.f32.mrf.mxu1 }
 0x422   :  { %v7639_v59 = vsel %vm7580_vm9, %v952_v56, -1e+30 }
 0x423   :  { %v948_v60 = vpop.f32.mrf.mxu1  ;;  %v956_v62 = vsel %vm385_vm8, %v7639_v59, -inf }
 0x424   :  { %v953_v63 = vmul.f32 0.25, %v948_v60  ;;  %957 = vmax.xlane.f32.xlu1 %v956_v62 }
 0x425   :  { %v6593_v0 = vpop.f32.mrf.mxu1 }
 0x426   :  { %v7645_v1 = vsel %vm7589_vm10, %v953_v63, -1e+30 }
 0x427   :  { %v1068_v3 = vpop.f32.mrf.mxu1  ;;  %v959_v4 = vsel %vm385_vm8, %v7645_v1, -inf }
 0x428   :  { %v1075_v5 = vmul.f32 0.25, %v1068_v3  ;;  %960 = vmax.xlane.f32.xlu0 %v959_v4 }
 0x429   :  { %v6604_v7 = vpop.f32.mrf.mxu1 }
 0x42a   :  { %v7651_v8 = vsel %vm7580_vm9, %v1075_v5, -1e+30 }
 0x42b   :  { %v1071_v9 = vpop.f32.mrf.mxu1  ;;  %v1079_v12 = vsel %vm385_vm8, %v7651_v8, -inf }
 0x42c   :  { %v1076_v13 = vmul.f32 0.25, %v1071_v9  ;;  %1080 = vmax.xlane.f32.xlu1 %v1079_v12 }
 0x42d   :  { %v6605_v57 = vpop.f32.mrf.mxu1 }
 0x42e   :  { %v7657_v14 = vsel %vm7589_vm10, %v1076_v13, -1e+30 }
 0x42f   :  { %v1200_v18 = vpop.f32.mrf.mxu1  ;;  %v1082_v19 = vsel %vm385_vm8, %v7657_v14, -inf }
 0x430   :  { %v1207_v20 = vmul.f32 0.25, %v1200_v18  ;;  %1083 = vmax.xlane.f32.xlu0 %v1082_v19 }
 0x431   :  { %v6616_v21 = vpop.f32.mrf.mxu1 }
 0x432   :  { %v7663_v23 = vsel %vm7580_vm9, %v1207_v20, -1e+30 }
 0x433   :  { %v1203_v25 = vpop.f32.mrf.mxu1  ;;  %v1211_v29 = vsel %vm385_vm8, %v7663_v23, -inf }
 0x434   :  { %v1208_v30 = vmul.f32 0.25, %v1203_v25  ;;  %1212 = vmax.xlane.f32.xlu1 %v1211_v29 }
 0x435   :  { %v6617_v33 = vpop.f32.mrf.mxu1 }
 0x436   :  { %v7669_v34 = vsel %vm7589_vm10, %v1208_v30, -1e+30 }
 0x437   :  { %v1330_v35 = vpop.f32.mrf.mxu1  ;;  %v1214_v36 = vsel %vm385_vm8, %v7669_v34, -inf }
 0x438   :  { %v1337_v38 = vmul.f32 0.25, %v1330_v35  ;;  %1215 = vmax.xlane.f32.xlu0 %v1214_v36 }
 0x439   :  { %v6628_v39 = vpop.f32.mrf.mxu1 }
 0x43a   :  { %v7675_v40 = vsel %vm7580_vm9, %v1337_v38, -1e+30 }
 0x43b   :  { %v1333_v41 = vpop.f32.mrf.mxu1  ;;  %v1341_v43 = vsel %vm385_vm8, %v7675_v40, -inf }
 0x43c   :  { %v1338_v45 = vmul.f32 0.25, %v1333_v41  ;;  %1342 = vmax.xlane.f32.xlu1 %v1341_v43 }
 0x43d   :  { %v6629_v46 = vpop.f32.mrf.mxu1 }
 0x43e   :  { %v7681_v47 = vsel %vm7589_vm10, %v1338_v45, -1e+30 }
 0x43f   :  { %v1344_v49 = vsel %vm385_vm8, %v7681_v47, -inf }
 0x440   :  { %1345 = vmax.xlane.f32.xlu0 %v1344_v49 }
 0x44d   :  { %461 = vrot.lane.b32.xlu1 %v7514_v24, %s7314_s22 }
 0x48d   :  { %v439_v50 = vpop.xlane.xlu0 %438 }
 0x48e   :  { %v443_v51 = vsub.f32 %v7586_v10, %v439_v50 }
 0x490   :  { %v445_v52 = vmul.f32 1.442695, %v443_v51 }
 0x491   :  { %v442_v54 = vpop.xlane.xlu1 %441 }
 0x492   :  { %6939 = vpow2.f32 %v445_v52  ;;  %v444_v55 = vsub.f32 %v7597_v17, %v442_v54 }
 0x494   :  { %v447_v56 = vmul.f32 1.442695, %v444_v55 }
 0x495   :  { %v562_v58 = vpop.xlane.xlu0 %561 }
 0x496   :  { %6941 = vpow2.f32 %v447_v56  ;;  %v566_v60 = vsub.f32 %v7603_v22, %v562_v58 }
 0x498   :  { %v568_v62 = vmul.f32 1.442695, %v566_v60 }
 0x499   :  { %v565_v63 = vpop.xlane.xlu0 %564 }
 0x49a   :  { %6943 = vpow2.f32 %v568_v62  ;;  %v567_v0 = vsub.f32 %v7609_v32, %v565_v63 }
 0x49c   :  { %v570_v3 = vmul.f32 1.442695, %v567_v0 }
 0x49d   :  { %v695_v4 = vpop.xlane.xlu1 %694 }
 0x49e   :  { %6945 = vpow2.f32 %v570_v3  ;;  %v699_v10 = vsub.f32 %v7615_v37, %v695_v4 }
 0x49f   :  { %v7692_v5 = vpop.eup %6939 }
 0x4a0   :  { %v701_v7 = vmul.f32 1.442695, %v699_v10  ;;  %v449_v17 = vsel %vm385_vm8, %v7692_v5, 0.0 }
 0x4a1   :  { %450 = vadd.xlane.f32.xlu1 %v449_v17  ;;  %v698_v9 = vpop.xlane.xlu0 %697 }
 0x4a2   :  { %6947 = vpow2.f32 %v701_v7  ;;  %v700_v22 = vsub.f32 %v7621_v42, %v698_v9 }
 0x4a3   :  { %v7697_v12 = vpop.eup %6941 }
 0x4a4   :  { %v703_v13 = vmul.f32 1.442695, %v700_v22  ;;  %v452_v32 = vsel %vm385_vm8, %v7697_v12, 0.0 }
 0x4a5   :  { %v826_v57 = vpop.xlane.xlu1 %825  ;;  %453 = vadd.xlane.f32.xlu0 %v452_v32 }
 0x4a6   :  { %6949 = vpow2.f32 %v703_v13  ;;  %v830_v37 = vsub.f32 %v7627_v48, %v826_v57 }
 0x4a7   :  { %v7702_v18 = vpop.eup %6943 }
 0x4a8   :  { %v832_v19 = vmul.f32 1.442695, %v830_v37  ;;  %v572_v20 = vsel %vm385_vm8, %v7702_v18, 0.0 }
 0x4a9   :  { %573 = vadd.xlane.f32.xlu1 %v572_v20  ;;  %v829_v21 = vpop.xlane.xlu0 %828 }
 0x4aa   :  { %6951 = vpow2.f32 %v832_v19  ;;  %v831_v42 = vsub.f32 %v7633_v53, %v829_v21 }
 0x4ab   :  { %v7707_v25 = vpop.eup %6945 }
 0x4ac   :  { %v834_v29 = vmul.f32 1.442695, %v831_v42  ;;  %v575_v30 = vsel %vm385_vm8, %v7707_v25, 0.0 }
 0x4ad   :  { %v958_v33 = vpop.xlane.xlu1 %957  ;;  %576 = vadd.xlane.f32.xlu0 %v575_v30 }
 0x4ae   :  { %6953 = vpow2.f32 %v834_v29  ;;  %v962_v48 = vsub.f32 %v7639_v59, %v958_v33 }
 0x4af   :  { %v7712_v35 = vpop.eup %6947 }
 0x4b0   :  { %v964_v36 = vmul.f32 1.442695, %v962_v48  ;;  %v705_v38 = vsel %vm385_vm8, %v7712_v35, 0.0 }
 0x4b1   :  { %706 = vadd.xlane.f32.xlu1 %v705_v38  ;;  %v961_v39 = vpop.xlane.xlu0 %960 }
 0x4b2   :  { %6955 = vpow2.f32 %v964_v36  ;;  %v963_v53 = vsub.f32 %v7645_v1, %v961_v39 }
 0x4b3   :  { %v7717_v41 = vpop.eup %6949 }
 0x4b4   :  { %v966_v43 = vmul.f32 1.442695, %v963_v53  ;;  %v708_v45 = vsel %vm385_vm8, %v7717_v41, 0.0 }
 0x4b5   :  { %v1081_v46 = vpop.xlane.xlu1 %1080  ;;  %709 = vadd.xlane.f32.xlu0 %v708_v45 }
 0x4b6   :  { %6957 = vpow2.f32 %v966_v43  ;;  %v1085_v59 = vsub.f32 %v7651_v8, %v1081_v46 }
 0x4b7   :  { %v7722_v49 = vpop.eup %6951 }
 0x4b8   :  { %v1087_v50 = vmul.f32 1.442695, %v1085_v59  ;;  %v836_v51 = vsel %vm385_vm8, %v7722_v49, 0.0 }
 0x4b9   :  { %837 = vadd.xlane.f32.xlu1 %v836_v51  ;;  %v1084_v52 = vpop.xlane.xlu0 %1083 }
 0x4ba   :  { %6959 = vpow2.f32 %v1087_v50  ;;  %v1086_v1 = vsub.f32 %v7657_v14, %v1084_v52 }
 0x4bb   :  { %v7727_v54 = vpop.eup %6953 }
 0x4bc   :  { %v1089_v55 = vmul.f32 1.442695, %v1086_v1  ;;  %v839_v56 = vsel %vm385_vm8, %v7727_v54, 0.0 }
 0x4bd   :  { %v1213_v58 = vpop.xlane.xlu1 %1212  ;;  %840 = vadd.xlane.f32.xlu0 %v839_v56 }
 0x4be   :  { %6961 = vpow2.f32 %v1089_v55  ;;  %v1217_v8 = vsub.f32 %v7663_v23, %v1213_v58 }
 0x4bf   :  { %v7732_v60 = vpop.eup %6955 }
 0x4c0   :  { %v1219_v62 = vmul.f32 1.442695, %v1217_v8  ;;  %v968_v63 = vsel %vm385_vm8, %v7732_v60, 0.0 }
 0x4c1   :  { %969 = vadd.xlane.f32.xlu0 %v968_v63  ;;  %v1216_v13 = vpop.xlane.xlu0 %1215 }
 0x4c2   :  { %6963 = vpow2.f32 %v1219_v62  ;;  %v1218_v32 = vsub.f32 %v7669_v34, %v1216_v13 }
 0x4c3   :  { %v7736_v14 = vpop.eup %6957 }
 0x4c4   :  { %v971_v0 = vsel %vm385_vm8, %v7736_v14, 0.0  ;;  %v1221_v57 = vmul.f32 1.442695, %v1218_v32 }
 0x4c5   :  { %v1343_v3 = vpop.xlane.xlu1 %1342  ;;  %972 = vadd.xlane.f32.xlu0 %v971_v0 }
 0x4c6   :  { %6965 = vpow2.f32 %v1221_v57  ;;  %v1347_v37 = vsub.f32 %v7675_v40, %v1343_v3 }
 0x4c7   :  { %v7740_v4 = vpop.eup %6959 }
 0x4c8   :  { %v1091_v23 = vsel %vm385_vm8, %v7740_v4, 0.0  ;;  %v1349_v21 = vmul.f32 1.442695, %v1347_v37 }
 0x4c9   :  { %v462_v10 = vpop.permute.xlu1 %461  ;;  %1092 = vadd.xlane.f32.xlu0 %v1091_v23  ;;  %v1346_v20 = vpop.xlane.xlu0 %1345 }
 0x4ca   :  { %6547 = vmatpush3.bf16.msra.mxu0 %v462_v10  ;;  %716 = vrot.lane.b32.xlu1 %v7514_v24, %s7315_s23  ;;  %v1348_v42 = vsub.f32 %v7681_v47, %v1346_v20  ;;  %6967 = vpow2.f32 %v1349_v21 }
 0x4cb   :  { %v7746_v7 = vpop.eup %6961  ;;  %6558 = vmatprep.subr.bf16.mxu0 %v9383_v15 }
 0x4cc   :  { %v1094_v17 = vsel %vm385_vm8, %v7746_v7, 0.0  ;;  %v1351_v29 = vmul.f32 1.442695, %v1348_v42 }
 0x4cd   :  { %1095 = vadd.xlane.f32.xlu0 %v1094_v17 }
 0x4ce   :  { %6969 = vpow2.f32 %v1351_v29 }
 0x4cf   :  { %v7751_v9 = vpop.eup %6963 }
 0x4d0   :  { %v1223_v22 = vsel %vm385_vm8, %v7751_v9, 0.0 }
 0x4d1   :  { %1224 = vadd.xlane.f32.xlu0 %v1223_v22 }
 0x4d3   :  { %v7758_v24 = vpop.eup %6965 }
 0x4d4   :  { %v1226_v19 = vsel %vm385_vm8, %v7758_v24, 0.0 }
 0x4d7   :  { %v7764_v34 = vpop.eup %6967 }
 0x4d8   :  { %v1353_v30 = vsel %vm385_vm8, %v7764_v34, 0.0 }
 0x4db   :  { %v7768_v33 = vpop.eup %6969 }
 0x4dc   :  { %v1356_v40 = vsel %vm385_vm8, %v7768_v33, 0.0 }
 0x4e7   :  { %980 = vrot.lane.b32.xlu0 %v7532_v44, %s7314_s22 }
 0x4ee   :  { %1227 = vadd.xlane.f32.xlu1 %v1226_v19 }
 0x506   :  { %1354 = vadd.xlane.f32.xlu0 %v1353_v30 }
 0x50a   :  { %1357 = vadd.xlane.f32.xlu0 %v1356_v40 }
 0x520   :  { %1234 = vrot.lane.b32.xlu0 %v7532_v44, %s7315_s23 }
 0x52a   :  { %v451_v48 = vpop.xlane.xlu1 %450 }
 0x52b   :  { %6971 = vrcp.f32 %v451_v48 }
 0x52e   :  { %v454_v47 = vpop.xlane.xlu0 %453 }
 0x52f   :  { %6973 = vrcp.f32 %v454_v47 }
 0x532   :  { %v574_v36 = vpop.xlane.xlu1 %573 }
 0x533   :  { %6975 = vrcp.f32 %v574_v36 }
 0x536   :  { %v577_v38 = vpop.xlane.xlu0 %576 }
 0x537   :  { %6977 = vrcp.f32 %v577_v38 }
 0x538   :  { %v6972_v39 = vpop.eup %6971 }
 0x539   :  { %v456_v45 = vmul.f32 %v6972_v39, %v7692_v5 }
 0x53a   :  { %v707_v53 = vpop.xlane.xlu1 %706 }
 0x53b   :  { %6979 = vrcp.f32 %v707_v53 }
 0x53c   :  { %v6974_v43 = vpop.eup %6973 }
 0x53d   :  { %v458_v46 = vmul.f32 %v6974_v43, %v7697_v12 }
 0x53e   :  { %v710_v59 = vpop.xlane.xlu0 %709 }
 0x53f   :  { %6981 = vrcp.f32 %v710_v59  ;;  %v459_v50 = vpack.c.bf16 %v458_v46, %v456_v45 }
 0x540   :  { %v6976_v44 = vpop.eup %6975 }
 0x541   :  { %6549 = vmatmul.mubr.msk.bf16.vlgmr.msra.gmra.mxu0 %vm385_vm8, %v459_v50  ;;  %v579_v1 = vmul.f32 %v6976_v44, %v7702_v18 }
 0x542   :  { %6559 = vmatpush3.bf16.msra.mxu0 %v462_v10  ;;  %v838_v51 = vpop.xlane.xlu1 %837  ;;  %6560 = vmatprep.mubr.msk.bf16.mxu0 %vm7308_vm7, %v9383_v15 }
 0x543   :  { %6570 = vmatprep.subr.bf16.mxu0 %v9383_v15  ;;  %6983 = vrcp.f32 %v838_v51 }
 0x544   :  { %v6978_v52 = vpop.eup %6977 }
 0x545   :  { %v581_v5 = vmul.f32 %v6978_v52, %v7707_v25 }
 0x546   :  { %v841_v12 = vpop.xlane.xlu0 %840  ;;  %v717_v56 = vpop.permute.xlu1 %716 }
 0x547   :  { %6985 = vrcp.f32 %v841_v12  ;;  %v582_v55 = vpack.c.bf16 %v581_v5, %v579_v1 }
 0x548   :  { %v6980_v58 = vpop.eup %6979 }
 0x549   :  { %6561 = vmatmul.mubr.msk.bf16.vlgmr.msra.gmra.mxu0 %vm385_vm8, %v582_v55  ;;  %v712_v18 = vmul.f32 %v6980_v58, %v7712_v35 }
 0x54a   :  { %6571 = vmatpush3.bf16.msra.mxu0 %v717_v56  ;;  %v970_v8 = vpop.xlane.xlu0 %969  ;;  %6572 = vmatprep.mubr.msk.bf16.mxu0 %vm7308_vm7, %v9383_v15 }
 0x54b   :  { %6582 = vmatprep.subr.bf16.mxu0 %v9383_v15  ;;  %6987 = vrcp.f32 %v970_v8 }
 0x54c   :  { %v6982_v62 = vpop.eup %6981 }
 0x54d   :  { %v714_v25 = vmul.f32 %v6982_v62, %v7717_v41 }
 0x54e   :  { %v973_v63 = vpop.xlane.xlu0 %972 }
 0x54f   :  { %6989 = vrcp.f32 %v973_v63  ;;  %v715_v0 = vpack.c.bf16 %v714_v25, %v712_v18 }
 0x550   :  { %v6984_v3 = vpop.eup %6983 }
 0x551   :  { %6573 = vmatmul.mubr.msk.bf16.vlgmr.msra.gmra.mxu0 %vm385_vm8, %v715_v0  ;;  %v843_v17 = vmul.f32 %v6984_v3, %v7722_v49 }
 0x552   :  { %6583 = vmatpush3.bf16.msra.mxu0 %v717_v56  ;;  %v1093_v23 = vpop.xlane.xlu0 %1092  ;;  %6584 = vmatprep.mubr.msk.bf16.mxu0 %vm7308_vm7, %v9383_v15 }
 0x553   :  { %6594 = vmatprep.subr.bf16.mxu0 %v9383_v15  ;;  %6991 = vrcp.f32 %v1093_v23 }
 0x554   :  { %v6986_v10 = vpop.eup %6985 }
 0x555   :  { %v845_v35 = vmul.f32 %v6986_v10, %v7727_v54 }
 0x556   :  { %v1096_v41 = vpop.xlane.xlu0 %1095 }
 0x557   :  { %6993 = vrcp.f32 %v1096_v41  ;;  %v846_v22 = vpack.c.bf16 %v845_v35, %v843_v17  ;;  %v6827_v17 = vld [vmem:[%s9374_s7 + $0x18] sm:$0xff]   ;;  %v6828_v35 = vld [vmem:[%s9374_s7 + $0x10] sm:$0xff]  }
 0x558   :  { %v6988_v13 = vpop.eup %6987  ;;  %6636 = vmatprep.subr.bf16.mxu1 %v6827_v17 }
 0x559   :  { %6585 = vmatmul.mubr.msk.bf16.vlgmr.msra.gmra.mxu0 %vm385_vm8, %v846_v22  ;;  %v975_v37 = vmul.f32 %v6988_v13, %v7732_v60  ;;  %6637 = vmatpush3.bf16.msra.mxu1 %v6827_v17  ;;  %v6829_v13 = vld [vmem:[%s9374_s7 + $0x8] sm:$0xff]   ;;  %v1921_v17 = vld [vmem:[%s9376_s9 + $0xa0] sm:$0xff] }
 0x55a   :  { %v1225_v32 = vpop.xlane.xlu0 %1224  ;;  %6596 = vmatprep.mubr.msk.bf16.mxu0 %vm7308_vm7, %v9383_v15  ;;  %6638 = vmatprep.subr.bf16.mxu1 %v6828_v35 }
 0x55c   :  { %v6990_v57 = vpop.eup %6989 }
 0x55d   :  { %v977_v19 = vmul.f32 %v6990_v57, %v7736_v14  ;;  %6639 = vmatpush3.bf16.msra.mxu1 %v6828_v35 }
 0x55e   :  { %v981_v20 = vpop.permute.xlu0 %980  ;;  %6640 = vmatprep.subr.bf16.mxu1 %v6829_v13 }
 0x55f   :  { %6595 = vmatpush3.bf16.msra.mxu0 %v981_v20  ;;  %v978_v49 = vpack.c.bf16 %v977_v19, %v975_v37 }
 0x560   :  { %6606 = vmatprep.subr.bf16.mxu0 %v9383_v15  ;;  %v6992_v54 = vpop.eup %6991 }
 0x561   :  { %v1098_v42 = vmul.f32 %v6992_v54, %v7740_v4  ;;  %6641 = vmatpush3.bf16.msra.mxu1 %v6829_v13  ;;  %v1909_v13 = vld [vmem:[%s9376_s9 + $0x40] sm:$0xff] }
 0x562   :  { %6597 = vmatmul.mubr.msk.bf16.vlgmr.msra.gmra.mxu0 %vm385_vm8, %v978_v49 }
 0x563   :  { %6607 = vmatpush3.bf16.msra.mxu0 %v981_v20  ;;  %6608 = vmatprep.mubr.msk.bf16.mxu0 %vm7308_vm7, %v9383_v15 }
 0x564   :  { %v6994_v21 = vpop.eup %6993  ;;  %6618 = vmatprep.subr.bf16.mxu0 %v9383_v15 }
 0x565   :  { %v1100_v60 = vmul.f32 %v6994_v21, %v7746_v7 }
 0x567   :  { %v1101_v14 = vpack.c.bf16 %v1100_v60, %v1098_v42 }
 0x56a   :  { %6609 = vmatmul.mubr.msk.bf16.vlgmr.msra.gmra.mxu0 %vm385_vm8, %v1101_v14 }
 0x56b   :  { %6620 = vmatprep.mubr.msk.bf16.mxu0 %vm7308_vm7, %v9383_v15 }
 0x577   :  { %v1228_v29 = vpop.xlane.xlu1 %1227 }
 0x578   :  { %6995 = vrcp.f32 %v1228_v29 }
 0x579   :  { %6997 = vrcp.f32 %v1225_v32  ;;  %v6830_v32 = vld [vmem:[%s9374_s7] sm:$0xff]  }
 0x57a   :  { %6642 = vmatprep.subr.bf16.mxu1 %v6830_v32 }
 0x57b   :  { %6643 = vmatpush3.bf16.msra.mxu1 %v6830_v32  ;;  %v1913_v32 = vld [vmem:[%s9376_s9 + $0x60] sm:$0xff] }
 0x585   :  { %v6996_v40 = vpop.eup %6995 }
 0x586   :  { %v6998_v47 = vpop.eup %6997  ;;  %v1232_v36 = vmul.f32 %v6996_v40, %v7758_v24 }
 0x587   :  { %v1230_v7 = vmul.f32 %v6998_v47, %v7751_v9 }
 0x589   :  { %v1233_v38 = vpack.c.bf16 %v1232_v36, %v1230_v7 }
 0x58f   :  { %v1355_v30 = vpop.xlane.xlu0 %1354 }
 0x590   :  { %6999 = vrcp.f32 %v1355_v30 }
 0x593   :  { %v1358_v48 = vpop.xlane.xlu0 %1357 }
 0x594   :  { %7001 = vrcp.f32 %v1358_v48 }
 0x597   :  { %v1235_v4 = vpop.permute.xlu0 %1234 }
 0x598   :  { %6619 = vmatpush3.bf16.msra.mxu0 %v1235_v4 }
 0x599   :  { %6630 = vmatprep.subr.bf16.mxu0 %v9383_v15 }
 0x59b   :  { %6621 = vmatmul.mubr.msk.bf16.vlgmr.msra.gmra.mxu0 %vm385_vm8, %v1233_v38 }
 0x59c   :  { %6631 = vmatpush3.bf16.msra.mxu0 %v1235_v4  ;;  %6632 = vmatprep.mubr.msk.bf16.mxu0 %vm7308_vm7, %v9383_v15 }
 0x59d   :  { %v7000_v39 = vpop.eup %6999 }
 0x59e   :  { %v1360_v43 = vmul.f32 %v7000_v39, %v7764_v34 }
 0x5a1   :  { %v7002_v53 = vpop.eup %7001 }
 0x5a2   :  { %v1362_v45 = vmul.f32 %v7002_v53, %v7768_v33 }
 0x5a4   :  { %v1363_v24 = vpack.c.bf16 %v1362_v45, %v1360_v43 }
 0x5a6   :  { %6633 = vmatmul.mubr.msk.bf16.vlgmr.msra.gmra.mxu0 %vm385_vm8, %v1363_v24 }
 0x601   :  { %v501_v9 = vpop.f32.mrf.mxu0 }
 0x602   :  { %508 = vst.msk [vmem:[#allocation2] sm:$0xff] %vm385_vm8, %v501_v9 }
 0x603   :  { %v6550_v46 = vpop.f32.mrf.mxu0 }
 0x605   :  { %v504_v59 = vpop.f32.mrf.mxu0 }
 0x606   :  { %509 = vst.msk [vmem:[#allocation2 + $0x8] sm:$0xff] %vm385_vm8, %v504_v59 }
 0x607   :  { %v6551_v50 = vpop.f32.mrf.mxu0 }
 0x609   :  { %v620_v44 = vpop.f32.mrf.mxu0 }
 0x60a   :  { %629 = vrot.lane.b32.xlu0 %v620_v44, %s7315_s23 }
 0x60b   :  { %v6562_v51 = vpop.f32.mrf.mxu0 }
 0x60d   :  { %v623_v52 = vpop.f32.mrf.mxu0 }
 0x60e   :  { %631 = vrot.lane.b32.xlu1 %v623_v52, %s7315_s23 }
 0x60f   :  { %v6563_v34 = vpop.f32.mrf.mxu0 }
 0x611   :  { %v756_v33 = vpop.f32.mrf.mxu0 }
 0x612   :  { %765 = vrot.lane.b32.xlu0 %v756_v33, %s7314_s22 }
 0x613   :  { %v6574_v1 = vpop.f32.mrf.mxu0 }
 0x615   :  { %v759_v5 = vpop.f32.mrf.mxu0 }
 0x616   :  { %767 = vrot.lane.b32.xlu0 %v759_v5, %s7314_s22 }
 0x617   :  { %v6575_v12 = vpop.f32.mrf.mxu0 }
 0x619   :  { %v884_v55 = vpop.f32.mrf.mxu0 }
 0x61a   :  { %893 = vrot.lane.b32.xlu1 %v884_v55, %s7312_s20 }
 0x61b   :  { %v6586_v56 = vpop.f32.mrf.mxu0 }
 0x61d   :  { %v887_v58 = vpop.f32.mrf.mxu0 }
 0x61e   :  { %895 = vrot.lane.b32.xlu0 %v887_v58, %s7312_s20 }
 0x61f   :  { %v6587_v8 = vpop.f32.mrf.mxu0 }
 0x622   :  { %v1020_v62 = vpop.f32.mrf.mxu0 }
 0x623   :  { %1027 = vst.msk [vmem:[#allocation2 + $0x10] sm:$0xff] %vm385_vm8, %v1020_v62 }
 0x624   :  { %v6598_v18 = vpop.f32.mrf.mxu0 }
 0x626   :  { %v1023_v25 = vpop.f32.mrf.mxu0 }
 0x627   :  { %1028 = vst.msk [vmem:[#allocation2 + $0x18] sm:$0xff] %vm385_vm8, %v1023_v25  ;;  %v1925_v25 = vld [vmem:[%s9376_s9 + $0xc0] sm:$0xff] }
 0x628   :  { %v6599_v63 = vpop.f32.mrf.mxu0 }
 0x629   :  { %v1929_v63 = vld [vmem:[%s9376_s9 + $0xe0] sm:$0xff] }
 0x62a   :  { %v1139_v0 = vpop.f32.mrf.mxu0 }
 0x62b   :  { %1148 = vrot.lane.b32.xlu0 %v1139_v0, %s7315_s23  ;;  %v5948_v0 = vcombine.high %v1925_v25, %v1929_v63 }
 0x62c   :  { %v6610_v3 = vpop.f32.mrf.mxu0 }
 0x62d   :  { %v5947_v3 = vcombine.low %v1925_v25, %v1929_v63  ;;  %2101 = vmatprep.subr.bf16.mxu1 %v5948_v0 }
 0x62e   :  { %v1142_v23 = vpop.f32.mrf.mxu0 }
 0x62f   :  { %1150 = vrot.lane.b32.xlu0 %v1142_v23, %s7315_s23  ;;  %v6831_v23 = vld [vmem:[%s9375_s8 + $0x18] sm:$0xff]  }
 0x630   :  { %v6611_v10 = vpop.f32.mrf.mxu0  ;;  %6648 = vmatprep.subr.bf16.mxu0 %v6831_v23 }
 0x631   :  { %v1917_v10 = vld [vmem:[%s9376_s9 + $0x80] sm:$0xff]  ;;  %6649 = vmatpush3.bf16.msra.mxu0 %v6831_v23 }
 0x632   :  { %v5939_v35 = vcombine.low %v1917_v10, %v1921_v17 }
 0x65b   :  { %v1274_v41 = vpop.f32.mrf.mxu0 }
 0x65c   :  { %1283 = vrot.lane.b32.xlu1 %v1274_v41, %s7314_s22  ;;  %v5940_v41 = vcombine.high %v1917_v10, %v1921_v17  ;;  %v1922_v10 = vld [vmem:[%s9376_s9 + $0xa8] sm:$0xff]  ;;  %v1911_v17 = vld [vmem:[%s9376_s9 + $0x50] sm:$0xff] }
 0x65d   :  { %v6622_v22 = vpop.f32.mrf.mxu0 }
 0x65e   :  { %v6832_v22 = vld [vmem:[%s9375_s8 + $0x10] sm:$0xff]  }
 0x65f   :  { %v1277_v57 = vpop.f32.mrf.mxu0  ;;  %6650 = vmatprep.subr.bf16.mxu0 %v6832_v22 }
 0x660   :  { %1285 = vrot.lane.b32.xlu0 %v1277_v57, %s7314_s22  ;;  %v5932_v57 = vcombine.high %v1909_v13, %v1913_v32  ;;  %6651 = vmatpush3.bf16.msra.mxu0 %v6832_v22 }
 0x661   :  { %v6623_v37 = vpop.f32.mrf.mxu0 }
 0x662   :  { %v1901_v37 = vld [vmem:[%s9376_s9] sm:$0xff] }
 0x666   :  { %v1401_v19 = vpop.f32.mrf.mxu0 }
 0x667   :  { %1410 = vrot.lane.b32.xlu1 %v1401_v19, %s7312_s20  ;;  %v1905_v19 = vld [vmem:[%s9376_s9 + $0x20] sm:$0xff] }
 0x668   :  { %v6634_v20 = vpop.f32.mrf.mxu0 }
 0x669   :  { %v6833_v20 = vld [vmem:[%s9375_s8 + $0x8] sm:$0xff]  }
 0x66a   :  { %v1404_v49 = vpop.f32.mrf.mxu0  ;;  %6652 = vmatprep.subr.bf16.mxu0 %v6833_v20 }
 0x66b   :  { %1412 = vrot.lane.b32.xlu0 %v1404_v49, %s7312_s20  ;;  %v5931_v49 = vcombine.low %v1909_v13, %v1913_v32  ;;  %6653 = vmatpush3.bf16.msra.mxu0 %v6833_v20  ;;  %v1903_v20 = vld [vmem:[%s9376_s9 + $0x10] sm:$0xff] }
 0x66c   :  { %v6635_v54 = vpop.f32.mrf.mxu0 }
 0x66d   :  { %v5924_v54 = vcombine.high %v1901_v37, %v1905_v19 }
 0x67c   :  { %v630_v21 = vpop.permute.xlu0 %629 }
 0x67d   :  { %636 = vst.msk [vmem:[#allocation2] sm:$0xff] %vm635_vm11, %v630_v21  ;;  %v6834_v21 = vld [vmem:[%s9375_s8] sm:$0xff]  }
 0x67e   :  { %6654 = vmatprep.subr.bf16.mxu0 %v6834_v21 }
 0x67f   :  { %6655 = vmatpush3.bf16.msra.mxu0 %v6834_v21 }
 0x680   :  { %v632_v42 = vpop.permute.xlu1 %631 }
 0x681   :  { %637 = vst.msk [vmem:[#allocation2 + $0x8] sm:$0xff] %vm635_vm11, %v632_v42  ;;  %v5923_v42 = vcombine.low %v1901_v37, %v1905_v19  ;;  %v1910_v37 = vld [vmem:[%s9376_s9 + $0x48] sm:$0xff] }
 0x682   :  { %v1914_v19 = vld [vmem:[%s9376_s9 + $0x68] sm:$0xff] }
 0x684   :  { %v766_v60 = vpop.permute.xlu0 %765 }
 0x685   :  { %772 = vst.msk [vmem:[#allocation2] sm:$0xff] %vm771_vm12, %v766_v60  ;;  %v1927_v60 = vld [vmem:[%s9376_s9 + $0xd0] sm:$0xff] }
 0x688   :  { %v768_v14 = vpop.permute.xlu0 %767 }
 0x689   :  { %773 = vst.msk [vmem:[#allocation2 + $0x8] sm:$0xff] %vm771_vm12, %v768_v14  ;;  %v1931_v14 = vld [vmem:[%s9376_s9 + $0xf0] sm:$0xff] }
 0x68c   :  { %v894_v29 = vpop.permute.xlu1 %893 }
 0x68d   :  { %900 = vst.msk [vmem:[#allocation2] sm:$0xff] %vm9382_vm13, %v894_v29  ;;  %v5952_v29 = vcombine.high %v1927_v60, %v1931_v14 }
 0x690   :  { %v896_v30 = vpop.permute.xlu0 %895 }
 0x691   :  { %901 = vst.msk [vmem:[#allocation2 + $0x8] sm:$0xff] %vm9382_vm13, %v896_v30  ;;  %v5951_v30 = vcombine.low %v1927_v60, %v1931_v14  ;;  %v1902_v14 = vld [vmem:[%s9376_s9 + $0x8] sm:$0xff] }
 0x694   :  { %v1418_v40 = vld [vmem:[#allocation2] sm:$0xff] }
 0x698   :  { %v1419_v48 = vld [vmem:[#allocation2 + $0x8] sm:$0xff] }
 0x699   :  { %v1422_v47 = vpack.c.bf16 %v1419_v48, %v1418_v40  ;;  %v1926_v40 = vld [vmem:[%s9376_s9 + $0xc8] sm:$0xff] }
 0x69a   :  { %v1930_v48 = vld [vmem:[%s9376_s9 + $0xe8] sm:$0xff] }
 0x69b   :  { %6644 = vmatprep.mubr.msk.bf16.mxu1 %vm217_vm6, %v1422_v47  ;;  %v5949_v47 = vcombine.low %v1926_v40, %v1930_v48 }
 0x69d   :  { %v1149_v36 = vpop.permute.xlu0 %1148 }
 0x69e   :  { %1154 = vst.msk [vmem:[#allocation2 + $0x10] sm:$0xff] %vm635_vm11, %v1149_v36  ;;  %v5950_v36 = vcombine.high %v1926_v40, %v1930_v48 }
 0x6a0   :  { %2154 = vmatprep.subr.bf16.mxu0 %v5950_v36  ;;  %v1932_v36 = vld [vmem:[%s9376_s9 + $0xf8] sm:$0xff] }
 0x6a1   :  { %v1151_v4 = vpop.permute.xlu0 %1150 }
 0x6a2   :  { %1155 = vst.msk [vmem:[#allocation2 + $0x18] sm:$0xff] %vm635_vm11, %v1151_v4 }
 0x6ce   :  { %v1284_v7 = vpop.permute.xlu1 %1283 }
 0x6cf   :  { %1289 = vst.msk [vmem:[#allocation2 + $0x10] sm:$0xff] %vm771_vm12, %v1284_v7 }
 0x6d2   :  { %v1286_v38 = vpop.permute.xlu0 %1285 }
 0x6d3   :  { %1290 = vst.msk [vmem:[#allocation2 + $0x18] sm:$0xff] %vm771_vm12, %v1286_v38 }
 0x6d9   :  { %v1411_v39 = vpop.permute.xlu1 %1410 }
 0x6da   :  { %1416 = vst.msk [vmem:[#allocation2 + $0x10] sm:$0xff] %vm9382_vm13, %v1411_v39 }
 0x6dd   :  { %v1413_v53 = vpop.permute.xlu0 %1412 }
 0x6de   :  { %1417 = vst.msk [vmem:[#allocation2 + $0x18] sm:$0xff] %vm9382_vm13, %v1413_v53 }
 0x6e1   :  { %v1420_v43 = vld [vmem:[#allocation2 + $0x10] sm:$0xff] }
 0x6e5   :  { %v1421_v45 = vld [vmem:[#allocation2 + $0x18] sm:$0xff] }
 0x6e6   :  { %v1423_v24 = vpack.c.bf16 %v1421_v45, %v1420_v43 }
 0x6e8   :  { %6645 = vmatmul.mubr.msk.bf16.vlgmr.msra.gmra.mxu1 %vm217_vm6, %v1423_v24 }
 0x6e9   :  { %2125 = vmatprep.mubr.bf16.mxu1 %v7305_v2  ;;  %2102 = vmatpush1.bf16.msra.mxu1 %v5947_v3  ;;  %v1918_v3 = vld [vmem:[%s9376_s9 + $0x88] sm:$0xff] }
 0x6ea   :  { %2103 = vmatprep.subr.bf16.mxu1 %v5940_v41  ;;  %v5942_v32 = vcombine.high %v1918_v3, %v1922_v10 }
 0x6ed   :  { %2104 = vmatpush1.bf16.msra.mxu1 %v5939_v35  ;;  %v1915_v35 = vld [vmem:[%s9376_s9 + $0x70] sm:$0xff] }
 0x6ee   :  { %2105 = vmatprep.subr.bf16.mxu1 %v5932_v57  ;;  %v5936_v57 = vcombine.high %v1911_v17, %v1915_v35  ;;  %v5935_v21 = vcombine.low %v1911_v17, %v1915_v35 }
 0x6f1   :  { %2106 = vmatpush1.bf16.msra.mxu1 %v5931_v49  ;;  %v1907_v49 = vld [vmem:[%s9376_s9 + $0x30] sm:$0xff] }
 0x6f2   :  { %2107 = vmatprep.subr.bf16.mxu1 %v5924_v54  ;;  %v5941_v54 = vcombine.low %v1918_v3, %v1922_v10  ;;  %v5928_v60 = vcombine.high %v1903_v20, %v1907_v49  ;;  %v5927_v40 = vcombine.low %v1903_v20, %v1907_v49 }
 0x6f5   :  { %2108 = vmatpush1.bf16.msra.mxu1 %v5923_v42  ;;  %v5934_v42 = vcombine.high %v1910_v37, %v1914_v19 }
 0x6f6   :  { %2207 = vmatprep.subr.bf16.mxu1 %v5952_v29  ;;  %v1906_v29 = vld [vmem:[%s9376_s9 + $0x28] sm:$0xff] }
 0x6f7   :  { %v5926_v48 = vcombine.high %v1902_v14, %v1906_v29 }
 0x7a8   :  { %v6646_v9 = vpop.f32.mrf.mxu1 }
 0x7a9   :  { %v1513_v50 = vadd.f32 %v6646_v9, %v7439_v26 }
 0x7aa   :  { %v1496_v46 = vpop.f32.mrf.mxu1 }
 0x7ab   :  { %v1511_v52 = vadd.f32 %v1496_v46, %v7441_v27 }
 0x7ac   :  { %v6647_v59 = vpop.f32.mrf.mxu1 }
 0x7ad   :  { %v1514_v44 = vadd.f32 %v6647_v59, %v7449_v31 }
 0x7ae   :  { %v1499_v51 = vpop.f32.mrf.mxu1 }
 0x7af   :  { %v1516_v34 = vpack.c.bf16 %v1514_v44, %v1513_v50  ;;  %v1512_v33 = vadd.f32 %v1499_v51, %v7443_v28  ;;  %v1553_v44 = vld [vmem:[%s9372_s5] sm:$0x1] }
 0x7b0   :  { %v1554_v51 = vunpack.c.l.bf16 %v1553_v44 }
 0x7b1   :  { %v1515_v1 = vpack.c.bf16 %v1512_v33, %v1511_v52  ;;  %v7865_v5 = vunpack.c.l.bf16 %v1516_v34  ;;  %v7867_v12 = vunpack.c.h.bf16 %v1516_v34 }
 0x7b2   :  { %v1558_v52 = vrot.slane %v1554_v51, %v7490_v61 }
 0x7b3   :  { %v7869_v55 = vunpack.c.l.bf16 %v1515_v1  ;;  %v7871_v56 = vunpack.c.h.bf16 %v1515_v1  ;;  %v1523_v28 = vmul.f32 %v7865_v5, %v7865_v5  ;;  %v1524_v8 = vmul.f32 %v7867_v12, %v7867_v12 }
 0x7b5   :  { %v1522_v26 = vmul.f32 %v7871_v56, %v7871_v56  ;;  %v1521_v31 = vmul.f32 %v7869_v55, %v7869_v55  ;;  %v1531_v62 = vsel %vm217_vm6, %v1523_v28, 0.0  ;;  %v1534_v18 = vsel %vm217_vm6, %v1524_v8, 0.0 }
 0x7b7   :  { %v1528_v27 = vsel %vm217_vm6, %v1522_v26, 0.0  ;;  %v1525_v58 = vsel %vm217_vm6, %v1521_v31, 0.0 }
 0x7b8   :  { %1529 = vadd.xlane.f32.xlu0 %v1528_v27  ;;  %1526 = vadd.xlane.f32.xlu1 %v1525_v58  ;;  %v1919_v27 = vld [vmem:[%s9376_s9 + $0x90] sm:$0xff] }
 0x7b9   :  { %v1923_v58 = vld [vmem:[%s9376_s9 + $0xb0] sm:$0xff] }
 0x7ba   :  { %v5944_v0 = vcombine.high %v1919_v27, %v1923_v58  ;;  %v5943_v22 = vcombine.low %v1919_v27, %v1923_v58 }
 0x7bc   :  { %1532 = vadd.xlane.f32.xlu0 %v1531_v62  ;;  %1535 = vadd.xlane.f32.xlu1 %v1534_v18 }
 0x841   :  { %v1530_v4 = vpop.xlane.xlu0 %1529  ;;  %v1527_v7 = vpop.xlane.xlu1 %1526 }
 0x842   :  { %v1538_v38 = vmul.f32 0.015625, %v1530_v4  ;;  %v1537_v39 = vmul.f32 0.015625, %v1527_v7  ;;  %v5925_v4 = vcombine.low %v1902_v14, %v1906_v29 }
 0x844   :  { %v1542_v53 = vadd.f32 1e-05, %v1538_v38  ;;  %v1541_v43 = vadd.f32 1e-05, %v1537_v39  ;;  %v1920_v38 = vld [vmem:[%s9376_s9 + $0x98] sm:$0xff] }
 0x845   :  { %v1533_v45 = vpop.xlane.xlu0 %1532  ;;  %v1536_v24 = vpop.xlane.xlu1 %1535  ;;  %v1924_v39 = vld [vmem:[%s9376_s9 + $0xb8] sm:$0xff] }
 0x846   :  { %7003 = vrsqrt.f32 %v1542_v53  ;;  %v1539_v9 = vmul.f32 0.015625, %v1533_v45  ;;  %v1540_v46 = vmul.f32 0.015625, %v1536_v24  ;;  %v1912_v45 = vld [vmem:[%s9376_s9 + $0x58] sm:$0xff] }
 0x847   :  { %7005 = vrsqrt.f32 %v1541_v43  ;;  %v5946_v43 = vcombine.high %v1920_v38, %v1924_v39  ;;  %v1916_v24 = vld [vmem:[%s9376_s9 + $0x78] sm:$0xff] }
 0x848   :  { %v1543_v59 = vadd.f32 1e-05, %v1539_v9  ;;  %v1544_v50 = vadd.f32 1e-05, %v1540_v46  ;;  %v5945_v9 = vcombine.low %v1920_v38, %v1924_v39  ;;  %v5938_v46 = vcombine.high %v1912_v45, %v1916_v24 }
 0x849   :  { %v5937_v44 = vcombine.low %v1912_v45, %v1916_v24 }
 0x84a   :  { %7007 = vrsqrt.f32 %v1543_v59  ;;  %v1904_v59 = vld [vmem:[%s9376_s9 + $0x18] sm:$0xff] }
 0x84b   :  { %7009 = vrsqrt.f32 %v1544_v50  ;;  %v1908_v50 = vld [vmem:[%s9376_s9 + $0x38] sm:$0xff] }
 0x84c   :  { %v5930_v51 = vcombine.high %v1904_v59, %v1908_v50 }
 0x853   :  { %v7004_v34 = vpop.eup %7003 }
 0x854   :  { %v7006_v33 = vpop.eup %7005  ;;  %v1550_v1 = vmul.f32 %v7004_v34, %v7871_v56 }
 0x855   :  { %v1549_v26 = vmul.f32 %v7006_v33, %v7869_v55 }
 0x856   :  { %v1560_v31 = vmul.f32 %v1558_v52, %v1550_v1 }
 0x857   :  { %v7008_v28 = vpop.eup %7007  ;;  %v1559_v8 = vmul.f32 %v1558_v52, %v1549_v26 }
 0x858   :  { %v7010_v62 = vpop.eup %7009  ;;  %v1551_v18 = vmul.f32 %v7008_v28, %v7865_v5 }
 0x859   :  { %v7946_v25 = vpack.c.bf16 %v1560_v31, %v1559_v8  ;;  %v1552_v63 = vmul.f32 %v7010_v62, %v7867_v12 }
 0x85a   :  { %v1561_v23 = vmul.f32 %v1558_v52, %v1551_v18 }
 0x85b   :  { %6656 = vmatprep.mubr.msk.bf16.mxu0 %vm217_vm6, %v7946_v25  ;;  %5955 = vmatmul.mubr.msk.bf16.vlgmr.msra.gmra.mxu1 %vm217_vm6, %v7946_v25  ;;  %v1562_v41 = vmul.f32 %v1558_v52, %v1552_v63  ;;  %v5929_v52 = vcombine.low %v1904_v59, %v1908_v50 }
 0x85c   :  { %2208 = vmatpush1.bf16.msra.mxu1 %v5951_v30  ;;  %2135 = vmatprep.mubr.bf16.mxu1 %v7305_v2  ;;  %v5933_v30 = vcombine.low %v1910_v37, %v1914_v19 }
 0x85d   :  { %v7966_v13 = vpack.c.bf16 %v1562_v41, %v1561_v23  ;;  %2209 = vmatprep.subr.bf16.mxu1 %v5944_v0 }
 0x85f   :  { %6657 = vmatmul.mubr.msk.bf16.vlgmr.msra.gmra.mxu0 %vm217_vm6, %v7966_v13 }
 0x860   :  { %2155 = vmatpush1.bf16.msra.mxu0 %v5949_v47  ;;  %2210 = vmatpush1.bf16.msra.mxu1 %v5943_v22  ;;  %v1928_v47 = vld [vmem:[%s9376_s9 + $0xd8] sm:$0xff] }
 0x861   :  { %2156 = vmatprep.subr.bf16.mxu0 %v5942_v32  ;;  %2211 = vmatprep.subr.bf16.mxu1 %v5936_v57  ;;  %v5954_v7 = vcombine.high %v1928_v47, %v1932_v36  ;;  %v5953_v53 = vcombine.low %v1928_v47, %v1932_v36 }
 0x862   :  { %2178 = vmatprep.mubr.bf16.mxu0 %v7305_v2 }
 0x863   :  { %5956 = vmatmul.mubr.msk.bf16.gmra.mxu1 %vm217_vm6, %v7966_v13 }
 0x864   :  { %2157 = vmatpush1.bf16.msra.mxu0 %v5941_v54  ;;  %2212 = vmatpush1.bf16.msra.mxu1 %v5935_v21 }
 0x865   :  { %2158 = vmatprep.subr.bf16.mxu0 %v5934_v42  ;;  %2213 = vmatprep.subr.bf16.mxu1 %v5928_v60 }
 0x866   :  { %2231 = vmatprep.mubr.bf16.mxu1 %v7305_v2 }
 0x868   :  { %2159 = vmatpush1.bf16.msra.mxu0 %v5933_v30  ;;  %2214 = vmatpush1.bf16.msra.mxu1 %v5927_v40 }
 0x869   :  { %2160 = vmatprep.subr.bf16.mxu0 %v5926_v48 }
 0x86b   :  { %5959 = vmatmul.mubr.msk.bf16.vlgmr.msra.gmra.mxu1 %vm217_vm6, %v7946_v25 }
 0x86c   :  { %2161 = vmatpush1.bf16.msra.mxu0 %v5925_v4  ;;  %2241 = vmatprep.mubr.bf16.mxu1 %v7305_v2 }
 0x86d   :  { %2260 = vmatprep.subr.bf16.mxu0 %v5954_v7 }
 0x86f   :  { %5957 = vmatmul.mubr.msk.bf16.vlgmr.msra.gmra.mxu0 %vm217_vm6, %v7946_v25 }
 0x870   :  { %2261 = vmatpush1.bf16.msra.mxu0 %v5953_v53  ;;  %2188 = vmatprep.mubr.bf16.mxu0 %v7305_v2 }
 0x871   :  { %2262 = vmatprep.subr.bf16.mxu0 %v5946_v43 }
 0x873   :  { %5960 = vmatmul.mubr.msk.bf16.gmra.mxu1 %vm217_vm6, %v7966_v13 }
 0x874   :  { %2263 = vmatpush1.bf16.msra.mxu0 %v5945_v9  ;;  %2368 = vmatprep.mubr.bf16.mxu1 %v7305_v2 }
 0x875   :  { %2264 = vmatprep.subr.bf16.mxu0 %v5938_v46 }
 0x877   :  { %5958 = vmatmul.mubr.msk.bf16.gmra.mxu0 %vm217_vm6, %v7966_v13 }
 0x878   :  { %2265 = vmatpush1.bf16.msra.mxu0 %v5937_v44  ;;  %2284 = vmatprep.mubr.bf16.mxu0 %v7305_v2 }
 0x879   :  { %2266 = vmatprep.subr.bf16.mxu0 %v5930_v51 }
 0x87c   :  { %2267 = vmatpush1.bf16.msra.mxu0 %v5929_v52 }
 0x87f   :  { %5961 = vmatmul.mubr.msk.bf16.vlgmr.msra.gmra.mxu0 %vm217_vm6, %v7946_v25 }
 0x880   :  { %2294 = vmatprep.mubr.bf16.mxu0 %v7305_v2 }
 0x887   :  { %5962 = vmatmul.mubr.msk.bf16.gmra.mxu0 %vm217_vm6, %v7966_v13 }
 0x888   :  { %2421 = vmatprep.mubr.bf16.mxu0 %v7305_v2 }
 0x91f   :  { %v6658_v34 = vpop.f32.mrf.mxu0 }
 0x921   :  { %v1637_v33 = vpop.f32.mrf.mxu0 }
 0x923   :  { %v6659_v1 = vpop.f32.mrf.mxu0 }
 0x924   :  { %v1653_v31 = vpack.c.bf16 %v6659_v1, %v6658_v34 }
 0x925   :  { %v1640_v26 = vpop.f32.mrf.mxu0 }
 0x926   :  { %v1652_v27 = vpack.c.bf16 %v1640_v26, %v1637_v33  ;;  %v1657_v18 = vunpack.c.h.bf16 %v1653_v31  ;;  %v1656_v25 = vunpack.c.l.bf16 %v1653_v31 }
 0x928   :  { %v1655_v58 = vunpack.c.h.bf16 %v1652_v27  ;;  %v1654_v28 = vunpack.c.l.bf16 %v1652_v27  ;;  %v1668_v63 = vsel %vm1658_vm14, %v1657_v18, -inf  ;;  %v1665_v0 = vsel %vm1658_vm14, %v1656_v25, -inf }
 0x92a   :  { %v1662_v8 = vsel %vm1658_vm14, %v1655_v58, -inf  ;;  %v1659_v62 = vsel %vm1658_vm14, %v1654_v28, -inf }
 0x92b   :  { %1663 = vmax.xlane.f32.xlu1 %v1662_v8  ;;  %1660 = vmax.xlane.f32.xlu0 %v1659_v62 }
 0x92f   :  { %1669 = vmax.xlane.f32.xlu1 %v1668_v63  ;;  %1666 = vmax.xlane.f32.xlu0 %v1665_v0 }
 0x9b4   :  { %v1664_v3 = vpop.xlane.xlu1 %1663  ;;  %v1661_v23 = vpop.xlane.xlu0 %1660 }
 0x9b5   :  { %v1672_v10 = vsub.f32 %v1655_v58, %v1664_v3  ;;  %v1671_v17 = vsub.f32 %v1654_v28, %v1661_v23 }
 0x9b7   :  { %v1677_v35 = vmul.f32 1.442695, %v1672_v10  ;;  %v1675_v41 = vmul.f32 1.442695, %v1671_v17 }
 0x9b8   :  { %v1670_v22 = vpop.xlane.xlu1 %1669  ;;  %v1667_v13 = vpop.xlane.xlu0 %1666 }
 0x9b9   :  { %7011 = vpow2.f32 %v1677_v35  ;;  %v1674_v32 = vsub.f32 %v1657_v18, %v1670_v22  ;;  %v1673_v57 = vsub.f32 %v1656_v25, %v1667_v13 }
 0x9ba   :  { %7013 = vpow2.f32 %v1675_v41 }
 0x9bb   :  { %v1681_v37 = vmul.f32 1.442695, %v1674_v32  ;;  %v1679_v19 = vmul.f32 1.442695, %v1673_v57 }
 0x9bd   :  { %7015 = vpow2.f32 %v1681_v37 }
 0x9be   :  { %7017 = vpow2.f32 %v1679_v19 }
 0x9c6   :  { %v7012_v20 = vpop.eup %7011 }
 0x9c7   :  { %v7014_v49 = vpop.eup %7013  ;;  %v1686_v54 = vsel %vm1658_vm14, %v7012_v20, 0.0 }
 0x9c8   :  { %1687 = vadd.xlane.f32.xlu1 %v1686_v54  ;;  %v1683_v21 = vsel %vm1658_vm14, %v7014_v49, 0.0 }
 0x9c9   :  { %1684 = vadd.xlane.f32.xlu0 %v1683_v21 }
 0x9ca   :  { %v7016_v42 = vpop.eup %7015 }
 0x9cb   :  { %v7018_v60 = vpop.eup %7017  ;;  %v1692_v14 = vsel %vm1658_vm14, %v7016_v42, 0.0 }
 0x9cc   :  { %1693 = vadd.xlane.f32.xlu1 %v1692_v14  ;;  %v1689_v29 = vsel %vm1658_vm14, %v7018_v60, 0.0 }
 0x9cd   :  { %1690 = vadd.xlane.f32.xlu0 %v1689_v29 }
 0xa51   :  { %v1688_v30 = vpop.xlane.xlu1 %1687 }
 0xa52   :  { %7019 = vrcp.f32 %v1688_v30  ;;  %v1685_v40 = vpop.xlane.xlu0 %1684 }
 0xa53   :  { %7021 = vrcp.f32 %v1685_v40 }
 0xa55   :  { %v1694_v48 = vpop.xlane.xlu1 %1693 }
 0xa56   :  { %7023 = vrcp.f32 %v1694_v48  ;;  %v1691_v47 = vpop.xlane.xlu0 %1690 }
 0xa57   :  { %7025 = vrcp.f32 %v1691_v47 }
 0xa5f   :  { %v7020_v36 = vpop.eup %7019 }
 0xa60   :  { %v7022_v4 = vpop.eup %7021  ;;  %v8042_v7 = vmul.f32 %v7020_v36, %v7012_v20 }
 0xa61   :  { %v8044_v38 = vmul.f32 %v7022_v4, %v7014_v49 }
 0xa62   :  { %v1706_v39 = vsel %vm1658_vm14, %v8042_v7, -inf }
 0xa63   :  { %v7024_v53 = vpop.eup %7023  ;;  %1707 = vmax.xlane.f32.xlu1 %v1706_v39  ;;  %v1703_v43 = vsel %vm1658_vm14, %v8044_v38, -inf }
 0xa64   :  { %v7026_v45 = vpop.eup %7025  ;;  %1704 = vmax.xlane.f32.xlu0 %v1703_v43  ;;  %v8050_v24 = vmul.f32 %v7024_v53, %v7016_v42 }
 0xa65   :  { %v8052_v9 = vmul.f32 %v7026_v45, %v7018_v60 }
 0xa66   :  { %v1712_v46 = vsel %vm1658_vm14, %v8050_v24, -inf }
 0xa67   :  { %1713 = vmax.xlane.f32.xlu1 %v1712_v46  ;;  %v1709_v59 = vsel %vm1658_vm14, %v8052_v9, -inf }
 0xa68   :  { %1710 = vmax.xlane.f32.xlu0 %v1709_v59 }
 0xaec   :  { %v8058_v50 = vpop.xlane.xlu1 %1707 }
 0xaed   :  { %v8060_v44 = vpop.xlane.xlu0 %1704  ;;  %vm1716_vm15 = vcmp.eq.f32.partialorder %v8042_v7, %v8058_v50 }
 0xaee   :  { %v1720_v51 = vsel %vm1716_vm15, %v7433_v16, 8  ;;  %vm1715_vm0 = vcmp.eq.f32.partialorder %v8044_v38, %v8060_v44 }
 0xaef   :  { %v1738_v52 = vsel %vm1658_vm14, %v1720_v51, 2147483647  ;;  %v1719_v34 = vsel %vm1715_vm0, %v7433_v16, 8 }
 0xaf0   :  { %v8069_v33 = vpop.xlane.xlu1 %1713  ;;  %v1740_v1 = vshra.s32 %v1738_v52, 16  ;;  %v1723_v26 = vsel %vm1658_vm14, %v1719_v34, 2147483647  ;;  %v1739_v10 = vand.u32 65535, %v1738_v52 }
 0xaf1   :  { %v8072_v31 = vpop.xlane.xlu0 %1710  ;;  %v1725_v27 = vshra.s32 %v1723_v26, 16  ;;  %vm1718_vm1 = vcmp.eq.f32.partialorder %v8050_v24, %v8069_v33  ;;  %v1724_v17 = vand.u32 65535, %v1723_v26 }
 0xaf2   :  { %v1742_v58 = vcvt.s32.f32 %v1740_v1  ;;  %v1722_v28 = vsel %vm1718_vm1, %v7433_v16, 8  ;;  %vm1717_vm2 = vcmp.eq.f32.partialorder %v8052_v9, %v8072_v31  ;;  %v1741_v41 = vcvt.s32.f32 %v1739_v10 }
 0xaf3   :  { %v1727_v8 = vcvt.s32.f32 %v1725_v27  ;;  %v1768_v62 = vsel %vm1658_vm14, %v1722_v28, 2147483647  ;;  %v1721_v18 = vsel %vm1717_vm2, %v7433_v16, 8  ;;  %v1726_v57 = vcvt.s32.f32 %v1724_v17 }
 0xaf4   :  { %1743 = vmin.xlane.f32.xlu1 %v1742_v58  ;;  %v1770_v25 = vshra.s32 %v1768_v62, 16  ;;  %v1753_v63 = vsel %vm1658_vm14, %v1721_v18, 2147483647  ;;  %v1769_v22 = vand.u32 65535, %v1768_v62 }
 0xaf5   :  { %1728 = vmin.xlane.f32.xlu0 %v1727_v8  ;;  %v1755_v0 = vshra.s32 %v1753_v63, 16  ;;  %v1754_v13 = vand.u32 65535, %v1753_v63 }
 0xaf6   :  { %v1772_v3 = vcvt.s32.f32 %v1770_v25  ;;  %v1771_v49 = vcvt.s32.f32 %v1769_v22 }
 0xaf7   :  { %v1757_v23 = vcvt.s32.f32 %v1755_v0  ;;  %v1756_v21 = vcvt.s32.f32 %v1754_v13 }
 0xaf8   :  { %1773 = vmin.xlane.f32.xlu1 %v1772_v3 }
 0xaf9   :  { %1758 = vmin.xlane.f32.xlu0 %v1757_v23 }
 0xb7d   :  { %v1744_v35 = vpop.xlane.xlu1 %1743 }
 0xb7e   :  { %v1729_v32 = vpop.xlane.xlu0 %1728  ;;  %vm1745_vm3 = vcmp.eq.f32.partialorder %v1742_v58, %v1744_v35  ;;  %v1750_v14 = vcvt.f32.s32 %v1744_v35 }
 0xb7f   :  { %v1746_v37 = vsel %vm1745_vm3, %v1741_v41, inf  ;;  %vm1730_vm4 = vcmp.eq.f32.partialorder %v1727_v8, %v1729_v32  ;;  %v1735_v29 = vcvt.f32.s32 %v1729_v32 }
 0xb80   :  { %1747 = vmin.xlane.f32.xlu1 %v1746_v37  ;;  %v1731_v19 = vsel %vm1730_vm4, %v1726_v57, inf  ;;  %v1751_v40 = vshll.u32 %v1750_v14, 16 }
 0xb81   :  { %1732 = vmin.xlane.f32.xlu0 %v1731_v19  ;;  %v1774_v20 = vpop.xlane.xlu1 %1773  ;;  %v1736_v4 = vshll.u32 %v1735_v29, 16 }
 0xb82   :  { %v1759_v54 = vpop.xlane.xlu0 %1758  ;;  %vm1775_vm5 = vcmp.eq.f32.partialorder %v1772_v3, %v1774_v20  ;;  %v1780_v48 = vcvt.f32.s32 %v1774_v20 }
 0xb83   :  { %v1776_v42 = vsel %vm1775_vm5, %v1771_v49, inf  ;;  %vm1760_vm15 = vcmp.eq.f32.partialorder %v1757_v23, %v1759_v54  ;;  %v1765_v39 = vcvt.f32.s32 %v1759_v54 }
 0xb84   :  { %1777 = vmin.xlane.f32.xlu1 %v1776_v42  ;;  %v1761_v60 = vsel %vm1760_vm15, %v1756_v21, inf  ;;  %v1781_v59 = vshll.u32 %v1780_v48, 16 }
 0xb85   :  { %1762 = vmin.xlane.f32.xlu0 %v1761_v60  ;;  %v1766_v34 = vshll.u32 %v1765_v39, 16 }
 0xc09   :  { %v1748_v30 = vpop.xlane.xlu1 %1747 }
 0xc0a   :  { %v1749_v47 = vcvt.f32.s32 %v1748_v30  ;;  %v1733_v36 = vpop.xlane.xlu0 %1732 }
 0xc0b   :  { %v1734_v53 = vcvt.f32.s32 %v1733_v36 }
 0xc0c   :  { %v8082_v43 = vadd.s32 %v1751_v40, %v1749_v47 }
 0xc0d   :  { %v8084_v45 = vadd.s32 %v1736_v4, %v1734_v53  ;;  %v1778_v46 = vpop.xlane.xlu1 %1777 }
 0xc0e   :  { %v1779_v51 = vcvt.f32.s32 %v1778_v46  ;;  %v1763_v52 = vpop.xlane.xlu0 %1762  ;;  %vm1784_vm0 = vcmp.eq.s32.totalorder %v7433_v16, %v8082_v43 }
 0xc0f   :  { %v1764_v1 = vcvt.f32.s32 %v1763_v52  ;;  %v1796_v26 = vsel %vm1784_vm0, -1.0, %v8042_v7  ;;  %vm1783_vm1 = vcmp.eq.s32.totalorder %v7433_v16, %v8084_v45 }
 0xc10   :  { %v8094_v27 = vadd.s32 %v1781_v59, %v1779_v51  ;;  %v1802_v58 = vsel %vm1658_vm14, %v1796_v26, -inf  ;;  %v1795_v28 = vsel %vm1783_vm1, -1.0, %v8044_v38 }
 0xc11   :  { %v8101_v8 = vadd.s32 %v1766_v34, %v1764_v1  ;;  %1803 = vmax.xlane.f32.xlu1 %v1802_v58  ;;  %v1799_v62 = vsel %vm1658_vm14, %v1795_v28, -inf  ;;  %v2305_v34 = vld [vmem:[%s9378_s11] sm:$0xff]  ;;  %v2306_v1 = vld [vmem:[%s9378_s11 + $0x8] sm:$0xff] }
 0xc12   :  { %1800 = vmax.xlane.f32.xlu0 %v1799_v62  ;;  %vm1786_vm2 = vcmp.eq.s32.totalorder %v7433_v16, %v8094_v27  ;;  %v5966_v58 = vcombine.high %v2306_v1, %v2306_v1  ;;  %v5965_v62 = vcombine.low %v2306_v1, %v2306_v1 }
 0xc13   :  { %v1798_v7 = vsel %vm1786_vm2, -1.0, %v8050_v24  ;;  %vm1785_vm3 = vcmp.eq.s32.totalorder %v7433_v16, %v8101_v8  ;;  %v6844_v8 = vld [vmem:[%s9377_s10 + $0xf0] sm:$0xff]  }
 0xc14   :  { %v1808_v18 = vsel %vm1658_vm14, %v1798_v7, -inf  ;;  %v1797_v38 = vsel %vm1785_vm3, -1.0, %v8052_v9 }
 0xc15   :  { %1809 = vmax.xlane.f32.xlu1 %v1808_v18  ;;  %v1805_v25 = vsel %vm1658_vm14, %v1797_v38, -inf }
 0xc16   :  { %1806 = vmax.xlane.f32.xlu0 %v1805_v25  ;;  %v6840_v25 = vld [vmem:[%s9377_s10 + $0xf8] sm:$0xff]  }
 0xc9a   :  { %v8118_v63 = vpop.xlane.xlu1 %1803 }
 0xc9b   :  { %v8120_v0 = vpop.xlane.xlu0 %1800  ;;  %vm1812_vm4 = vcmp.eq.f32.partialorder %v1796_v26, %v8118_v63  ;;  %v5964_v26 = vcombine.high %v2305_v34, %v2305_v34 }
 0xc9c   :  { %vm1811_vm5 = vcmp.eq.f32.partialorder %v1795_v28, %v8120_v0  ;;  %v1816_v24 = vsel %vm1812_vm4, %v7433_v16, 8  ;;  %v5963_v28 = vcombine.low %v2305_v34, %v2305_v34 }
 0xc9d   :  { %v1834_v3 = vsel %vm1658_vm14, %v1816_v24, 2147483647  ;;  %v1815_v23 = vsel %vm1811_vm5, %v7433_v16, 8  ;;  %v1888_v24 = vadd.f32 %v8118_v63, %v8058_v50 }
 0xc9e   :  { %v8127_v10 = vpop.xlane.xlu1 %1809  ;;  %v1836_v9 = vshra.s32 %v1834_v3, 16  ;;  %v1819_v17 = vsel %vm1658_vm14, %v1815_v23, 2147483647  ;;  %v1835_v42 = vand.u32 65535, %v1834_v3  ;;  %v1887_v3 = vadd.f32 %v8120_v0, %v8060_v44 }
 0xc9f   :  { %v8130_v35 = vpop.xlane.xlu0 %1806  ;;  %v1821_v41 = vshra.s32 %v1819_v17, 16  ;;  %vm1814_vm15 = vcmp.eq.f32.partialorder %v1798_v7, %v8127_v10  ;;  %v1820_v60 = vand.u32 65535, %v1819_v17  ;;  %7027 = vrcp.f32 %v1888_v24  ;;  %v6853_v24 = vld [vmem:[%s9377_s10 + $0x20] sm:$0xff]  }
 0xca0   :  { %vm1813_vm13 = vcmp.eq.f32.partialorder %v1797_v38, %v8130_v35  ;;  %v1838_v22 = vcvt.s32.f32 %v1836_v9  ;;  %v1818_v13 = vsel %vm1814_vm15, %v7433_v16, 8  ;;  %v1837_v29 = vcvt.s32.f32 %v1835_v42  ;;  %v6839_v38 = vld [vmem:[%s9377_s10 + $0x78] sm:$0xff]  }
 0xca1   :  { %v1823_v32 = vcvt.s32.f32 %v1821_v41  ;;  %v1864_v57 = vsel %vm1658_vm14, %v1818_v13, 2147483647  ;;  %v1817_v37 = vsel %vm1813_vm13, %v7433_v16, 8  ;;  %v1822_v48 = vcvt.s32.f32 %v1820_v60 }
 0xca2   :  { %1839 = vmin.xlane.f32.xlu1 %v1838_v22  ;;  %v1866_v19 = vshra.s32 %v1864_v57, 16  ;;  %v1849_v20 = vsel %vm1658_vm14, %v1817_v37, 2147483647  ;;  %v1865_v30 = vand.u32 65535, %v1864_v57  ;;  %v1890_v23 = vadd.f32 %v8127_v10, %v8069_v33 }
 0xca3   :  { %1824 = vmin.xlane.f32.xlu0 %v1823_v32  ;;  %v1851_v49 = vshra.s32 %v1849_v20, 16  ;;  %v1850_v47 = vand.u32 65535, %v1849_v20  ;;  %7029 = vrcp.f32 %v1887_v3  ;;  %v1889_v9 = vadd.f32 %v8130_v35, %v8072_v31  ;;  %v6854_v3 = vld [vmem:[%s9377_s10 + $0xa0] sm:$0xff]  }
 0xca4   :  { %v1868_v54 = vcvt.s32.f32 %v1866_v19  ;;  %v1867_v53 = vcvt.s32.f32 %v1865_v30  ;;  %7031 = vrcp.f32 %v1890_v23  ;;  %v6855_v23 = vld [vmem:[%s9377_s10 + $0x58] sm:$0xff]  }
 0xca5   :  { %v1853_v21 = vcvt.s32.f32 %v1851_v49  ;;  %v1852_v59 = vcvt.s32.f32 %v1850_v47  ;;  %7033 = vrcp.f32 %v1889_v9  ;;  %v6856_v9 = vld [vmem:[%s9377_s10 + $0xd8] sm:$0xff]  }
 0xca6   :  { %1869 = vmin.xlane.f32.xlu1 %v1868_v54 }
 0xca7   :  { %1854 = vmin.xlane.f32.xlu0 %v1853_v21 }
 0xd2b   :  { %v1840_v14 = vpop.xlane.xlu1 %1839 }
 0xd2c   :  { %v1825_v40 = vpop.xlane.xlu0 %1824  ;;  %vm1841_vm4 = vcmp.eq.f32.partialorder %v1838_v22, %v1840_v14  ;;  %v1846_v17 = vcvt.f32.s32 %v1840_v14  ;;  %v1787_v14 = vsel %vm1783_vm1, %v8060_v44, 0.0  ;;  %v1790_v44 = vsel %vm1786_vm2, %v8069_v33, 0.0  ;;  %v6842_v33 = vld [vmem:[%s9377_s10 + $0xb8] sm:$0xff]  }
 0xd2d   :  { %v1842_v36 = vsel %vm1841_vm4, %v1837_v29, inf  ;;  %vm1826_vm13 = vcmp.eq.f32.partialorder %v1823_v32, %v1825_v40  ;;  %vm2323_vm4 = vcmask 1043456   ;;  %v1831_v41 = vcvt.f32.s32 %v1825_v40 }
 0xd2e   :  { %1843 = vmin.xlane.f32.xlu1 %v1842_v36  ;;  %v1827_v4 = vsel %vm1826_vm13, %v1822_v48, inf  ;;  %5967 = vmatprep.subr.msk.bf16.mxu1 %vm2323_vm4, %v5964_v26  ;;  %v2325_v7 = vsel %vm2323_vm4, %v5963_v28, 0  ;;  %v2331_v18 = vsel %vm2323_vm4, %v5965_v62, 0  ;;  %v1847_v13 = vshll.u32 %v1846_v17, 16  ;;  %v7028_v48 = vpop.eup %7027  ;;  %v6847_v28 = vld [vmem:[%s9377_s10 + $0x68] sm:$0xff]   ;;  %v6857_v17 = vld [vmem:[%s9377_s10 + $0x18] sm:$0xff]  }
 0xd2f   :  { %1828 = vmin.xlane.f32.xlu0 %v1827_v4  ;;  %v1870_v39 = vpop.xlane.xlu1 %1869  ;;  %5970 = vmatprep.subr.msk.bf16.mxu0 %vm2323_vm4, %v5966_v58  ;;  %v1832_v19 = vshll.u32 %v1831_v41, 16  ;;  %v6846_v58 = vld [vmem:[%s9377_s10 + $0xb0] sm:$0xff]   ;;  %v6848_v62 = vld [vmem:[%s9377_s10 + $0xe8] sm:$0xff]   ;;  %v6858_v41 = vld [vmem:[%s9377_s10 + $0x98] sm:$0xff]  }
 0xd30   :  { %v1855_v46 = vpop.xlane.xlu0 %1854  ;;  %vm1871_vm5 = vcmp.eq.f32.partialorder %v1868_v54, %v1870_v39  ;;  %2351 = vmatpush1.bf16.msra.mxu1 %v2325_v7  ;;  %2404 = vmatpush1.bf16.msra.mxu0 %v2331_v18  ;;  %v1876_v32 = vcvt.f32.s32 %v1870_v39  ;;  %v6849_v7 = vld [vmem:[%s9377_s10 + $0x28] sm:$0xff]  }
 0xd31   :  { %v1872_v51 = vsel %vm1871_vm5, %v1867_v53, inf  ;;  %vm1856_vm15 = vcmp.eq.f32.partialorder %v1853_v21, %v1855_v46  ;;  %6358 = vmatprep.subr.bf16.mxu1 %v6839_v38  ;;  %6386 = vmatprep.subr.bf16.mxu0 %v6840_v25  ;;  %v1861_v20 = vcvt.f32.s32 %v1855_v46  ;;  %v1788_v21 = vsel %vm1784_vm0, %v8058_v50, 0.0  ;;  %v7030_v50 = vpop.eup %7029  ;;  %v6850_v18 = vld [vmem:[%s9377_s10 + $0xa8] sm:$0xff]   ;;  %v6851_v38 = vld [vmem:[%s9377_s10 + $0x60] sm:$0xff]  }
 0xd32   :  { %1873 = vmin.xlane.f32.xlu1 %v1872_v51  ;;  %v1857_v52 = vsel %vm1856_vm15, %v1852_v59, inf  ;;  %v1877_v29 = vshll.u32 %v1876_v32, 16  ;;  %v7032_v59 = vpop.eup %7031  ;;  %v6852_v25 = vld [vmem:[%s9377_s10 + $0xe0] sm:$0xff]   ;;  %v6861_v32 = vld [vmem:[%s9377_s10 + $0x10] sm:$0xff]  }
 0xd33   :  { %1858 = vmin.xlane.f32.xlu0 %v1857_v52  ;;  %v1862_v47 = vshll.u32 %v1861_v20, 16  ;;  %v7034_v27 = vpop.eup %7033  ;;  %v6865_v20 = vld [vmem:[%s9377_s10 + $0x8] sm:$0xff]  }
 0xdb7   :  { %v1844_v22 = vpop.xlane.xlu1 %1843 }
 0xdb8   :  { %v1845_v57 = vcvt.f32.s32 %v1844_v22  ;;  %v1829_v37 = vpop.xlane.xlu0 %1828  ;;  %v6859_v22 = vld [vmem:[%s9377_s10 + $0x50] sm:$0xff]  }
 0xdb9   :  { %v1830_v49 = vcvt.f32.s32 %v1829_v37  ;;  %v6863_v37 = vld [vmem:[%s9377_s10 + $0x48] sm:$0xff]  }
 0xdba   :  { %v1848_v54 = vadd.s32 %v1847_v13, %v1845_v57  ;;  %v6860_v13 = vld [vmem:[%s9377_s10 + $0xd0] sm:$0xff]  }
 0xdbb   :  { %v1833_v42 = vadd.s32 %v1832_v19, %v1830_v49  ;;  %v1874_v60 = vpop.xlane.xlu1 %1873  ;;  %v6862_v57 = vld [vmem:[%s9377_s10 + $0x90] sm:$0xff]   ;;  %v6864_v19 = vld [vmem:[%s9377_s10 + $0xc8] sm:$0xff]  }
 0xdbc   :  { %vm1880_vm13 = vcmp.eq.s32.totalorder %v7433_v16, %v1848_v54  ;;  %v1875_v30 = vcvt.f32.s32 %v1874_v60  ;;  %v1859_v40 = vpop.xlane.xlu0 %1858  ;;  %v6866_v49 = vld [vmem:[%s9377_s10 + $0x88] sm:$0xff]   ;;  %v6867_v54 = vld [vmem:[%s9377_s10 + $0x40] sm:$0xff]  }
 0xdbd   :  { %v1884_v36 = vsel %vm1880_vm13, %v8118_v63, %v1788_v21  ;;  %vm1879_vm5 = vcmp.eq.s32.totalorder %v7433_v16, %v1833_v42  ;;  %v1860_v43 = vcvt.f32.s32 %v1859_v40  ;;  %v1789_v63 = vsel %vm1785_vm3, %v8072_v31, 0.0  ;;  %v6843_v31 = vld [vmem:[%s9377_s10 + $0x70] sm:$0xff]   ;;  %v6868_v21 = vld [vmem:[%s9377_s10 + $0xc0] sm:$0xff]  }
 0xdbe   :  { %v1894_v4 = vmul.f32 %v7028_v48, %v1884_v36  ;;  %v1883_v39 = vsel %vm1879_vm5, %v8120_v0, %v1787_v14  ;;  %v1878_v53 = vadd.s32 %v1877_v29, %v1875_v30  ;;  %v6841_v0 = vld [vmem:[%s9377_s10 + $0x38] sm:$0xff]   ;;  %v6869_v42 = vld [vmem:[%s9377_s10] sm:$0xff]   ;;  %v8283_v14 = vpop.f32.mrf.mxu1  ;;  %v8285_v29 = vpop.f32.mrf.mxu0 }
 0xdbf   :  { %v1892_v46 = vmul.f32 %v7030_v50, %v1883_v39  ;;  %v1863_v45 = vadd.s32 %v1862_v47, %v1860_v43  ;;  %v6870_v60 = vld [vmem:[%s9377_s10 + $0x80] sm:$0xff]   ;;  %v5973_v39 = vmul.f32 -1.442695, %v8283_v14 }
 0xdc0   :  { %vm1882_vm0 = vcmp.eq.s32.totalorder %v7433_v16, %v1878_v53  ;;  %v8287_v30 = vpop.f32.mrf.mxu1  ;;  %v8289_v40 = vpop.f32.mrf.mxu0 }
 0xdc1   :  { %v1899_v51 = vpack.c.bf16 %v1894_v4, %v1892_v46  ;;  %v1886_v52 = vsel %vm1882_vm0, %v8127_v10, %v1790_v44  ;;  %vm1881_vm1 = vcmp.eq.s32.totalorder %v7433_v16, %v1863_v45  ;;  %v5974_v46 = vmul.f32 -1.442695, %v8287_v30 }
 0xdc2   :  { %v1898_v34 = vmul.f32 %v7032_v59, %v1886_v52  ;;  %v1885_v1 = vsel %vm1881_vm1, %v8130_v35, %v1789_v63  ;;  %v6845_v35 = vld [vmem:[%s9377_s10 + $0x30] sm:$0xff]   ;;  %v8291_v48 = vpop.f32.mrf.mxu1  ;;  %v8293_v47 = vpop.f32.mrf.mxu0  ;;  %7035 = vpow2.f32 %v5973_v39 }
 0xdc3   :  { %v1896_v10 = vmul.f32 %v7034_v27, %v1885_v1  ;;  %5968 = vmatmul.mubr.msk.bf16.vlgmr.msra.gmra.mxu1 %vm1658_vm14, %v1899_v51  ;;  %5971 = vmatmul.mubr.msk.bf16.vlgmr.msra.gmra.mxu0 %vm1658_vm14, %v1899_v51  ;;  %v5977_v45 = vmul.f32 -1.442695, %v8291_v48  ;;  %v5976_v51 = vmul.f32 -1.442695, %v8289_v40  ;;  %7037 = vpow2.f32 %v5974_v46 }
 0xdc4   :  { %2378 = vmatprep.mubr.bf16.mxu1 %v7305_v2  ;;  %2431 = vmatprep.mubr.bf16.mxu0 %v7305_v2  ;;  %v8295_v36 = vpop.f32.mrf.mxu1  ;;  %v8297_v43 = vpop.f32.mrf.mxu0  ;;  %v5979_v52 = vmul.f32 -1.442695, %v8293_v47 }
 0xdc5   :  { %v1900_v26 = vpack.c.bf16 %v1898_v34, %v1896_v10  ;;  %6359 = vmatpush3.bf16.msra.mxu1 %v6841_v0  ;;  %6387 = vmatpush3.bf16.msra.mxu0 %v6842_v33  ;;  %v5978_v44 = vmul.f32 -1.442695, %v8295_v36  ;;  %7039 = vpow2.f32 %v5977_v45  ;;  %v5980_v0 = vmul.f32 -1.442695, %v8297_v43 }
 0xdc6   :  { %6360 = vmatprep.subr.bf16.mxu1 %v6843_v31  ;;  %6388 = vmatprep.subr.bf16.mxu0 %v6844_v8  ;;  %v8299_v50 = vpop.f32.mrf.mxu1  ;;  %v8301_v4 = vpop.f32.mrf.mxu0  ;;  %v5975_v33 = vmul.f32 -1.442695, %v8285_v29 }
 0xdc7   :  { %7041 = vpow2.f32 %v5978_v44  ;;  %v5981_v34 = vmul.f32 -1.442695, %v8299_v50 }
 0xdc8   :  { %v8304_v53 = vpop.f32.mrf.mxu1  ;;  %v8309_v59 = vpop.f32.mrf.mxu0  ;;  %7043 = vpow2.f32 %v5976_v51 }
 0xdc9   :  { %6361 = vmatpush3.bf16.msra.mxu1 %v6845_v35  ;;  %6389 = vmatpush3.bf16.msra.mxu0 %v6846_v58  ;;  %v5982_v31 = vmul.f32 -1.442695, %v8304_v53  ;;  %7045 = vpow2.f32 %v5979_v52  ;;  %v5984_v35 = vmul.f32 -1.442695, %v8309_v59 }
 0xdca   :  { %6362 = vmatprep.subr.bf16.mxu1 %v6847_v28  ;;  %6390 = vmatprep.subr.bf16.mxu0 %v6848_v62  ;;  %v8311_v63 = vpop.f32.mrf.mxu1  ;;  %v8317_v27 = vpop.f32.mrf.mxu0  ;;  %7047 = vpow2.f32 %v5980_v0 }
 0xdcb   :  { %5969 = vmatmul.mubr.msk.bf16.gmra.mxu1 %vm1658_vm14, %v1900_v26  ;;  %5972 = vmatmul.mubr.msk.bf16.gmra.mxu0 %vm1658_vm14, %v1900_v26  ;;  %v5985_v8 = vmul.f32 -1.442695, %v8311_v63  ;;  %7049 = vpow2.f32 %v5975_v33  ;;  %v5987_v58 = vmul.f32 -1.442695, %v8317_v27 }
 0xdcc   :  { %v8320_v1 = vpop.f32.mrf.mxu1  ;;  %v8325_v26 = vpop.f32.mrf.mxu0  ;;  %7051 = vpow2.f32 %v5981_v34 }
 0xdcd   :  { %6363 = vmatpush3.bf16.msra.mxu1 %v6849_v7  ;;  %6391 = vmatpush3.bf16.msra.mxu0 %v6850_v18  ;;  %v5986_v10 = vmul.f32 -1.442695, %v8320_v1  ;;  %7053 = vpow2.f32 %v5982_v31  ;;  %v5988_v28 = vmul.f32 -1.442695, %v8325_v26  ;;  %v5983_v7 = vmul.f32 -1.442695, %v8301_v4 }
 0xdce   :  { %6364 = vmatprep.subr.bf16.mxu1 %v6851_v38  ;;  %6392 = vmatprep.subr.bf16.mxu0 %v6852_v25  ;;  %7055 = vpow2.f32 %v5985_v8  ;;  %v8330_v62 = vpop.f32.mrf.mxu1  ;;  %v8333_v18 = vpop.f32.mrf.mxu0 }
 0xdcf   :  { %7057 = vpow2.f32 %v5986_v10  ;;  %v7036_v38 = vpop.eup %7035 }
 0xdd0   :  { %7059 = vpow2.f32 %v5984_v35  ;;  %v7038_v25 = vpop.eup %7037 }
 0xdd1   :  { %6365 = vmatpush3.bf16.msra.mxu1 %v6853_v24  ;;  %6393 = vmatpush3.bf16.msra.mxu0 %v6854_v3  ;;  %7061 = vpow2.f32 %v5987_v58  ;;  %v8335_v3 = vpop.f32.mrf.mxu1 }
 0xdd2   :  { %6366 = vmatprep.subr.bf16.mxu1 %v6855_v23  ;;  %6394 = vmatprep.subr.bf16.mxu0 %v6856_v9  ;;  %7063 = vpow2.f32 %v5988_v28  ;;  %v7040_v24 = vpop.eup %7039  ;;  %v8337_v23 = vpop.f32.mrf.mxu0 }
 0xdd3   :  { %7065 = vpow2.f32 %v5983_v7 }
 0xdd4   :  { %v7042_v9 = vpop.eup %7041 }
 0xdd5   :  { %6367 = vmatpush3.bf16.msra.mxu1 %v6857_v17  ;;  %6395 = vmatpush3.bf16.msra.mxu0 %v6858_v41  ;;  %v2490_v17 = vadd.f32 1.0, %v7036_v38  ;;  %v7044_v41 = vpop.eup %7043 }
 0xdd6   :  { %6368 = vmatprep.subr.bf16.mxu1 %v6859_v22  ;;  %6396 = vmatprep.subr.bf16.mxu0 %v6860_v13  ;;  %v2491_v22 = vadd.f32 1.0, %v7038_v25  ;;  %v7046_v13 = vpop.eup %7045 }
 0xdd7   :  { %7067 = vrcp.f32 %v2490_v17 }
 0xdd8   :  { %7069 = vrcp.f32 %v2491_v22 }
 0xdd9   :  { %6369 = vmatpush3.bf16.msra.mxu1 %v6861_v32  ;;  %6397 = vmatpush3.bf16.msra.mxu0 %v6862_v57  ;;  %v2494_v32 = vadd.f32 1.0, %v7040_v24  ;;  %v7048_v57 = vpop.eup %7047 }
 0xdda   :  { %6370 = vmatprep.subr.bf16.mxu1 %v6863_v37  ;;  %6398 = vmatprep.subr.bf16.mxu0 %v6864_v19  ;;  %v2495_v37 = vadd.f32 1.0, %v7042_v9  ;;  %v8339_v19 = vpop.f32.mrf.mxu1  ;;  %v2497_v39 = vadd.f32 1.0, %v7048_v57 }
 0xddb   :  { %7071 = vrcp.f32 %v2494_v32 }
 0xddc   :  { %7073 = vrcp.f32 %v2495_v37  ;;  %v8343_v44 = vpop.f32.mrf.mxu1 }
 0xddd   :  { %6371 = vmatpush3.bf16.msra.mxu1 %v6865_v20  ;;  %6399 = vmatpush3.bf16.msra.mxu0 %v6866_v49  ;;  %v8341_v20 = vpop.f32.mrf.mxu0  ;;  %v7050_v49 = vpop.eup %7049 }
 0xdde   :  { %6372 = vmatprep.subr.bf16.mxu1 %v6867_v54  ;;  %6400 = vmatprep.subr.bf16.mxu0 %v6868_v21  ;;  %v2493_v54 = vadd.f32 1.0, %v7044_v41  ;;  %v7052_v21 = vpop.eup %7051  ;;  %v2492_v45 = vadd.f32 1.0, %v7050_v49  ;;  %v8347_v58 = vpop.f32.mrf.mxu1 }
 0xddf   :  { %v8345_v51 = vpop.f32.mrf.mxu0  ;;  %v2498_v0 = vadd.f32 1.0, %v7052_v21 }
 0xde0   :  { %7075 = vrcp.f32 %v2493_v54  ;;  %v8351_v9 = vpop.f32.mrf.mxu1 }
 0xde1   :  { %6373 = vmatpush3.bf16.msra.mxu1 %v6869_v42  ;;  %6401 = vmatpush3.bf16.msra.mxu0 %v6870_v60  ;;  %v2496_v42 = vadd.f32 1.0, %v7046_v13  ;;  %v7054_v60 = vpop.eup %7053  ;;  %v8349_v28 = vpop.f32.mrf.mxu0 }
 0xde2   :  { %6660 = vmatprep.subr.bf16.mxu0 %v9383_v15  ;;  %v7056_v46 = vpop.eup %7055  ;;  %v2499_v34 = vadd.f32 1.0, %v7054_v60  ;;  %v8355_v57 = vpop.f32.mrf.mxu1 }
 0xde3   :  { %v7058_v52 = vpop.eup %7057  ;;  %7077 = vrcp.f32 %v2496_v42  ;;  %v2502_v8 = vadd.f32 1.0, %v7056_v46  ;;  %v8353_v41 = vpop.f32.mrf.mxu0 }
 0xde4   :  { %v7060_v33 = vpop.eup %7059  ;;  %7079 = vrcp.f32 %v2497_v39  ;;  %v2503_v35 = vadd.f32 1.0, %v7058_v52  ;;  %v8359_v60 = vpop.f32.mrf.mxu1 }
 0xde5   :  { %v7062_v31 = vpop.eup %7061  ;;  %7081 = vrcp.f32 %v2492_v45  ;;  %v2501_v38 = vadd.f32 1.0, %v7060_v33  ;;  %v8357_v37 = vpop.f32.mrf.mxu0 }
 0xde6   :  { %v7064_v10 = vpop.eup %7063  ;;  %7083 = vrcp.f32 %v2498_v0  ;;  %v2504_v25 = vadd.f32 1.0, %v7062_v31 }
 0xde7   :  { %v7066_v7 = vpop.eup %7065  ;;  %7085 = vrcp.f32 %v2499_v34  ;;  %v2505_v24 = vadd.f32 1.0, %v7064_v10  ;;  %v8361_v39 = vpop.f32.mrf.mxu0 }
 0xde8   :  { %7087 = vrcp.f32 %v2502_v8  ;;  %v2500_v17 = vadd.f32 1.0, %v7066_v7  ;;  %v7068_v22 = vpop.eup %7067 }
 0xde9   :  { %7089 = vrcp.f32 %v2503_v35  ;;  %v7070_v13 = vpop.eup %7069  ;;  %v2538_v52 = vmul.f32 %v7068_v22, %v8283_v14 }
 0xdea   :  { %7091 = vrcp.f32 %v2501_v38  ;;  %v7072_v32 = vpop.eup %7071  ;;  %v2539_v0 = vmul.f32 %v7070_v13, %v8287_v30 }
 0xdeb   :  { %7093 = vrcp.f32 %v2504_v25  ;;  %v7074_v49 = vpop.eup %7073  ;;  %v2542_v33 = vmul.f32 %v7072_v32, %v8291_v48  ;;  %v2554_v48 = vmul.f32 %v2538_v52, %v8330_v62 }
 0xdec   :  { %7095 = vrcp.f32 %v2505_v24  ;;  %v2543_v35 = vmul.f32 %v7074_v49, %v8295_v36 }
 0xded   :  { %7097 = vrcp.f32 %v2500_v17  ;;  %v7076_v54 = vpop.eup %7075  ;;  %v2558_v13 = vmul.f32 %v2542_v33, %v8339_v19 }
 0xdee   :  { %v2541_v7 = vmul.f32 %v7076_v54, %v8289_v40  ;;  %v2559_v54 = vmul.f32 %v2543_v35, %v8343_v44 }
 0xdf0   :  { %v7078_v21 = vpop.eup %7077 }
 0xdf1   :  { %v7080_v42 = vpop.eup %7079  ;;  %v2544_v34 = vmul.f32 %v7078_v21, %v8293_v47  ;;  %v2555_v47 = vmul.f32 %v2539_v0, %v8335_v3 }
 0xdf2   :  { %v7082_v46 = vpop.eup %7081  ;;  %v2545_v38 = vmul.f32 %v7080_v42, %v8297_v43 }
 0xdf3   :  { %v7084_v45 = vpop.eup %7083  ;;  %v2540_v24 = vmul.f32 %v7082_v46, %v8285_v29  ;;  %v2560_v32 = vmul.f32 %v2544_v34, %v8341_v20  ;;  %v2557_v29 = vmul.f32 %v2541_v7, %v8337_v23 }
 0xdf4   :  { %v7086_v10 = vpop.eup %7085  ;;  %v2561_v21 = vmul.f32 %v2545_v38, %v8345_v51 }
 0xdf5   :  { %v7088_v25 = vpop.eup %7087  ;;  %v2547_v43 = vmul.f32 %v7086_v10, %v8304_v53  ;;  %v2556_v3 = vmul.f32 %v2540_v24, %v8333_v18  ;;  %v2546_v24 = vmul.f32 %v7084_v45, %v8299_v50 }
 0xdf6   :  { %v7090_v22 = vpop.eup %7089  ;;  %v2550_v62 = vmul.f32 %v7088_v25, %v8311_v63 }
 0xdf7   :  { %v7092_v30 = vpop.eup %7091  ;;  %v2551_v44 = vmul.f32 %v7090_v22, %v8320_v1  ;;  %v2562_v45 = vmul.f32 %v2546_v24, %v8347_v58  ;;  %v9389_v58 = vmov 0.0  }
 0xdf8   :  { %v7094_v40 = vpop.eup %7093  ;;  %v2549_v63 = vmul.f32 %v7092_v30, %v8309_v59 }
 0xdf9   :  { %v7096_v42 = vpop.eup %7095  ;;  %v2552_v23 = vmul.f32 %v7094_v40, %v8317_v27  ;;  %v2566_v27 = vmul.f32 %v2550_v62, %v8355_v57  ;;  %v2567_v50 = vmul.f32 %v2551_v44, %v8359_v60 }
 0xdfa   :  { %v7098_v0 = vpop.eup %7097  ;;  %v2553_v18 = vmul.f32 %v7096_v42, %v8325_v26 }
 0xdfc   :  { %v2569_v26 = vmul.f32 %v2553_v18, %v8361_v39 }
 0xe83   :  { %v2370_v31 = vpop.f32.mrf.mxu1  ;;  %v2423_v8 = vpop.f32.mrf.mxu0 }
 0xe84   :  { %v2570_v10 = vmul.f32 %v2554_v48, %v2370_v31  ;;  %v2572_v51 = vmul.f32 %v2556_v3, %v2423_v8  ;;  %v2568_v31 = vmul.f32 %v2552_v23, %v8357_v37 }
 0xe85   :  { %v2372_v17 = vpop.f32.mrf.mxu1  ;;  %v2425_v14 = vpop.f32.mrf.mxu0 }
 0xe86   :  { %v2571_v33 = vmul.f32 %v2555_v47, %v2372_v17  ;;  %v2573_v34 = vmul.f32 %v2557_v29, %v2425_v14  ;;  %v2548_v17 = vmul.f32 %v7098_v0, %v8301_v4  ;;  %v2565_v4 = vmul.f32 %v2549_v63, %v8353_v41 }
 0xe87   :  { %v2374_v36 = vpop.f32.mrf.mxu1  ;;  %v2427_v49 = vpop.f32.mrf.mxu0 }
 0xe88   :  { %v2574_v46 = vmul.f32 %v2558_v13, %v2374_v36  ;;  %v2576_v19 = vmul.f32 %v2560_v32, %v2427_v49  ;;  %v2564_v22 = vmul.f32 %v2548_v17, %v8349_v28 }
 0xe89   :  { %v2376_v52 = vpop.f32.mrf.mxu1  ;;  %v2429_v20 = vpop.f32.mrf.mxu0 }
 0xe8a   :  { %v2575_v15 = vmul.f32 %v2559_v54, %v2376_v52  ;;  %v2577_v53 = vmul.f32 %v2561_v21, %v2429_v20  ;;  %v2586_v14 = vpack.c.bf16 %v2574_v46, %v2570_v10  ;;  %v2588_v47 = vpack.c.bf16 %v2576_v19, %v2572_v51 }
 0xe8b   :  { %v2380_v35 = vpop.f32.mrf.mxu1  ;;  %v2433_v7 = vpop.f32.mrf.mxu0 }
 0xe8c   :  { %v2587_v38 = vpack.c.bf16 %v2575_v15, %v2571_v33  ;;  %v2589_v25 = vpack.c.bf16 %v2577_v53, %v2573_v34  ;;  %v2563_v15 = vmul.f32 %v2547_v43, %v8351_v9  ;;  %v2578_v54 = vmul.f32 %v2562_v45, %v2380_v35 }
 0xe8d   :  { %v2382_v13 = vpop.f32.mrf.mxu1  ;;  %v2435_v1 = vpop.f32.mrf.mxu0  ;;  %v2580_v9 = vmul.f32 %v2564_v22, %v2433_v7 }
 0xe8e   :  { %2882 = vmatprep.mubr.bf16.mxu1 %v2587_v38  ;;  %2931 = vmatprep.mubr.bf16.mxu0 %v2589_v25  ;;  %v2579_v32 = vmul.f32 %v2563_v15, %v2382_v13  ;;  %v2581_v36 = vmul.f32 %v2565_v4, %v2435_v1 }
 0xe8f   :  { %v2384_v8 = vpop.f32.mrf.mxu1  ;;  %v2437_v59 = vpop.f32.mrf.mxu0  ;;  %2883 = vmatmul.mubr.bf16.vlgmr.msra.gmra.mxu1 %v2586_v14  ;;  %2932 = vmatmul.mubr.bf16.vlgmr.msra.gmra.mxu0 %v2588_v47 }
 0xe90   :  { %v2582_v30 = vmul.f32 %v2566_v27, %v2384_v8  ;;  %v2584_v57 = vmul.f32 %v2568_v31, %v2437_v59 }
 0xe91   :  { %v2386_v48 = vpop.f32.mrf.mxu1  ;;  %v2439_v37 = vpop.f32.mrf.mxu0 }
 0xe92   :  { %v2583_v49 = vmul.f32 %v2567_v50, %v2386_v48  ;;  %v2585_v40 = vmul.f32 %v2569_v26, %v2439_v37  ;;  %v2590_v29 = vpack.c.bf16 %v2582_v30, %v2578_v54  ;;  %v2592_v41 = vpack.c.bf16 %v2584_v57, %v2580_v9  ;;  %v6873_v48 = vld [vmem:[%s9373_s6 + $0x74] ss:$8 sps:$4 sm:$0xff]   ;;  %v6871_v37 = vld [vmem:[%s9373_s6 + $0x70] ss:$8 sps:$4 sm:$0xff]   ;;  %v6882_v54 = vld [vmem:[%s9373_s6 + $0x44] ss:$8 sps:$4 sm:$0xff]  }
 0xe93   :  { %3066 = vmatprep.subr.bf16.mxu1 %v6873_v48  ;;  %v6880_v9 = vld [vmem:[%s9373_s6 + $0x40] ss:$8 sps:$4 sm:$0xff]  }
 0xe94   :  { %v2591_v43 = vpack.c.bf16 %v2583_v49, %v2579_v32  ;;  %v2593_v60 = vpack.c.bf16 %v2585_v40, %v2581_v36  ;;  %3067 = vmatpush1.bf16.msra.mxu1 %v6871_v37  ;;  %v6876_v32 = vld [vmem:[%s9373_s6 + $0x64] ss:$8 sps:$4 sm:$0xff]   ;;  %v6874_v36 = vld [vmem:[%s9373_s6 + $0x60] ss:$8 sps:$4 sm:$0xff]   ;;  %v6879_v49 = vld [vmem:[%s9373_s6 + $0x54] ss:$8 sps:$4 sm:$0xff]  }
 0xe95   :  { %3068 = vmatprep.subr.bf16.mxu1 %v6876_v32  ;;  %v6877_v40 = vld [vmem:[%s9373_s6 + $0x50] ss:$8 sps:$4 sm:$0xff]  }
 0xe96   :  { %2890 = vmatprep.mubr.bf16.mxu1 %v2591_v43  ;;  %2939 = vmatprep.mubr.bf16.mxu0 %v2593_v60  ;;  %v7279_v32 = vld [vmem:[%s9370_s3 + $0x10] sm:$0xff] }
 0xe97   :  { %2891 = vmatmul.mubr.bf16.gmra.mxu1 %v2590_v29  ;;  %2940 = vmatmul.mubr.bf16.gmra.mxu0 %v2592_v41 }
 0xe98   :  { %3090 = vmatprep.mubr.bf16.mxu1 %v7305_v2  ;;  %6662 = vmatprep.mubr.msk.bf16.mxu0 %vm7308_vm7, %v9389_v58 }
 0xe99   :  { %3069 = vmatpush1.bf16.msra.mxu1 %v6874_v36 }
 0xe9a   :  { %3070 = vmatprep.subr.bf16.mxu1 %v6879_v49 }
 0xe9d   :  { %3071 = vmatpush1.bf16.msra.mxu1 %v6877_v40 }
 0xe9e   :  { %3072 = vmatprep.subr.bf16.mxu1 %v6882_v54  ;;  %v7280_v54 = vld [vmem:[%s9369_s2 + $0x10] sm:$0xff] }
 0xea1   :  { %3073 = vmatpush1.bf16.msra.mxu1 %v6880_v9 }
 0xea2   :  { %6672 = vmatprep.subr.bf16.mxu1 %v9389_v58 }
 0xf4f   :  { %v6374_v28 = vpop.f32.mrf.mxu1  ;;  %v6402_v39 = vpop.f32.mrf.mxu0 }
 0xf51   :  { %v6375_v21 = vpop.f32.mrf.mxu1  ;;  %v6403_v42 = vpop.f32.mrf.mxu0 }
 0xf52   :  { %v6376_v62 = vadd.f32 %v6375_v21, %v6374_v28  ;;  %v6404_v3 = vadd.f32 %v6403_v42, %v6402_v39 }
 0xf53   :  { %v6377_v46 = vpop.f32.mrf.mxu1  ;;  %v6405_v19 = vpop.f32.mrf.mxu0 }
 0xf54   :  { %v2934_v0 = vadd.f32 %v6404_v3, %v6376_v62 }
 0xf55   :  { %v6378_v52 = vpop.f32.mrf.mxu1  ;;  %v6406_v20 = vpop.f32.mrf.mxu0 }
 0xf56   :  { %v6379_v33 = vadd.f32 %v6378_v52, %v6377_v46  ;;  %v6407_v34 = vadd.f32 %v6406_v20, %v6405_v19  ;;  %v2948_v35 = vadd.f32 %v2934_v0, %v7869_v55  ;;  %v6021_v46 = vld [vmem:[%s9371_s4 + $0x1] sm:$0x1] }
 0xf57   :  { %v6380_v53 = vpop.f32.mrf.mxu1  ;;  %v6408_v44 = vpop.f32.mrf.mxu0  ;;  %v2992_v20 = vunpack.c.l.bf16 %v6021_v46 }
 0xf58   :  { %v2937_v23 = vadd.f32 %v6407_v34, %v6379_v33 }
 0xf59   :  { %v6381_v10 = vpop.f32.mrf.mxu1  ;;  %v6409_v51 = vpop.f32.mrf.mxu0  ;;  %v2996_v0 = vrot.slane %v2992_v20, %v7490_v61 }
 0xf5a   :  { %v2949_v7 = vadd.f32 %v2937_v23, %v7871_v56  ;;  %v6382_v63 = vadd.f32 %v6381_v10, %v6380_v53  ;;  %v6410_v18 = vadd.f32 %v6409_v51, %v6408_v44 }
 0xf5b   :  { %v6383_v38 = vpop.f32.mrf.mxu1  ;;  %v6411_v25 = vpop.f32.mrf.mxu0 }
 0xf5c   :  { %v2952_v24 = vpack.c.bf16 %v2949_v7, %v2948_v35  ;;  %v2942_v47 = vadd.f32 %v6410_v18, %v6382_v63 }
 0xf5d   :  { %v6384_v17 = vpop.f32.mrf.mxu1  ;;  %v6412_v14 = vpop.f32.mrf.mxu0 }
 0xf5e   :  { %v6385_v13 = vadd.f32 %v6384_v17, %v6383_v38  ;;  %v6413_v1 = vadd.f32 %v6412_v14, %v6411_v25  ;;  %v8400_v27 = vunpack.c.h.bf16 %v2952_v24  ;;  %v8402_v31 = vunpack.c.l.bf16 %v2952_v24 }
 0xf5f   :  { %v2950_v59 = vadd.f32 %v2942_v47, %v7865_v5 }
 0xf60   :  { %v2945_v8 = vadd.f32 %v6413_v1, %v6385_v13  ;;  %v2959_v55 = vmul.f32 %v8400_v27, %v8400_v27  ;;  %v2958_v56 = vmul.f32 %v8402_v31, %v8402_v31  ;;  %v7275_v13 = vld [vmem:[%s9370_s3] sm:$0xff] }
 0xf62   :  { %v2951_v15 = vadd.f32 %v2945_v8, %v7867_v12  ;;  %v2965_v50 = vsel %vm217_vm6, %v2959_v55, 0.0  ;;  %v2962_v4 = vsel %vm217_vm6, %v2958_v56, 0.0  ;;  %v7276_v56 = vld [vmem:[%s9369_s2] sm:$0xff] }
 0xf63   :  { %2966 = vadd.xlane.f32.xlu1 %v2965_v50  ;;  %2963 = vadd.xlane.f32.xlu0 %v2962_v4  ;;  %v7278_v4 = vld [vmem:[%s9370_s3 + $0x8] sm:$0xff] }
 0xf64   :  { %v2953_v26 = vpack.c.bf16 %v2951_v15, %v2950_v59  ;;  %v7277_v15 = vld [vmem:[%s9369_s2 + $0x8] sm:$0xff] }
 0xf66   :  { %v8412_v45 = vunpack.c.h.bf16 %v2953_v26  ;;  %v8414_v22 = vunpack.c.l.bf16 %v2953_v26 }
 0xf68   :  { %v2961_v30 = vmul.f32 %v8412_v45, %v8412_v45  ;;  %v2960_v57 = vmul.f32 %v8414_v22, %v8414_v22 }
 0xf6a   :  { %v2971_v5 = vsel %vm217_vm6, %v2961_v30, 0.0  ;;  %v2968_v12 = vsel %vm217_vm6, %v2960_v57, 0.0 }
 0xf6b   :  { %2972 = vadd.xlane.f32.xlu1 %v2971_v5  ;;  %2969 = vadd.xlane.f32.xlu0 %v2968_v12 }
 0xfec   :  { %v2967_v43 = vpop.xlane.xlu1 %2966  ;;  %v2964_v29 = vpop.xlane.xlu0 %2963 }
 0xfed   :  { %v2975_v60 = vmul.f32 0.015625, %v2967_v43  ;;  %v2974_v41 = vmul.f32 0.015625, %v2964_v29  ;;  %v7281_v43 = vld [vmem:[%s9369_s2 + $0x18] sm:$0xff] }
 0xfee   :  { %v7282_v29 = vld [vmem:[%s9370_s3 + $0x18] sm:$0xff] }
 0xfef   :  { %v2979_v28 = vadd.f32 1e-05, %v2975_v60  ;;  %v2978_v39 = vadd.f32 1e-05, %v2974_v41 }
 0xff1   :  { %7099 = vrsqrt.f32 %v2979_v28 }
 0xff2   :  { %7101 = vrsqrt.f32 %v2978_v39 }
 0xff4   :  { %v2973_v21 = vpop.xlane.xlu1 %2972  ;;  %v2970_v42 = vpop.xlane.xlu0 %2969 }
 0xff5   :  { %v2977_v62 = vmul.f32 0.015625, %v2973_v21  ;;  %v2976_v3 = vmul.f32 0.015625, %v2970_v42 }
 0xff7   :  { %v2981_v19 = vadd.f32 1e-05, %v2977_v62  ;;  %v2980_v52 = vadd.f32 1e-05, %v2976_v3 }
 0xff9   :  { %7103 = vrsqrt.f32 %v2981_v19 }
 0xffa   :  { %7105 = vrsqrt.f32 %v2980_v52 }
 0xffe   :  { %v7100_v33 = vpop.eup %7099 }
 0xfff   :  { %v7102_v34 = vpop.eup %7101  ;;  %v2987_v53 = vmul.f32 %v7100_v33, %v8400_v27 }
0x1000   :  { %v2986_v44 = vmul.f32 %v7102_v34, %v8402_v31 }
0x1001   :  { %v2998_v23 = vmul.f32 %v2996_v0, %v2987_v53 }
0x1002   :  { %v2997_v10 = vmul.f32 %v2996_v0, %v2986_v44 }
0x1004   :  { %v3001_v51 = vpack.c.bf16 %v2998_v23, %v2997_v10 }
0x1006   :  { %v7104_v35 = vpop.eup %7103  ;;  %6038 = vmatmul.mubr.msk.bf16.vlgmr.msra.gmra.mxu1 %vm217_vm6, %v3001_v51 }
0x1007   :  { %v7106_v7 = vpop.eup %7105  ;;  %3100 = vmatprep.mubr.bf16.mxu1 %v7305_v2  ;;  %v2989_v63 = vmul.f32 %v7104_v35, %v8412_v45 }
0x1008   :  { %v2988_v18 = vmul.f32 %v7106_v7, %v8414_v22 }
0x1009   :  { %v3000_v38 = vmul.f32 %v2996_v0, %v2989_v63 }
0x100a   :  { %v2999_v25 = vmul.f32 %v2996_v0, %v2988_v18 }
0x100c   :  { %v3002_v24 = vpack.c.bf16 %v3000_v38, %v2999_v25 }
0x100e   :  { %6039 = vmatmul.mubr.msk.bf16.gmra.mxu1 %vm217_vm6, %v3002_v24 }
0x100f   :  { %6674 = vmatprep.mubr.msk.bf16.mxu1 %vm7308_vm7, %v9389_v58 }
0x10c6   :  { %v3092_v17 = vpop.f32.mrf.mxu1 }
0x10c7   :  { %v3113_v59 = vmul.f32 %v7276_v56, %v3092_v17 }
0x10c8   :  { %v3094_v14 = vpop.f32.mrf.mxu1 }
0x10c9   :  { %v3117_v1 = vmul.f32 %v7275_v13, %v3094_v14 }
0x10ca   :  { %v3096_v47 = vpop.f32.mrf.mxu1 }
0x10cb   :  { %v8463_v8 = vpack.c.bf16 %v3096_v47, %v3092_v17  ;;  %v3114_v50 = vmul.f32 %v7277_v15, %v3096_v47  ;;  %v3121_v57 = vadd.f32 %v3117_v1, %v3113_v59 }
0x10cc   :  { %v3098_v55 = vpop.f32.mrf.mxu1 }
0x10cd   :  { %v3118_v26 = vmul.f32 %v7278_v4, %v3098_v55 }
0x10ce   :  { %v3102_v30 = vpop.f32.mrf.mxu1 }
0x10cf   :  { %v3122_v5 = vadd.f32 %v3118_v26, %v3114_v50  ;;  %v3115_v9 = vmul.f32 %v7280_v54, %v3102_v30 }
0x10d0   :  { %v3104_v12 = vpop.f32.mrf.mxu1 }
0x10d1   :  { %v3125_v48 = vpack.c.bf16 %v3122_v5, %v3121_v57  ;;  %v3119_v36 = vmul.f32 %v7279_v32, %v3104_v12 }
0x10d2   :  { %v3106_v37 = vpop.f32.mrf.mxu1 }
0x10d3   :  { %v8477_v49 = vpack.c.bf16 %v3106_v37, %v3102_v30  ;;  %3254 = vrot.lane.b32.xlu1 %v3125_v48, %s7309_s18  ;;  %3128 = vrot.lane.b32.xlu0 %v3125_v48, %s7310_s19  ;;  %v3116_v60 = vmul.f32 %v7281_v43, %v3106_v37  ;;  %v3123_v28 = vadd.f32 %v3119_v36, %v3115_v9 }
0x10d4   :  { %v3108_v40 = vpop.f32.mrf.mxu1 }
0x10d5   :  { %v3120_v41 = vmul.f32 %v7282_v29, %v3108_v40 }
0x10d7   :  { %v3124_v39 = vadd.f32 %v3120_v41, %v3116_v60  ;;  %3383 = vrot.lane.b32.xlu1 %v3125_v48, %s7312_s20  ;;  %3381 = vrot.lane.b32.xlu0 %v3125_v48, %s7313_s21 }
0x10d9   :  { %v3126_v21 = vpack.c.bf16 %v3124_v39, %v3123_v28 }
0x10db   :  { %3516 = vrot.lane.b32.xlu1 %v3125_v48, %s7311_s1  ;;  %3644 = vrot.lane.b32.xlu0 %v3126_v21, %s7310_s19 }
0x10df   :  { %3770 = vrot.lane.b32.xlu1 %v3126_v21, %s7309_s18  ;;  %3899 = vrot.lane.b32.xlu0 %v3126_v21, %s7312_s20 }
0x10e3   :  { %3897 = vrot.lane.b32.xlu1 %v3126_v21, %s7313_s21  ;;  %4032 = vrot.lane.b32.xlu0 %v3126_v21, %s7311_s1 }
0x1145   :  { %v3255_v42 = vpop.permute.xlu1 %3254  ;;  %v3129_v62 = vpop.permute.xlu0 %3128 }
0x1146   :  { %v3134_v3 = vsel %vm385_vm8, %v3129_v62, 0 }
0x1147   :  { %6661 = vmatpush3.bf16.xpose.msra.mxu0 %v3134_v3  ;;  %6673 = vmatpush3.bf16.xpose.msra.mxu1 %v3134_v3 }
0x1148   :  { %6684 = vmatprep.subr.bf16.mxu1 %v9389_v58  ;;  %6666 = vmatprep.subr.bf16.mxu0 %v9389_v58 }
0x1149   :  { %v3384_v46 = vpop.permute.xlu1 %3383  ;;  %v3382_v52 = vpop.permute.xlu0 %3381 }
0x114a   :  { %v3389_v19 = vsel %vm385_vm8, %v3384_v46, 0 }
0x114d   :  { %v3645_v20 = vpop.permute.xlu0 %3644  ;;  %v3517_v0 = vpop.permute.xlu1 %3516 }
0x114e   :  { %6663 = vmatmul.mubr.msk.bf16.vlgmr.msra.gmra.mxu0 %vm385_vm8, %v3125_v48  ;;  %6675 = vmatmul.mubr.msk.bf16.vlgmr.msra.gmra.mxu1 %vm385_vm8, %v3255_v42  ;;  %v3650_v33 = vsel %vm385_vm8, %v3645_v20, 0 }
0x114f   :  { %6685 = vmatpush3.bf16.xpose.msra.mxu1 %v3389_v19  ;;  %6686 = vmatprep.mubr.msk.bf16.mxu1 %vm7308_vm7, %v9389_v58 }
0x1150   :  { %6696 = vmatprep.subr.bf16.mxu1 %v9389_v58  ;;  %6668 = vmatprep.mubr.msk.bf16.mxu0 %vm7308_vm7, %v9389_v58 }
0x1151   :  { %v3900_v34 = vpop.permute.xlu0 %3899  ;;  %v3771_v53 = vpop.permute.xlu1 %3770 }
0x1152   :  { %v3905_v44 = vsel %vm385_vm8, %v3900_v34, 0 }
0x1155   :  { %v3898_v23 = vpop.permute.xlu1 %3897  ;;  %v4033_v10 = vpop.permute.xlu0 %4032 }
0x1156   :  { %6687 = vmatmul.mubr.msk.bf16.vlgmr.msra.gmra.mxu1 %vm385_vm8, %v3382_v52 }
0x1157   :  { %6697 = vmatpush3.bf16.xpose.msra.mxu1 %v3389_v19  ;;  %6698 = vmatprep.mubr.msk.bf16.mxu1 %vm7308_vm7, %v9389_v58 }
0x1158   :  { %6708 = vmatprep.subr.bf16.mxu1 %v9389_v58 }
0x115e   :  { %6699 = vmatmul.mubr.msk.bf16.vlgmr.msra.gmra.mxu1 %vm385_vm8, %v3517_v0 }
0x115f   :  { %6709 = vmatpush3.bf16.xpose.msra.mxu1 %v3650_v33  ;;  %6710 = vmatprep.mubr.msk.bf16.mxu1 %vm7308_vm7, %v9389_v58 }
0x1160   :  { %6720 = vmatprep.subr.bf16.mxu1 %v9389_v58 }
0x1166   :  { %6711 = vmatmul.mubr.msk.bf16.vlgmr.msra.gmra.mxu1 %vm385_vm8, %v3126_v21 }
0x1167   :  { %6721 = vmatpush3.bf16.xpose.msra.mxu1 %v3650_v33  ;;  %6722 = vmatprep.mubr.msk.bf16.mxu1 %vm7308_vm7, %v9389_v58 }
0x1168   :  { %6732 = vmatprep.subr.bf16.mxu1 %v9389_v58 }
0x116e   :  { %6723 = vmatmul.mubr.msk.bf16.vlgmr.msra.gmra.mxu1 %vm385_vm8, %v3771_v53 }
0x116f   :  { %6733 = vmatpush3.bf16.xpose.msra.mxu1 %v3905_v44  ;;  %6734 = vmatprep.mubr.msk.bf16.mxu1 %vm7308_vm7, %v9389_v58 }
0x1170   :  { %6744 = vmatprep.subr.bf16.mxu1 %v9389_v58 }
0x1176   :  { %6735 = vmatmul.mubr.msk.bf16.vlgmr.msra.gmra.mxu1 %vm385_vm8, %v3898_v23 }
0x1177   :  { %6745 = vmatpush3.bf16.xpose.msra.mxu1 %v3905_v44  ;;  %6746 = vmatprep.mubr.msk.bf16.mxu1 %vm7308_vm7, %v9389_v58 }
0x117e   :  { %6747 = vmatmul.mubr.msk.bf16.vlgmr.msra.gmra.mxu1 %vm385_vm8, %v4033_v10 }
0x120e   :  { %v3170_v51 = vpop.f32.mrf.mxu0  ;;  %v3293_v35 = vpop.f32.mrf.mxu1 }
0x120f   :  { %v3177_v7 = vmul.f32 0.25, %v3170_v51  ;;  %v3300_v14 = vmul.f32 0.25, %v3293_v35 }
0x1210   :  { %v6664_v63 = vpop.f32.mrf.mxu0  ;;  %v6676_v18 = vpop.f32.mrf.mxu1 }
0x1211   :  { %v8533_v38 = vsel %vm7580_vm9, %v3177_v7, -1e+30  ;;  %v8551_v26 = vsel %vm7580_vm9, %v3300_v14, -1e+30 }
0x1212   :  { %v3173_v25 = vpop.f32.mrf.mxu0  ;;  %v3296_v24 = vpop.f32.mrf.mxu1  ;;  %v3181_v17 = vsel %vm385_vm8, %v8533_v38, -inf  ;;  %v3304_v12 = vsel %vm385_vm8, %v8551_v26, -inf }
0x1213   :  { %v3178_v47 = vmul.f32 0.25, %v3173_v25  ;;  %v3301_v13 = vmul.f32 0.25, %v3296_v24  ;;  %3182 = vmax.xlane.f32.xlu1 %v3181_v17 }
0x1214   :  { %v6665_v1 = vpop.f32.mrf.mxu0  ;;  %v6677_v55 = vpop.f32.mrf.mxu1 }
0x1215   :  { %v8539_v56 = vsel %vm7589_vm10, %v3178_v47, -1e+30  ;;  %v8543_v59 = vsel %vm7589_vm10, %v3301_v13, -1e+30 }
0x1216   :  { %v3425_v15 = vpop.f32.mrf.mxu1  ;;  %v3307_v50 = vsel %vm385_vm8, %v8543_v59, -inf  ;;  %v3184_v4 = vsel %vm385_vm8, %v8539_v56, -inf }
0x1217   :  { %v3432_v30 = vmul.f32 0.25, %v3425_v15  ;;  %3308 = vmax.xlane.f32.xlu1 %v3307_v50  ;;  %3185 = vmax.xlane.f32.xlu0 %v3184_v4 }
0x1218   :  { %v6688_v57 = vpop.f32.mrf.mxu1 }
0x1219   :  { %v8557_v48 = vsel %vm7580_vm9, %v3432_v30, -1e+30 }
0x121a   :  { %v3428_v5 = vpop.f32.mrf.mxu1  ;;  %v3436_v54 = vsel %vm385_vm8, %v8557_v48, -inf }
0x121b   :  { %v3433_v37 = vmul.f32 0.25, %v3428_v5  ;;  %3305 = vmax.xlane.f32.xlu0 %v3304_v12 }
0x121c   :  { %v6689_v32 = vpop.f32.mrf.mxu1 }
0x121d   :  { %v8561_v36 = vsel %vm7589_vm10, %v3433_v37, -1e+30 }
0x121e   :  { %v3555_v40 = vpop.f32.mrf.mxu1  ;;  %v3439_v9 = vsel %vm385_vm8, %v8561_v36, -inf }
0x121f   :  { %v3562_v43 = vmul.f32 0.25, %v3555_v40  ;;  %3437 = vmax.xlane.f32.xlu0 %v3436_v54  ;;  %3440 = vmax.xlane.f32.xlu1 %v3439_v9 }
0x1220   :  { %v6700_v60 = vpop.f32.mrf.mxu1 }
0x1221   :  { %v8569_v29 = vsel %vm7580_vm9, %v3562_v43, -1e+30 }
0x1222   :  { %v3558_v41 = vpop.f32.mrf.mxu1  ;;  %v3566_v28 = vsel %vm385_vm8, %v8569_v29, -inf }
0x1223   :  { %v3563_v39 = vmul.f32 0.25, %v3558_v41  ;;  %3567 = vmax.xlane.f32.xlu0 %v3566_v28 }
0x1224   :  { %v6701_v21 = vpop.f32.mrf.mxu1 }
0x1225   :  { %v8575_v42 = vsel %vm7589_vm10, %v3563_v39, -1e+30 }
0x1226   :  { %v3686_v62 = vpop.f32.mrf.mxu1  ;;  %v3569_v3 = vsel %vm385_vm8, %v8575_v42, -inf }
0x1227   :  { %v3693_v46 = vmul.f32 0.25, %v3686_v62  ;;  %3570 = vmax.xlane.f32.xlu1 %v3569_v3 }
0x1228   :  { %v6712_v19 = vpop.f32.mrf.mxu1 }
0x1229   :  { %v8581_v52 = vsel %vm7580_vm9, %v3693_v46, -1e+30 }
0x122a   :  { %v3689_v20 = vpop.f32.mrf.mxu1  ;;  %v3697_v0 = vsel %vm385_vm8, %v8581_v52, -inf }
0x122b   :  { %v3694_v33 = vmul.f32 0.25, %v3689_v20  ;;  %3698 = vmax.xlane.f32.xlu0 %v3697_v0 }
0x122c   :  { %v6713_v34 = vpop.f32.mrf.mxu1 }
0x122d   :  { %v8587_v53 = vsel %vm7589_vm10, %v3694_v33, -1e+30 }
0x122e   :  { %v3809_v44 = vpop.f32.mrf.mxu1  ;;  %v3700_v23 = vsel %vm385_vm8, %v8587_v53, -inf }
0x122f   :  { %v3816_v10 = vmul.f32 0.25, %v3809_v44  ;;  %3701 = vmax.xlane.f32.xlu1 %v3700_v23 }
0x1230   :  { %v6724_v51 = vpop.f32.mrf.mxu1 }
0x1231   :  { %v8593_v35 = vsel %vm7580_vm9, %v3816_v10, -1e+30 }
0x1232   :  { %v3812_v7 = vpop.f32.mrf.mxu1  ;;  %v3820_v63 = vsel %vm385_vm8, %v8593_v35, -inf }
0x1233   :  { %v3817_v18 = vmul.f32 0.25, %v3812_v7  ;;  %3821 = vmax.xlane.f32.xlu0 %v3820_v63 }
0x1234   :  { %v6725_v25 = vpop.f32.mrf.mxu1 }
0x1235   :  { %v8599_v24 = vsel %vm7589_vm10, %v3817_v18, -1e+30 }
0x1236   :  { %v3941_v17 = vpop.f32.mrf.mxu1  ;;  %v3823_v14 = vsel %vm385_vm8, %v8599_v24, -inf }
0x1237   :  { %v3948_v47 = vmul.f32 0.25, %v3941_v17  ;;  %3824 = vmax.xlane.f32.xlu1 %v3823_v14 }
0x1238   :  { %v6736_v13 = vpop.f32.mrf.mxu1 }
0x1239   :  { %v8605_v1 = vsel %vm7580_vm9, %v3948_v47, -1e+30 }
0x123a   :  { %v3944_v55 = vpop.f32.mrf.mxu1  ;;  %v3952_v15 = vsel %vm385_vm8, %v8605_v1, -inf }
0x123b   :  { %v3949_v50 = vmul.f32 0.25, %v3944_v55  ;;  %3953 = vmax.xlane.f32.xlu0 %v3952_v15 }
0x123c   :  { %v6737_v4 = vpop.f32.mrf.mxu1 }
0x123d   :  { %v8611_v30 = vsel %vm7589_vm10, %v3949_v50, -1e+30 }
0x123e   :  { %v4071_v57 = vpop.f32.mrf.mxu1  ;;  %v3955_v5 = vsel %vm385_vm8, %v8611_v30, -inf }
0x123f   :  { %v4078_v12 = vmul.f32 0.25, %v4071_v57  ;;  %3956 = vmax.xlane.f32.xlu1 %v3955_v5 }
0x1240   :  { %v6748_v37 = vpop.f32.mrf.mxu1 }
0x1241   :  { %v8617_v32 = vsel %vm7580_vm9, %v4078_v12, -1e+30 }
0x1242   :  { %v4074_v40 = vpop.f32.mrf.mxu1  ;;  %v4082_v54 = vsel %vm385_vm8, %v8617_v32, -inf }
0x1243   :  { %v4079_v9 = vmul.f32 0.25, %v4074_v40  ;;  %4083 = vmax.xlane.f32.xlu0 %v4082_v54 }
0x1244   :  { %v6749_v43 = vpop.f32.mrf.mxu1 }
0x1245   :  { %v8623_v60 = vsel %vm7589_vm10, %v4079_v9, -1e+30 }
0x1246   :  { %v4085_v41 = vsel %vm385_vm8, %v8623_v60, -inf }
0x1247   :  { %4086 = vmax.xlane.f32.xlu1 %v4085_v41 }
0x129c   :  { %v3183_v28 = vpop.xlane.xlu1 %3182 }
0x129d   :  { %v3187_v6 = vsub.f32 %v8533_v38, %v3183_v28 }
0x129f   :  { %v3189_v39 = vmul.f32 1.442695, %v3187_v6 }
0x12a0   :  { %v3309_v21 = vpop.xlane.xlu1 %3308  ;;  %v3186_v62 = vpop.xlane.xlu0 %3185 }
0x12a1   :  { %7107 = vpow2.f32 %v3189_v39  ;;  %v3311_v3 = vsub.f32 %v8543_v59, %v3309_v21  ;;  %v3188_v46 = vsub.f32 %v8539_v56, %v3186_v62 }
0x12a3   :  { %v3191_v19 = vmul.f32 1.442695, %v3188_v46  ;;  %v3314_v20 = vmul.f32 1.442695, %v3311_v3 }
0x12a4   :  { %v3306_v59 = vpop.xlane.xlu0 %3305 }
0x12a5   :  { %7109 = vpow2.f32 %v3191_v19  ;;  %v3310_v51 = vsub.f32 %v8551_v26, %v3306_v59 }
0x12a6   :  { %7111 = vpow2.f32 %v3314_v20 }
0x12a7   :  { %v3312_v18 = vmul.f32 1.442695, %v3310_v51 }
0x12a8   :  { %v3438_v44 = vpop.xlane.xlu0 %3437  ;;  %v3441_v23 = vpop.xlane.xlu1 %3440 }
0x12a9   :  { %v3442_v25 = vsub.f32 %v8557_v48, %v3438_v44  ;;  %7113 = vpow2.f32 %v3312_v18  ;;  %v3443_v55 = vsub.f32 %v8561_v36, %v3441_v23 }
0x12ab   :  { %v3444_v47 = vmul.f32 1.442695, %v3442_v25  ;;  %v3446_v26 = vmul.f32 1.442695, %v3443_v55 }
0x12ac   :  { %v3568_v10 = vpop.xlane.xlu0 %3567 }
0x12ad   :  { %v3572_v13 = vsub.f32 %v8569_v29, %v3568_v10  ;;  %7115 = vpow2.f32 %v3444_v47 }
0x12ae   :  { %v8630_v11 = vpop.eup %7107 }
0x12af   :  { %v3193_v0 = vsel %vm385_vm8, %v8630_v11, 0.0  ;;  %v3574_v4 = vmul.f32 1.442695, %v3572_v13 }
0x12b0   :  { %3194 = vadd.xlane.f32.xlu0 %v3193_v0  ;;  %v3571_v7 = vpop.xlane.xlu1 %3570 }
0x12b1   :  { %v3573_v57 = vsub.f32 %v8575_v42, %v3571_v7  ;;  %7117 = vpow2.f32 %v3574_v4 }
0x12b2   :  { %v8634_v33 = vpop.eup %7109  ;;  %7119 = vpow2.f32 %v3446_v26 }
0x12b3   :  { %v3196_v38 = vsel %vm385_vm8, %v8634_v33, 0.0  ;;  %v8638_v34 = vpop.eup %7111  ;;  %v3576_v40 = vmul.f32 1.442695, %v3573_v57 }
0x12b4   :  { %3197 = vadd.xlane.f32.xlu1 %v3196_v38  ;;  %v3319_v56 = vsel %vm385_vm8, %v8638_v34, 0.0  ;;  %v3699_v63 = vpop.xlane.xlu0 %3698 }
0x12b5   :  { %v3703_v29 = vsub.f32 %v8581_v52, %v3699_v63 }
0x12b6   :  { %v8655_v43 = vpop.eup %7113 }
0x12b8   :  { %3320 = vadd.xlane.f32.xlu1 %v3319_v56  ;;  %v3702_v17 = vpop.xlane.xlu1 %3701 }
0x12b9   :  { %v3704_v42 = vsub.f32 %v8587_v53, %v3702_v17 }
0x12ba   :  { %v8660_v28 = vpop.eup %7115 }
0x12bb   :  { %v3707_v52 = vmul.f32 1.442695, %v3704_v42 }
0x12bc   :  { %v3822_v14 = vpop.xlane.xlu0 %3821 }
0x12bd   :  { %v3826_v6 = vsub.f32 %v8593_v35, %v3822_v14 }
0x12be   :  { %v8665_v39 = vpop.eup %7117 }
0x12bf   :  { %v3828_v53 = vmul.f32 1.442695, %v3826_v6  ;;  %v8668_v62 = vpop.eup %7119  ;;  %v3578_v3 = vsel %vm385_vm8, %v8665_v39, 0.0 }
0x12c0   :  { %v3825_v15 = vpop.xlane.xlu1 %3824  ;;  %v3451_v20 = vsel %vm385_vm8, %v8668_v62, 0.0 }
0x12c1   :  { %v3827_v21 = vsub.f32 %v8599_v24, %v3825_v15 }
0x12c3   :  { %v3830_v35 = vmul.f32 1.442695, %v3827_v21 }
0x12c4   :  { %v3954_v50 = vpop.xlane.xlu0 %3953 }
0x12c6   :  { %3205 = vrot.lane.b32.xlu0 %v8463_v8, %s7314_s22 }
0x12c8   :  { %v3957_v5 = vpop.xlane.xlu1 %3956 }
0x12c9   :  { %3459 = vrot.lane.b32.xlu1 %v8463_v8, %s7315_s23  ;;  %v3958_v8 = vsub.f32 %v8605_v1, %v3954_v50  ;;  %v3705_v1 = vmul.f32 1.442695, %v3703_v29  ;;  %v3959_v19 = vsub.f32 %v8611_v30, %v3957_v5 }
0x12cb   :  { %v3960_v48 = vmul.f32 1.442695, %v3958_v8  ;;  %v3962_v56 = vmul.f32 1.442695, %v3959_v19 }
0x12cc   :  { %v4084_v12 = vpop.xlane.xlu0 %4083 }
0x12cd   :  { %v4088_v37 = vsub.f32 %v8617_v32, %v4084_v12  ;;  %7121 = vpow2.f32 %v3960_v48  ;;  %v3316_v32 = vsel %vm385_vm8, %v8655_v43, 0.0 }
0x12ce   :  { %7123 = vpow2.f32 %v3576_v40 }
0x12cf   :  { %v4090_v54 = vmul.f32 1.442695, %v4088_v37 }
0x12d0   :  { %v4087_v36 = vpop.xlane.xlu1 %4086 }
0x12d1   :  { %v4089_v9 = vsub.f32 %v8623_v60, %v4087_v36  ;;  %7125 = vpow2.f32 %v4090_v54  ;;  %v3448_v60 = vsel %vm385_vm8, %v8660_v28, 0.0 }
0x12d2   :  { %7127 = vpow2.f32 %v3705_v1 }
0x12d3   :  { %v4092_v41 = vmul.f32 1.442695, %v4089_v9 }
0x12d5   :  { %7129 = vpow2.f32 %v4092_v41 }
0x12d6   :  { %7131 = vpow2.f32 %v3707_v52 }
0x12d7   :  { %7133 = vpow2.f32 %v3828_v53 }
0x12d8   :  { %7135 = vpow2.f32 %v3830_v35 }
0x12d9   :  { %7137 = vpow2.f32 %v3962_v56 }
0x12da   :  { %v8672_v46 = vpop.eup %7121 }
0x12db   :  { %v8677_v0 = vpop.eup %7123  ;;  %v3964_v24 = vsel %vm385_vm8, %v8672_v46, 0.0 }
0x12dc   :  { %v3581_v59 = vsel %vm385_vm8, %v8677_v0, 0.0 }
0x12de   :  { %v8681_v38 = vpop.eup %7125 }
0x12df   :  { %v8685_v44 = vpop.eup %7127  ;;  %v4094_v30 = vsel %vm385_vm8, %v8681_v38, 0.0 }
0x12e0   :  { %v3709_v10 = vsel %vm385_vm8, %v8685_v44, 0.0 }
0x12e2   :  { %v8689_v23 = vpop.eup %7129 }
0x12e3   :  { %v8693_v51 = vpop.eup %7131  ;;  %v4097_v7 = vsel %vm385_vm8, %v8689_v23, 0.0 }
0x12e4   :  { %v3712_v63 = vsel %vm385_vm8, %v8693_v51, 0.0  ;;  %v8699_v18 = vpop.eup %7133 }
0x12e5   :  { %3317 = vadd.xlane.f32.xlu0 %v3316_v32  ;;  %v3832_v25 = vsel %vm385_vm8, %v8699_v18, 0.0  ;;  %v8703_v17 = vpop.eup %7135 }
0x12e6   :  { %v3835_v14 = vsel %vm385_vm8, %v8703_v17, 0.0  ;;  %v8707_v47 = vpop.eup %7137 }
0x12e7   :  { %v3967_v13 = vsel %vm385_vm8, %v8707_v47, 0.0 }
0x12e9   :  { %3449 = vadd.xlane.f32.xlu0 %v3448_v60 }
0x12ed   :  { %3579 = vadd.xlane.f32.xlu0 %v3578_v3  ;;  %3452 = vadd.xlane.f32.xlu1 %v3451_v20 }
0x12f1   :  { %3965 = vadd.xlane.f32.xlu0 %v3964_v24  ;;  %3582 = vadd.xlane.f32.xlu1 %v3581_v59 }
0x12f5   :  { %4095 = vadd.xlane.f32.xlu0 %v4094_v30  ;;  %3710 = vadd.xlane.f32.xlu1 %v3709_v10 }
0x12f9   :  { %4098 = vadd.xlane.f32.xlu0 %v4097_v7  ;;  %3713 = vadd.xlane.f32.xlu1 %v3712_v63 }
0x12fd   :  { %3833 = vadd.xlane.f32.xlu1 %v3832_v25 }
0x1301   :  { %3836 = vadd.xlane.f32.xlu1 %v3835_v14 }
0x1305   :  { %3968 = vadd.xlane.f32.xlu1 %v3967_v13 }
0x130f   :  { %3721 = vrot.lane.b32.xlu0 %v8477_v49, %s7314_s22 }
0x1316   :  { %3975 = vrot.lane.b32.xlu1 %v8477_v49, %s7315_s23 }
0x1339   :  { %v3195_v55 = vpop.xlane.xlu0 %3194 }
0x133a   :  { %7139 = vrcp.f32 %v3195_v55 }
0x133d   :  { %v3206_v15 = vpop.permute.xlu0 %3205  ;;  %v3198_v50 = vpop.xlane.xlu1 %3197 }
0x133e   :  { %6667 = vmatpush3.bf16.msra.mxu0 %v3206_v15  ;;  %7141 = vrcp.f32 %v3198_v50 }
0x133f   :  { %6678 = vmatprep.subr.bf16.mxu0 %v9389_v58 }
0x1341   :  { %v3321_v49 = vpop.xlane.xlu1 %3320 }
0x1342   :  { %7143 = vrcp.f32 %v3321_v49 }
0x1345   :  { %v3460_v48 = vpop.permute.xlu1 %3459 }
0x1347   :  { %v7140_v4 = vpop.eup %7139 }
0x1348   :  { %v3200_v26 = vmul.f32 %v7140_v4, %v8630_v11 }
0x134b   :  { %v7142_v8 = vpop.eup %7141 }
0x134c   :  { %v3202_v57 = vmul.f32 %v7142_v8, %v8634_v33 }
0x134e   :  { %v3203_v5 = vpack.c.bf16 %v3202_v57, %v3200_v26 }
0x134f   :  { %v7144_v11 = vpop.eup %7143 }
0x1350   :  { %6669 = vmatmul.mubr.msk.bf16.vlgmr.msra.gmra.mxu0 %vm385_vm8, %v3203_v5  ;;  %v3325_v9 = vmul.f32 %v7144_v11, %v8638_v34 }
0x1351   :  { %6679 = vmatpush3.bf16.msra.mxu0 %v3206_v15  ;;  %6680 = vmatprep.mubr.msk.bf16.mxu0 %vm7308_vm7, %v9389_v58 }
0x1352   :  { %6690 = vmatprep.subr.bf16.mxu0 %v9389_v58 }
0x136e   :  { %v3318_v12 = vpop.xlane.xlu0 %3317 }
0x136f   :  { %7145 = vrcp.f32 %v3318_v12 }
0x1372   :  { %v3450_v37 = vpop.xlane.xlu0 %3449 }
0x1373   :  { %7147 = vrcp.f32 %v3450_v37 }
0x1376   :  { %v3453_v40 = vpop.xlane.xlu1 %3452  ;;  %v3580_v33 = vpop.xlane.xlu0 %3579 }
0x1377   :  { %7149 = vrcp.f32 %v3453_v40 }
0x137a   :  { %v3583_v29 = vpop.xlane.xlu1 %3582  ;;  %v3966_v41 = vpop.xlane.xlu0 %3965 }
0x137b   :  { %7151 = vrcp.f32 %v3583_v29 }
0x137c   :  { %v7146_v36 = vpop.eup %7145  ;;  %7153 = vrcp.f32 %v3580_v33 }
0x137d   :  { %v3323_v54 = vmul.f32 %v7146_v36, %v8655_v43 }
0x137e   :  { %v3711_v1 = vpop.xlane.xlu1 %3710  ;;  %v4096_v43 = vpop.xlane.xlu0 %4095 }
0x137f   :  { %v3326_v42 = vpack.c.bf16 %v3325_v9, %v3323_v54 }
0x1380   :  { %v7148_v32 = vpop.eup %7147 }
0x1381   :  { %6681 = vmatmul.mubr.msk.bf16.vlgmr.msra.gmra.mxu0 %vm385_vm8, %v3326_v42  ;;  %v3455_v34 = vmul.f32 %v7148_v32, %v8660_v28 }
0x1382   :  { %6691 = vmatpush3.bf16.msra.mxu0 %v3460_v48  ;;  %6692 = vmatprep.mubr.msk.bf16.mxu0 %vm7308_vm7, %v9389_v58  ;;  %v3714_v52 = vpop.xlane.xlu1 %3713  ;;  %v4099_v20 = vpop.xlane.xlu0 %4098 }
0x1383   :  { %6702 = vmatprep.subr.bf16.mxu0 %v9389_v58  ;;  %7155 = vrcp.f32 %v3714_v52 }
0x1384   :  { %v7150_v6 = vpop.eup %7149  ;;  %7157 = vrcp.f32 %v3711_v1 }
0x1385   :  { %v3457_v60 = vmul.f32 %v7150_v6, %v8668_v62  ;;  %v6883_v6 = vld [vmem:[%s9374_s7 + $0x38] sm:$0xff]  }
0x1386   :  { %v3834_v53 = vpop.xlane.xlu1 %3833  ;;  %v3722_v30 = vpop.permute.xlu0 %3721  ;;  %6756 = vmatprep.subr.bf16.mxu1 %v6883_v6 }
0x1387   :  { %v3458_v21 = vpack.c.bf16 %v3457_v60, %v3455_v34  ;;  %6757 = vmatpush3.bf16.msra.mxu1 %v6883_v6  ;;  %v6884_v60 = vld [vmem:[%s9374_s7 + $0x30] sm:$0xff]   ;;  %v6105_v6 = vld [vmem:[%s9376_s9 + $0x1a0] sm:$0xff] }
0x1388   :  { %v7152_v3 = vpop.eup %7151  ;;  %6758 = vmatprep.subr.bf16.mxu1 %v6884_v60 }
0x1389   :  { %6693 = vmatmul.mubr.msk.bf16.vlgmr.msra.gmra.mxu0 %vm385_vm8, %v3458_v21  ;;  %v7154_v35 = vpop.eup %7153  ;;  %v3587_v24 = vmul.f32 %v7152_v3, %v8677_v0  ;;  %v6885_v3 = vld [vmem:[%s9374_s7 + $0x28] sm:$0xff]  }
0x138a   :  { %6703 = vmatpush3.bf16.msra.mxu0 %v3460_v48  ;;  %v3837_v19 = vpop.xlane.xlu1 %3836  ;;  %6704 = vmatprep.mubr.msk.bf16.mxu0 %vm7308_vm7, %v9389_v58  ;;  %v3585_v28 = vmul.f32 %v7154_v35, %v8665_v39  ;;  %v6886_v35 = vld [vmem:[%s9374_s7 + $0x20] sm:$0xff]  }
0x138b   :  { %7159 = vrcp.f32 %v3837_v19  ;;  %6714 = vmatprep.subr.bf16.mxu0 %v9389_v58  ;;  %6759 = vmatpush3.bf16.msra.mxu1 %v6884_v60  ;;  %v6888_v60 = vld [vmem:[%s9375_s8 + $0x30] sm:$0xff]  }
0x138c   :  { %7161 = vrcp.f32 %v3834_v53  ;;  %v3588_v62 = vpack.c.bf16 %v3587_v24, %v3585_v28  ;;  %6760 = vmatprep.subr.bf16.mxu1 %v6885_v3 }
0x138e   :  { %v3969_v59 = vpop.xlane.xlu1 %3968 }
0x138f   :  { %7163 = vrcp.f32 %v3969_v59  ;;  %6761 = vmatpush3.bf16.msra.mxu1 %v6885_v3 }
0x1390   :  { %v7156_v56 = vpop.eup %7155  ;;  %7165 = vrcp.f32 %v3966_v41  ;;  %6762 = vmatprep.subr.bf16.mxu1 %v6886_v35 }
0x1391   :  { %6705 = vmatmul.mubr.msk.bf16.vlgmr.msra.gmra.mxu0 %vm385_vm8, %v3588_v62  ;;  %v7158_v10 = vpop.eup %7157  ;;  %v3718_v7 = vmul.f32 %v7156_v56, %v8693_v51  ;;  %7167 = vrcp.f32 %v4099_v20 }
0x1392   :  { %6715 = vmatpush3.bf16.msra.mxu0 %v3722_v30  ;;  %6716 = vmatprep.mubr.msk.bf16.mxu0 %vm7308_vm7, %v9389_v58  ;;  %v3716_v0 = vmul.f32 %v7158_v10, %v8685_v44  ;;  %7169 = vrcp.f32 %v4096_v43  ;;  %v3976_v44 = vpop.permute.xlu1 %3975 }
0x1393   :  { %6726 = vmatprep.subr.bf16.mxu0 %v9389_v58  ;;  %6763 = vmatpush3.bf16.msra.mxu1 %v6886_v35 }
0x1394   :  { %v3719_v39 = vpack.c.bf16 %v3718_v7, %v3716_v0 }
0x1398   :  { %v7160_v63 = vpop.eup %7159 }
0x1399   :  { %6717 = vmatmul.mubr.msk.bf16.vlgmr.msra.gmra.mxu0 %vm385_vm8, %v3719_v39  ;;  %v7162_v25 = vpop.eup %7161  ;;  %v3841_v14 = vmul.f32 %v7160_v63, %v8703_v17 }
0x139a   :  { %6727 = vmatpush3.bf16.msra.mxu0 %v3722_v30  ;;  %6728 = vmatprep.mubr.msk.bf16.mxu0 %vm7308_vm7, %v9389_v58  ;;  %v3839_v51 = vmul.f32 %v7162_v25, %v8699_v18 }
0x139b   :  { %6738 = vmatprep.subr.bf16.mxu0 %v9389_v58 }
0x139c   :  { %v3842_v13 = vpack.c.bf16 %v3841_v14, %v3839_v51  ;;  %v7164_v55 = vpop.eup %7163 }
0x139d   :  { %v7166_v15 = vpop.eup %7165  ;;  %v3973_v50 = vmul.f32 %v7164_v55, %v8707_v47 }
0x139e   :  { %v3971_v4 = vmul.f32 %v7166_v15, %v8672_v46  ;;  %v7168_v8 = vpop.eup %7167 }
0x139f   :  { %v7170_v18 = vpop.eup %7169  ;;  %v4103_v26 = vmul.f32 %v7168_v8, %v8689_v23 }
0x13a0   :  { %v3974_v17 = vpack.c.bf16 %v3973_v50, %v3971_v4  ;;  %v4101_v57 = vmul.f32 %v7170_v18, %v8681_v38 }
0x13a1   :  { %6729 = vmatmul.mubr.msk.bf16.vlgmr.msra.gmra.mxu0 %vm385_vm8, %v3842_v13 }
0x13a2   :  { %6739 = vmatpush3.bf16.msra.mxu0 %v3976_v44  ;;  %6740 = vmatprep.mubr.msk.bf16.mxu0 %vm7308_vm7, %v9389_v58  ;;  %v4104_v5 = vpack.c.bf16 %v4103_v26, %v4101_v57 }
0x13a3   :  { %6750 = vmatprep.subr.bf16.mxu0 %v9389_v58 }
0x13a9   :  { %6741 = vmatmul.mubr.msk.bf16.vlgmr.msra.gmra.mxu0 %vm385_vm8, %v3974_v17 }
0x13aa   :  { %6751 = vmatpush3.bf16.msra.mxu0 %v3976_v44  ;;  %6752 = vmatprep.mubr.msk.bf16.mxu0 %vm7308_vm7, %v9389_v58  ;;  %vm9390_vm7 = vcmask 523648  }
0x13ab   :  { %vm9392_vm9 = vmmov %vm9390_vm7 }
0x13ac   :  { %vm9393_vm10 = vmmov %vm9390_vm7 }
0x13b1   :  { %6753 = vmatmul.mubr.msk.bf16.vlgmr.msra.gmra.mxu0 %vm385_vm8, %v4104_v5 }
0x1410   :  { %v3245_v49 = vpop.f32.mrf.mxu0 }
0x1411   :  { %3252 = vst.msk [vmem:[#allocation2] sm:$0xff] %vm385_vm8, %v3245_v49 }
0x1412   :  { %v6670_v46 = vpop.f32.mrf.mxu0 }
0x1414   :  { %v3248_v47 = vpop.f32.mrf.mxu0 }
0x1415   :  { %3253 = vst.msk [vmem:[#allocation2 + $0x8] sm:$0xff] %vm385_vm8, %v3248_v47 }
0x1416   :  { %v6671_v12 = vpop.f32.mrf.mxu0 }
0x1441   :  { %v3364_v48 = vpop.f32.mrf.mxu0 }
0x1442   :  { %3373 = vrot.lane.b32.xlu0 %v3364_v48, %s7315_s23 }
0x1443   :  { %v6682_v37 = vpop.f32.mrf.mxu0 }
0x1445   :  { %v3367_v58 = vpop.f32.mrf.mxu0 }
0x1446   :  { %3375 = vrot.lane.b32.xlu0 %v3367_v58, %s7315_s23 }
0x1447   :  { %v6683_v23 = vpop.f32.mrf.mxu0 }
0x1449   :  { %v3499_v38 = vpop.f32.mrf.mxu0 }
0x144a   :  { %3508 = vrot.lane.b32.xlu1 %v3499_v38, %s7314_s22 }
0x144b   :  { %v6694_v40 = vpop.f32.mrf.mxu0 }
0x144d   :  { %v3502_v11 = vpop.f32.mrf.mxu0 }
0x144e   :  { %3510 = vrot.lane.b32.xlu0 %v3502_v11, %s7314_s22 }
0x144f   :  { %v6695_v33 = vpop.f32.mrf.mxu0 }
0x1451   :  { %v3626_v29 = vpop.f32.mrf.mxu0 }
0x1452   :  { %3635 = vrot.lane.b32.xlu1 %v3626_v29, %s7312_s20 }
0x1453   :  { %v6706_v36 = vpop.f32.mrf.mxu0 }
0x1455   :  { %v3629_v54 = vpop.f32.mrf.mxu0 }
0x1456   :  { %3637 = vrot.lane.b32.xlu0 %v3629_v54, %s7312_s20 }
0x1457   :  { %v6707_v9 = vpop.f32.mrf.mxu0 }
0x1458   :  { %v6109_v9 = vld [vmem:[%s9376_s9 + $0x1c0] sm:$0xff] }
0x1459   :  { %v3761_v1 = vpop.f32.mrf.mxu0 }
0x145a   :  { %3768 = vst.msk [vmem:[#allocation2 + $0x10] sm:$0xff] %vm385_vm8, %v3761_v1  ;;  %v6113_v1 = vld [vmem:[%s9376_s9 + $0x1e0] sm:$0xff] }
0x145b   :  { %v6718_v42 = vpop.f32.mrf.mxu0 }
0x145c   :  { %v6142_v42 = vcombine.high %v6109_v9, %v6113_v1 }
0x145d   :  { %v3764_v41 = vpop.f32.mrf.mxu0 }
0x145e   :  { %3769 = vst.msk [vmem:[#allocation2 + $0x18] sm:$0xff] %vm385_vm8, %v3764_v41  ;;  %vm9391_vm8 = vmmov %vm9390_vm7  ;;  %v6141_v41 = vcombine.low %v6109_v9, %v6113_v1  ;;  %4845 = vmatprep.subr.bf16.mxu1 %v6142_v42  ;;  %v6102_v9 = vld [vmem:[%s9376_s9 + $0x188] sm:$0xff] }
0x145f   :  { %v6719_v32 = vpop.f32.mrf.mxu0  ;;  %v6106_v42 = vld [vmem:[%s9376_s9 + $0x1a8] sm:$0xff] }
0x1460   :  { %v6887_v32 = vld [vmem:[%s9375_s8 + $0x38] sm:$0xff]  }
0x1461   :  { %v3880_v52 = vpop.f32.mrf.mxu0  ;;  %6768 = vmatprep.subr.bf16.mxu0 %v6887_v32 }
0x1462   :  { %3889 = vrot.lane.b32.xlu1 %v3880_v52, %s7315_s23  ;;  %v6101_v52 = vld [vmem:[%s9376_s9 + $0x180] sm:$0xff]  ;;  %6769 = vmatpush3.bf16.msra.mxu0 %v6887_v32  ;;  %v6099_v32 = vld [vmem:[%s9376_s9 + $0x170] sm:$0xff] }
0x1463   :  { %v6730_v43 = vpop.f32.mrf.mxu0  ;;  %6770 = vmatprep.subr.bf16.mxu0 %v6888_v60 }
0x1464   :  { %v6134_v43 = vcombine.high %v6101_v52, %v6105_v6 }
0x1465   :  { %v3883_v34 = vpop.f32.mrf.mxu0 }
0x1466   :  { %3891 = vrot.lane.b32.xlu0 %v3883_v34, %s7315_s23  ;;  %v6133_v34 = vcombine.low %v6101_v52, %v6105_v6  ;;  %6771 = vmatpush3.bf16.msra.mxu0 %v6888_v60 }
0x1467   :  { %v6731_v53 = vpop.f32.mrf.mxu0 }
0x1468   :  { %v6093_v53 = vld [vmem:[%s9376_s9 + $0x140] sm:$0xff] }
0x1469   :  { %v4015_v21 = vpop.f32.mrf.mxu0 }
0x146a   :  { %4024 = vrot.lane.b32.xlu1 %v4015_v21, %s7314_s22  ;;  %v6097_v21 = vld [vmem:[%s9376_s9 + $0x160] sm:$0xff] }
0x146b   :  { %v6742_v19 = vpop.f32.mrf.mxu0  ;;  %v6126_v3 = vcombine.high %v6093_v53, %v6097_v21  ;;  %v6125_v35 = vcombine.low %v6093_v53, %v6097_v21  ;;  %v6094_v53 = vld [vmem:[%s9376_s9 + $0x148] sm:$0xff] }
0x146c   :  { %v6889_v19 = vld [vmem:[%s9375_s8 + $0x28] sm:$0xff]  }
0x146d   :  { %v4018_v20 = vpop.f32.mrf.mxu0  ;;  %6772 = vmatprep.subr.bf16.mxu0 %v6889_v19  ;;  %v6098_v21 = vld [vmem:[%s9376_s9 + $0x168] sm:$0xff] }
0x146e   :  { %4026 = vrot.lane.b32.xlu0 %v4018_v20, %s7314_s22  ;;  %v6085_v20 = vld [vmem:[%s9376_s9 + $0x100] sm:$0xff]  ;;  %6773 = vmatpush3.bf16.msra.mxu0 %v6889_v19  ;;  %v6135_v19 = vcombine.low %v6102_v9, %v6106_v42 }
0x146f   :  { %v6743_v24 = vpop.f32.mrf.mxu0 }
0x1470   :  { %v6089_v24 = vld [vmem:[%s9376_s9 + $0x120] sm:$0xff] }
0x1471   :  { %v4142_v28 = vpop.f32.mrf.mxu0 }
0x1472   :  { %4151 = vrot.lane.b32.xlu1 %v4142_v28, %s7312_s20  ;;  %v6118_v28 = vcombine.high %v6085_v20, %v6089_v24 }
0x1473   :  { %v6754_v62 = vpop.f32.mrf.mxu0 }
0x1474   :  { %v6117_v62 = vcombine.low %v6085_v20, %v6089_v24  ;;  %v6128_v24 = vcombine.high %v6094_v53, %v6098_v21 }
0x1475   :  { %v4145_v56 = vpop.f32.mrf.mxu0 }
0x1476   :  { %4153 = vrot.lane.b32.xlu0 %v4145_v56, %s7312_s20  ;;  %v6890_v56 = vld [vmem:[%s9375_s8 + $0x20] sm:$0xff]  }
0x1477   :  { %v6755_v59 = vpop.f32.mrf.mxu0  ;;  %6774 = vmatprep.subr.bf16.mxu0 %v6890_v56 }
0x1478   :  { %v6111_v59 = vld [vmem:[%s9376_s9 + $0x1d0] sm:$0xff]  ;;  %6775 = vmatpush3.bf16.msra.mxu0 %v6890_v56  ;;  %v6090_v56 = vld [vmem:[%s9376_s9 + $0x128] sm:$0xff] }
0x14b4   :  { %v3374_v30 = vpop.permute.xlu0 %3373 }
0x14b5   :  { %3379 = vst.msk [vmem:[#allocation2] sm:$0xff] %vm635_vm11, %v3374_v30  ;;  %v6115_v30 = vld [vmem:[%s9376_s9 + $0x1f0] sm:$0xff] }
0x14b8   :  { %v3376_v10 = vpop.permute.xlu0 %3375 }
0x14b9   :  { %3380 = vst.msk [vmem:[#allocation2 + $0x8] sm:$0xff] %vm635_vm11, %v3376_v10  ;;  %v6146_v10 = vcombine.high %v6111_v59, %v6115_v30 }
0x14bc   :  { %v3509_v7 = vpop.permute.xlu1 %3508 }
0x14bd   :  { %3514 = vst.msk [vmem:[#allocation2] sm:$0xff] %vm771_vm12, %v3509_v7  ;;  %v6145_v7 = vcombine.low %v6111_v59, %v6115_v30  ;;  %v6127_v59 = vcombine.low %v6094_v53, %v6098_v21 }
0x14c0   :  { %v3511_v0 = vpop.permute.xlu0 %3510 }
0x14c1   :  { %3515 = vst.msk [vmem:[#allocation2 + $0x8] sm:$0xff] %vm771_vm12, %v3511_v0  ;;  %v6110_v0 = vld [vmem:[%s9376_s9 + $0x1c8] sm:$0xff] }
0x14c4   :  { %v3636_v39 = vpop.permute.xlu1 %3635 }
0x14c5   :  { %3641 = vst.msk [vmem:[#allocation2] sm:$0xff] %vm9390_vm7, %v3636_v39  ;;  %v6114_v39 = vld [vmem:[%s9376_s9 + $0x1e8] sm:$0xff] }
0x14c8   :  { %v3638_v63 = vpop.permute.xlu0 %3637 }
0x14c9   :  { %3642 = vst.msk [vmem:[#allocation2 + $0x8] sm:$0xff] %vm9391_vm8, %v3638_v63  ;;  %v6143_v63 = vcombine.low %v6110_v0, %v6114_v39 }
0x14cc   :  { %v4159_v25 = vld [vmem:[#allocation2] sm:$0xff] }
0x14d0   :  { %v4160_v14 = vld [vmem:[#allocation2 + $0x8] sm:$0xff] }
0x14d1   :  { %v4163_v51 = vpack.c.bf16 %v4160_v14, %v4159_v25  ;;  %v6144_v25 = vcombine.high %v6110_v0, %v6114_v39  ;;  %v6116_v0 = vld [vmem:[%s9376_s9 + $0x1f8] sm:$0xff] }
0x14d3   :  { %6764 = vmatprep.mubr.msk.bf16.mxu1 %vm217_vm6, %v4163_v51  ;;  %4898 = vmatprep.subr.bf16.mxu0 %v6144_v25  ;;  %v6104_v25 = vld [vmem:[%s9376_s9 + $0x198] sm:$0xff] }
0x14d4   :  { %v3890_v13 = vpop.permute.xlu1 %3889 }
0x14d5   :  { %3895 = vst.msk [vmem:[#allocation2 + $0x10] sm:$0xff] %vm635_vm11, %v3890_v13 }
0x14d8   :  { %v3892_v55 = vpop.permute.xlu0 %3891 }
0x14d9   :  { %3896 = vst.msk [vmem:[#allocation2 + $0x18] sm:$0xff] %vm635_vm11, %v3892_v55 }
0x14dc   :  { %v4025_v44 = vpop.permute.xlu1 %4024 }
0x14dd   :  { %4030 = vst.msk [vmem:[#allocation2 + $0x10] sm:$0xff] %vm771_vm12, %v4025_v44 }
0x14e0   :  { %v4027_v15 = vpop.permute.xlu0 %4026 }
0x14e1   :  { %4031 = vst.msk [vmem:[#allocation2 + $0x18] sm:$0xff] %vm771_vm12, %v4027_v15 }
0x14e4   :  { %v4152_v50 = vpop.permute.xlu1 %4151 }
0x14e5   :  { %4157 = vst.msk [vmem:[#allocation2 + $0x10] sm:$0xff] %vm9392_vm9, %v4152_v50 }
0x14e8   :  { %v4154_v4 = vpop.permute.xlu0 %4153 }
0x14e9   :  { %4158 = vst.msk [vmem:[#allocation2 + $0x18] sm:$0xff] %vm9393_vm10, %v4154_v4 }
0x14ec   :  { %v4161_v17 = vld [vmem:[#allocation2 + $0x10] sm:$0xff] }
0x14f0   :  { %v4162_v8 = vld [vmem:[#allocation2 + $0x18] sm:$0xff] }
0x14f1   :  { %v4164_v18 = vpack.c.bf16 %v4162_v8, %v4161_v17 }
0x14f3   :  { %6765 = vmatmul.mubr.msk.bf16.vlgmr.msra.gmra.mxu1 %vm217_vm6, %v4164_v18 }
0x14f4   :  { %4869 = vmatprep.mubr.bf16.mxu1 %v7305_v2  ;;  %4846 = vmatpush1.bf16.msra.mxu1 %v6141_v41  ;;  %v6095_v41 = vld [vmem:[%s9376_s9 + $0x150] sm:$0xff] }
0x14f5   :  { %4847 = vmatprep.subr.bf16.mxu1 %v6134_v43  ;;  %v6130_v60 = vcombine.high %v6095_v41, %v6099_v32  ;;  %v6129_v20 = vcombine.low %v6095_v41, %v6099_v32 }
0x14f8   :  { %4848 = vmatpush1.bf16.msra.mxu1 %v6133_v34  ;;  %v6136_v34 = vcombine.high %v6102_v9, %v6106_v42 }
0x14f9   :  { %4849 = vmatprep.subr.bf16.mxu1 %v6126_v3  ;;  %v6087_v3 = vld [vmem:[%s9376_s9 + $0x110] sm:$0xff] }
0x14fc   :  { %4850 = vmatpush1.bf16.msra.mxu1 %v6125_v35  ;;  %v6091_v35 = vld [vmem:[%s9376_s9 + $0x130] sm:$0xff] }
0x14fd   :  { %4851 = vmatprep.subr.bf16.mxu1 %v6118_v28  ;;  %v6122_v28 = vcombine.high %v6087_v3, %v6091_v35  ;;  %v6121_v30 = vcombine.low %v6087_v3, %v6091_v35 }
0x1500   :  { %4852 = vmatpush1.bf16.msra.mxu1 %v6117_v62  ;;  %v6086_v62 = vld [vmem:[%s9376_s9 + $0x108] sm:$0xff] }
0x1501   :  { %4951 = vmatprep.subr.bf16.mxu1 %v6146_v10  ;;  %v6120_v10 = vcombine.high %v6086_v62, %v6090_v56  ;;  %v6119_v39 = vcombine.low %v6086_v62, %v6090_v56 }
0x15b3   :  { %v6766_v26 = vpop.f32.mrf.mxu1 }
0x15b4   :  { %v4255_v49 = vadd.f32 %v6766_v26, %v8414_v22 }
0x15b5   :  { %v4238_v57 = vpop.f32.mrf.mxu1 }
0x15b6   :  { %v4253_v12 = vadd.f32 %v4238_v57, %v8402_v31  ;;  %v6070_v57 = vld [vmem:[%s9372_s5 + $0x1] sm:$0x1] }
0x15b7   :  { %v6767_v5 = vpop.f32.mrf.mxu1 }
0x15b8   :  { %v4256_v46 = vadd.f32 %v6767_v5, %v8412_v45  ;;  %v4297_v5 = vunpack.c.l.bf16 %v6070_v57 }
0x15b9   :  { %v4241_v47 = vpop.f32.mrf.mxu1 }
0x15ba   :  { %v4258_v48 = vpack.c.bf16 %v4256_v46, %v4255_v49  ;;  %v4254_v37 = vadd.f32 %v4241_v47, %v8400_v27  ;;  %v4301_v49 = vrot.slane %v4297_v5, %v7490_v61 }
0x15bc   :  { %v4257_v58 = vpack.c.bf16 %v4254_v37, %v4253_v12  ;;  %v8807_v23 = vunpack.c.l.bf16 %v4258_v48  ;;  %v8809_v38 = vunpack.c.h.bf16 %v4258_v48 }
0x15be   :  { %v8811_v40 = vunpack.c.l.bf16 %v4257_v58  ;;  %v8813_v11 = vunpack.c.h.bf16 %v4257_v58  ;;  %v4265_v27 = vmul.f32 %v8807_v23, %v8807_v23  ;;  %v4266_v29 = vmul.f32 %v8809_v38, %v8809_v38  ;;  %v6103_v58 = vld [vmem:[%s9376_s9 + $0x190] sm:$0xff] }
0x15c0   :  { %v4264_v22 = vmul.f32 %v8813_v11, %v8813_v11  ;;  %v4263_v45 = vmul.f32 %v8811_v40, %v8811_v40  ;;  %v4273_v36 = vsel %vm217_vm6, %v4265_v27, 0.0  ;;  %v4276_v54 = vsel %vm217_vm6, %v4266_v29, 0.0 }
0x15c2   :  { %v4270_v31 = vsel %vm217_vm6, %v4264_v22, 0.0  ;;  %v4267_v33 = vsel %vm217_vm6, %v4263_v45, 0.0  ;;  %v6107_v22 = vld [vmem:[%s9376_s9 + $0x1b0] sm:$0xff] }
0x15c3   :  { %4271 = vadd.xlane.f32.xlu0 %v4270_v31  ;;  %4268 = vadd.xlane.f32.xlu1 %v4267_v33  ;;  %v6137_v6 = vcombine.low %v6103_v58, %v6107_v22 }
0x15c7   :  { %4274 = vadd.xlane.f32.xlu0 %v4273_v36  ;;  %4277 = vadd.xlane.f32.xlu1 %v4276_v54  ;;  %v6138_v54 = vcombine.high %v6103_v58, %v6107_v22 }
0x164c   :  { %v4272_v14 = vpop.xlane.xlu0 %4271  ;;  %v4269_v51 = vpop.xlane.xlu1 %4268 }
0x164d   :  { %v4280_v13 = vmul.f32 0.015625, %v4272_v14  ;;  %v4279_v55 = vmul.f32 0.015625, %v4269_v51  ;;  %v6108_v14 = vld [vmem:[%s9376_s9 + $0x1b8] sm:$0xff] }
0x164f   :  { %v4284_v44 = vadd.f32 1e-05, %v4280_v13  ;;  %v4283_v15 = vadd.f32 1e-05, %v4279_v55  ;;  %v6140_v13 = vcombine.high %v6104_v25, %v6108_v14  ;;  %v6096_v55 = vld [vmem:[%s9376_s9 + $0x158] sm:$0xff] }
0x1650   :  { %v4275_v50 = vpop.xlane.xlu0 %4274  ;;  %v4278_v4 = vpop.xlane.xlu1 %4277 }
0x1651   :  { %7171 = vrsqrt.f32 %v4284_v44  ;;  %v4281_v17 = vmul.f32 0.015625, %v4275_v50  ;;  %v4282_v8 = vmul.f32 0.015625, %v4278_v4  ;;  %v6100_v44 = vld [vmem:[%s9376_s9 + $0x178] sm:$0xff] }
0x1652   :  { %7173 = vrsqrt.f32 %v4283_v15  ;;  %v6139_v15 = vcombine.low %v6104_v25, %v6108_v14  ;;  %v6132_v50 = vcombine.high %v6096_v55, %v6100_v44  ;;  %v6088_v4 = vld [vmem:[%s9376_s9 + $0x118] sm:$0xff] }
0x1653   :  { %v4285_v18 = vadd.f32 1e-05, %v4281_v17  ;;  %v4286_v26 = vadd.f32 1e-05, %v4282_v8  ;;  %v6092_v17 = vld [vmem:[%s9376_s9 + $0x138] sm:$0xff]  ;;  %v6131_v8 = vcombine.low %v6096_v55, %v6100_v44 }
0x1655   :  { %7175 = vrsqrt.f32 %v4285_v18  ;;  %v6124_v18 = vcombine.high %v6088_v4, %v6092_v17 }
0x1656   :  { %7177 = vrsqrt.f32 %v4286_v26  ;;  %v6123_v26 = vcombine.low %v6088_v4, %v6092_v17 }
0x165e   :  { %v7172_v46 = vpop.eup %7171 }
0x165f   :  { %v7174_v47 = vpop.eup %7173  ;;  %v4292_v12 = vmul.f32 %v7172_v46, %v8813_v11 }
0x1660   :  { %v4291_v48 = vmul.f32 %v7174_v47, %v8811_v40 }
0x1661   :  { %v4303_v37 = vmul.f32 %v4301_v49, %v4292_v12 }
0x1662   :  { %v7176_v45 = vpop.eup %7175  ;;  %v4302_v31 = vmul.f32 %v4301_v49, %v4291_v48 }
0x1663   :  { %v7178_v33 = vpop.eup %7177  ;;  %v4293_v27 = vmul.f32 %v7176_v45, %v8807_v23 }
0x1664   :  { %v4294_v29 = vmul.f32 %v7178_v33, %v8809_v38  ;;  %v8889_v36 = vpack.c.bf16 %v4303_v37, %v4302_v31 }
0x1665   :  { %v4304_v1 = vmul.f32 %v4301_v49, %v4293_v27 }
0x1666   :  { %6776 = vmatprep.mubr.msk.bf16.mxu0 %vm217_vm6, %v8889_v36  ;;  %6149 = vmatmul.mubr.msk.bf16.vlgmr.msra.gmra.mxu1 %vm217_vm6, %v8889_v36  ;;  %v4305_v52 = vmul.f32 %v4301_v49, %v4294_v29 }
0x1667   :  { %4952 = vmatpush1.bf16.msra.mxu1 %v6145_v7  ;;  %4879 = vmatprep.mubr.bf16.mxu1 %v7305_v2  ;;  %v6112_v7 = vld [vmem:[%s9376_s9 + $0x1d8] sm:$0xff] }
0x1668   :  { %v8908_v43 = vpack.c.bf16 %v4305_v52, %v4304_v1  ;;  %4953 = vmatprep.subr.bf16.mxu1 %v6138_v54  ;;  %v6147_v51 = vcombine.low %v6112_v7, %v6116_v0 }
0x166a   :  { %6777 = vmatmul.mubr.msk.bf16.vlgmr.msra.gmra.mxu0 %vm217_vm6, %v8908_v43 }
0x166b   :  { %4899 = vmatpush1.bf16.msra.mxu0 %v6143_v63  ;;  %4954 = vmatpush1.bf16.msra.mxu1 %v6137_v6  ;;  %v6148_v63 = vcombine.high %v6112_v7, %v6116_v0 }
0x166c   :  { %4900 = vmatprep.subr.bf16.mxu0 %v6136_v34  ;;  %4955 = vmatprep.subr.bf16.mxu1 %v6130_v60 }
0x166d   :  { %4922 = vmatprep.mubr.bf16.mxu0 %v7305_v2 }
0x166e   :  { %6150 = vmatmul.mubr.msk.bf16.gmra.mxu1 %vm217_vm6, %v8908_v43 }
0x166f   :  { %4901 = vmatpush1.bf16.msra.mxu0 %v6135_v19  ;;  %4956 = vmatpush1.bf16.msra.mxu1 %v6129_v20 }
0x1670   :  { %4902 = vmatprep.subr.bf16.mxu0 %v6128_v24  ;;  %4957 = vmatprep.subr.bf16.mxu1 %v6122_v28 }
0x1671   :  { %4975 = vmatprep.mubr.bf16.mxu1 %v7305_v2 }
0x1673   :  { %4903 = vmatpush1.bf16.msra.mxu0 %v6127_v59  ;;  %4958 = vmatpush1.bf16.msra.mxu1 %v6121_v30 }
0x1674   :  { %4904 = vmatprep.subr.bf16.mxu0 %v6120_v10 }
0x1676   :  { %6153 = vmatmul.mubr.msk.bf16.vlgmr.msra.gmra.mxu1 %vm217_vm6, %v8889_v36 }
0x1677   :  { %4905 = vmatpush1.bf16.msra.mxu0 %v6119_v39  ;;  %4985 = vmatprep.mubr.bf16.mxu1 %v7305_v2 }
0x1678   :  { %5004 = vmatprep.subr.bf16.mxu0 %v6148_v63 }
0x167a   :  { %6151 = vmatmul.mubr.msk.bf16.vlgmr.msra.gmra.mxu0 %vm217_vm6, %v8889_v36 }
0x167b   :  { %5005 = vmatpush1.bf16.msra.mxu0 %v6147_v51  ;;  %4932 = vmatprep.mubr.bf16.mxu0 %v7305_v2 }
0x167c   :  { %5006 = vmatprep.subr.bf16.mxu0 %v6140_v13 }
0x167e   :  { %6154 = vmatmul.mubr.msk.bf16.gmra.mxu1 %vm217_vm6, %v8908_v43 }
0x167f   :  { %5007 = vmatpush1.bf16.msra.mxu0 %v6139_v15  ;;  %5111 = vmatprep.mubr.bf16.mxu1 %v7305_v2 }
0x1680   :  { %5008 = vmatprep.subr.bf16.mxu0 %v6132_v50 }
0x1682   :  { %6152 = vmatmul.mubr.msk.bf16.gmra.mxu0 %vm217_vm6, %v8908_v43 }
0x1683   :  { %5009 = vmatpush1.bf16.msra.mxu0 %v6131_v8  ;;  %5028 = vmatprep.mubr.bf16.mxu0 %v7305_v2 }
0x1684   :  { %5010 = vmatprep.subr.bf16.mxu0 %v6124_v18 }
0x1687   :  { %5011 = vmatpush1.bf16.msra.mxu0 %v6123_v26 }
0x168a   :  { %6155 = vmatmul.mubr.msk.bf16.vlgmr.msra.gmra.mxu0 %vm217_vm6, %v8889_v36 }
0x168b   :  { %5038 = vmatprep.mubr.bf16.mxu0 %v7305_v2 }
0x1692   :  { %6156 = vmatmul.mubr.msk.bf16.gmra.mxu0 %vm217_vm6, %v8908_v43 }
0x1693   :  { %5164 = vmatprep.mubr.bf16.mxu0 %v7305_v2 }
0x172a   :  { %v6778_v57 = vpop.f32.mrf.mxu0 }
0x172c   :  { %v4381_v5 = vpop.f32.mrf.mxu0 }
0x172e   :  { %v6779_v49 = vpop.f32.mrf.mxu0 }
0x172f   :  { %v4397_v47 = vpack.c.bf16 %v6779_v49, %v6778_v57 }
0x1730   :  { %v4384_v46 = vpop.f32.mrf.mxu0 }
0x1731   :  { %v4396_v12 = vpack.c.bf16 %v4384_v46, %v4381_v5  ;;  %v4400_v58 = vunpack.c.l.bf16 %v4397_v47  ;;  %v4401_v22 = vunpack.c.h.bf16 %v4397_v47 }
0x1733   :  { %v4398_v48 = vunpack.c.l.bf16 %v4396_v12  ;;  %v4399_v37 = vunpack.c.h.bf16 %v4396_v12  ;;  %v4411_v33 = vsel %vm1658_vm14, %v4401_v22, -inf  ;;  %v4408_v27 = vsel %vm1658_vm14, %v4400_v58, -inf }
0x1735   :  { %v4405_v45 = vsel %vm1658_vm14, %v4399_v37, -inf  ;;  %v4402_v31 = vsel %vm1658_vm14, %v4398_v48, -inf }
0x1736   :  { %4406 = vmax.xlane.f32.xlu1 %v4405_v45  ;;  %4403 = vmax.xlane.f32.xlu0 %v4402_v31 }
0x173a   :  { %4412 = vmax.xlane.f32.xlu1 %v4411_v33  ;;  %4409 = vmax.xlane.f32.xlu0 %v4408_v27 }
0x17bf   :  { %v4407_v29 = vpop.xlane.xlu1 %4406  ;;  %v4404_v36 = vpop.xlane.xlu0 %4403 }
0x17c0   :  { %v4415_v54 = vsub.f32 %v4399_v37, %v4407_v29  ;;  %v4414_v9 = vsub.f32 %v4398_v48, %v4404_v36 }
0x17c2   :  { %v4420_v1 = vmul.f32 1.442695, %v4415_v54  ;;  %v4418_v42 = vmul.f32 1.442695, %v4414_v9 }
0x17c3   :  { %v4413_v41 = vpop.xlane.xlu1 %4412  ;;  %v4410_v32 = vpop.xlane.xlu0 %4409 }
0x17c4   :  { %7179 = vpow2.f32 %v4420_v1  ;;  %v4417_v52 = vsub.f32 %v4401_v22, %v4413_v41  ;;  %v4416_v6 = vsub.f32 %v4400_v58, %v4410_v32 }
0x17c5   :  { %7181 = vpow2.f32 %v4418_v42 }
0x17c6   :  { %v4424_v43 = vmul.f32 1.442695, %v4417_v52  ;;  %v4422_v34 = vmul.f32 1.442695, %v4416_v6 }
0x17c8   :  { %7183 = vpow2.f32 %v4424_v43 }
0x17c9   :  { %7185 = vpow2.f32 %v4422_v34 }
0x17d1   :  { %v7180_v60 = vpop.eup %7179 }
0x17d2   :  { %v7182_v53 = vpop.eup %7181  ;;  %v4429_v21 = vsel %vm1658_vm14, %v7180_v60, 0.0 }
0x17d3   :  { %4430 = vadd.xlane.f32.xlu1 %v4429_v21  ;;  %v4426_v3 = vsel %vm1658_vm14, %v7182_v53, 0.0 }
0x17d4   :  { %4427 = vadd.xlane.f32.xlu0 %v4426_v3 }
0x17d5   :  { %v7184_v35 = vpop.eup %7183 }
0x17d6   :  { %v7186_v19 = vpop.eup %7185  ;;  %v4435_v20 = vsel %vm1658_vm14, %v7184_v35, 0.0 }
0x17d7   :  { %4436 = vadd.xlane.f32.xlu1 %v4435_v20  ;;  %v4432_v24 = vsel %vm1658_vm14, %v7186_v19, 0.0 }
0x17d8   :  { %4433 = vadd.xlane.f32.xlu0 %v4432_v24 }
0x185c   :  { %v4431_v28 = vpop.xlane.xlu1 %4430 }
0x185d   :  { %7187 = vrcp.f32 %v4431_v28  ;;  %v4428_v62 = vpop.xlane.xlu0 %4427 }
0x185e   :  { %7189 = vrcp.f32 %v4428_v62 }
0x1860   :  { %v4437_v56 = vpop.xlane.xlu1 %4436 }
0x1861   :  { %7191 = vrcp.f32 %v4437_v56  ;;  %v4434_v59 = vpop.xlane.xlu0 %4433 }
0x1862   :  { %7193 = vrcp.f32 %v4434_v59 }
0x186a   :  { %v7188_v30 = vpop.eup %7187 }
0x186b   :  { %v7190_v10 = vpop.eup %7189  ;;  %v8984_v7 = vmul.f32 %v7188_v30, %v7180_v60 }
0x186c   :  { %v8986_v0 = vmul.f32 %v7190_v10, %v7182_v53 }
0x186d   :  { %v4449_v39 = vsel %vm1658_vm14, %v8984_v7, -inf }
0x186e   :  { %v7192_v63 = vpop.eup %7191  ;;  %4450 = vmax.xlane.f32.xlu1 %v4449_v39  ;;  %v4446_v25 = vsel %vm1658_vm14, %v8986_v0, -inf }
0x186f   :  { %v7194_v14 = vpop.eup %7193  ;;  %4447 = vmax.xlane.f32.xlu0 %v4446_v25  ;;  %v8992_v51 = vmul.f32 %v7192_v63, %v7184_v35 }
0x1870   :  { %v8994_v13 = vmul.f32 %v7194_v14, %v7186_v19 }
0x1871   :  { %v4455_v55 = vsel %vm1658_vm14, %v8992_v51, -inf }
0x1872   :  { %4456 = vmax.xlane.f32.xlu1 %v4455_v55  ;;  %v4452_v44 = vsel %vm1658_vm14, %v8994_v13, -inf }
0x1873   :  { %4453 = vmax.xlane.f32.xlu0 %v4452_v44 }
0x18f7   :  { %v9000_v15 = vpop.xlane.xlu1 %4450 }
0x18f8   :  { %vm4459_vm11 = vcmp.eq.f32.partialorder %v8984_v7, %v9000_v15  ;;  %v9004_v50 = vpop.xlane.xlu0 %4447 }
0x18f9   :  { %v4463_v4 = vsel %vm4459_vm11, %v7433_v16, 8  ;;  %vm4458_vm12 = vcmp.eq.f32.partialorder %v8986_v0, %v9004_v50 }
0x18fa   :  { %v4462_v17 = vsel %vm4458_vm12, %v7433_v16, 8  ;;  %v4481_v8 = vsel %vm1658_vm14, %v4463_v4, 2147483647 }
0x18fb   :  { %v9011_v18 = vpop.xlane.xlu1 %4456  ;;  %v4483_v26 = vshra.s32 %v4481_v8, 16  ;;  %v4466_v57 = vsel %vm1658_vm14, %v4462_v17, 2147483647  ;;  %v4482_v27 = vand.u32 65535, %v4481_v8 }
0x18fc   :  { %vm4461_vm2 = vcmp.eq.f32.partialorder %v8992_v51, %v9011_v18  ;;  %v9016_v5 = vpop.xlane.xlu0 %4453  ;;  %v4468_v49 = vshra.s32 %v4466_v57, 16  ;;  %v4467_v29 = vand.u32 65535, %v4466_v57 }
0x18fd   :  { %v4465_v46 = vsel %vm4461_vm2, %v7433_v16, 8  ;;  %vm4460_vm3 = vcmp.eq.f32.partialorder %v8994_v13, %v9016_v5  ;;  %v4485_v47 = vcvt.s32.f32 %v4483_v26  ;;  %v4484_v54 = vcvt.s32.f32 %v4482_v27 }
0x18fe   :  { %v4464_v12 = vsel %vm4460_vm3, %v7433_v16, 8  ;;  %v4470_v48 = vcvt.s32.f32 %v4468_v49  ;;  %v4511_v37 = vsel %vm1658_vm14, %v4465_v46, 2147483647  ;;  %v4469_v42 = vcvt.s32.f32 %v4467_v29 }
0x18ff   :  { %4486 = vmin.xlane.f32.xlu1 %v4485_v47  ;;  %v4513_v58 = vshra.s32 %v4511_v37, 16  ;;  %v4496_v22 = vsel %vm1658_vm14, %v4464_v12, 2147483647  ;;  %v4512_v9 = vand.u32 65535, %v4511_v37 }
0x1900   :  { %4471 = vmin.xlane.f32.xlu0 %v4470_v48  ;;  %v4498_v45 = vshra.s32 %v4496_v22, 16  ;;  %v4497_v41 = vand.u32 65535, %v4496_v22 }
0x1901   :  { %v4515_v31 = vcvt.s32.f32 %v4513_v58  ;;  %v4514_v43 = vcvt.s32.f32 %v4512_v9 }
0x1902   :  { %v4500_v33 = vcvt.s32.f32 %v4498_v45  ;;  %v4499_v60 = vcvt.s32.f32 %v4497_v41 }
0x1903   :  { %4516 = vmin.xlane.f32.xlu1 %v4515_v31 }
0x1904   :  { %4501 = vmin.xlane.f32.xlu0 %v4500_v33 }
0x1988   :  { %v4487_v36 = vpop.xlane.xlu1 %4486 }
0x1989   :  { %vm4488_vm15 = vcmp.eq.f32.partialorder %v4485_v47, %v4487_v36  ;;  %v4472_v1 = vpop.xlane.xlu0 %4471  ;;  %v4493_v3 = vcvt.f32.s32 %v4487_v36 }
0x198a   :  { %vm4473_vm13 = vcmp.eq.f32.partialorder %v4470_v48, %v4472_v1  ;;  %v4489_v32 = vsel %vm4488_vm15, %v4484_v54, inf  ;;  %v4478_v35 = vcvt.f32.s32 %v4472_v1 }
0x198b   :  { %4490 = vmin.xlane.f32.xlu1 %v4489_v32  ;;  %v4474_v52 = vsel %vm4473_vm13, %v4469_v42, inf  ;;  %v4494_v20 = vshll.u32 %v4493_v3, 16 }
0x198c   :  { %4475 = vmin.xlane.f32.xlu0 %v4474_v52  ;;  %v4517_v6 = vpop.xlane.xlu1 %4516  ;;  %v4479_v56 = vshll.u32 %v4478_v35, 16 }
0x198d   :  { %vm4518_vm5 = vcmp.eq.f32.partialorder %v4515_v31, %v4517_v6  ;;  %v4502_v34 = vpop.xlane.xlu0 %4501  ;;  %v4523_v24 = vcvt.f32.s32 %v4517_v6 }
0x198e   :  { %vm4503_vm0 = vcmp.eq.f32.partialorder %v4500_v33, %v4502_v34  ;;  %v4519_v53 = vsel %vm4518_vm5, %v4514_v43, inf  ;;  %v4508_v59 = vcvt.f32.s32 %v4502_v34 }
0x198f   :  { %4520 = vmin.xlane.f32.xlu1 %v4519_v53  ;;  %v4504_v21 = vsel %vm4503_vm0, %v4499_v60, inf  ;;  %v4524_v25 = vshll.u32 %v4523_v24, 16 }
0x1990   :  { %4505 = vmin.xlane.f32.xlu0 %v4504_v21  ;;  %v4509_v44 = vshll.u32 %v4508_v59, 16 }
0x1a14   :  { %v4491_v19 = vpop.xlane.xlu1 %4490 }
0x1a15   :  { %v4492_v28 = vcvt.f32.s32 %v4491_v19  ;;  %v4476_v62 = vpop.xlane.xlu0 %4475 }
0x1a16   :  { %v4477_v30 = vcvt.f32.s32 %v4476_v62 }
0x1a17   :  { %v9024_v10 = vadd.s32 %v4494_v20, %v4492_v28 }
0x1a18   :  { %v9026_v39 = vadd.s32 %v4479_v56, %v4477_v30  ;;  %v4521_v63 = vpop.xlane.xlu1 %4520 }
0x1a19   :  { %v4522_v14 = vcvt.f32.s32 %v4521_v63  ;;  %v4506_v55 = vpop.xlane.xlu0 %4505  ;;  %vm4527_vm1 = vcmp.eq.s32.totalorder %v7433_v16, %v9024_v10 }
0x1a1a   :  { %v4507_v4 = vcvt.f32.s32 %v4506_v55  ;;  %v4539_v17 = vsel %vm4527_vm1, -1.0, %v8984_v7  ;;  %vm4526_vm7 = vcmp.eq.s32.totalorder %v7433_v16, %v9026_v39 }
0x1a1b   :  { %v9036_v8 = vadd.s32 %v4524_v25, %v4522_v14  ;;  %v4545_v26 = vsel %vm1658_vm14, %v4539_v17, -inf  ;;  %v4538_v57 = vsel %vm4526_vm7, -1.0, %v8986_v0  ;;  %v5049_v25 = vld [vmem:[%s9378_s11] sm:$0xff]  ;;  %v5050_v14 = vld [vmem:[%s9378_s11 + $0x8] sm:$0xff] }
0x1a1c   :  { %v9043_v49 = vadd.s32 %v4509_v44, %v4507_v4  ;;  %4546 = vmax.xlane.f32.xlu1 %v4545_v26  ;;  %v4542_v46 = vsel %vm1658_vm14, %v4538_v57, -inf  ;;  %v6158_v55 = vcombine.high %v5049_v25, %v5049_v25  ;;  %v6160_v44 = vcombine.high %v5050_v14, %v5050_v14 }
0x1a1d   :  { %4543 = vmax.xlane.f32.xlu0 %v4542_v46  ;;  %vm4529_vm8 = vcmp.eq.s32.totalorder %v7433_v16, %v9036_v8  ;;  %v6157_v4 = vcombine.low %v5049_v25, %v5049_v25  ;;  %v6895_v46 = vld [vmem:[%s9377_s10 + $0x178] sm:$0xff]   ;;  %v6903_v25 = vld [vmem:[%s9377_s10 + $0x168] sm:$0xff]  }
0x1a1e   :  { %v4541_v7 = vsel %vm4529_vm8, -1.0, %v8992_v51  ;;  %vm4528_vm9 = vcmp.eq.s32.totalorder %v7433_v16, %v9043_v49  ;;  %6161 = vmatprep.subr.msk.bf16.mxu1 %vm2323_vm4, %v6158_v55  ;;  %6164 = vmatprep.subr.msk.bf16.mxu0 %vm2323_vm4, %v6160_v44  ;;  %v6906_v55 = vld [vmem:[%s9377_s10 + $0x1a8] sm:$0xff]   ;;  %v6907_v44 = vld [vmem:[%s9377_s10 + $0x160] sm:$0xff]  }
0x1a1f   :  { %v4551_v47 = vsel %vm1658_vm14, %v4541_v7, -inf  ;;  %v4540_v0 = vsel %vm4528_vm9, -1.0, %v8994_v13  ;;  %v5068_v26 = vsel %vm2323_vm4, %v6157_v4, 0  ;;  %v6908_v4 = vld [vmem:[%s9377_s10 + $0x1e0] sm:$0xff]  }
0x1a20   :  { %4552 = vmax.xlane.f32.xlu1 %v4551_v47  ;;  %v4548_v12 = vsel %vm1658_vm14, %v4540_v0, -inf  ;;  %5094 = vmatpush1.bf16.msra.mxu1 %v5068_v26  ;;  %v6910_v26 = vld [vmem:[%s9377_s10 + $0x1a0] sm:$0xff]  }
0x1a21   :  { %4549 = vmax.xlane.f32.xlu0 %v4548_v12  ;;  %6458 = vmatprep.subr.bf16.mxu1 %v6895_v46  ;;  %v6912_v46 = vld [vmem:[%s9377_s10 + $0x1d8] sm:$0xff]  }
0x1aa5   :  { %v9060_v48 = vpop.xlane.xlu1 %4546 }
0x1aa6   :  { %vm4555_vm10 = vcmp.eq.f32.partialorder %v4539_v17, %v9060_v48  ;;  %v9063_v37 = vpop.xlane.xlu0 %4543  ;;  %v6159_v17 = vcombine.low %v5050_v14, %v5050_v14  ;;  %v4631_v47 = vadd.f32 %v9060_v48, %v9000_v15  ;;  %v6905_v14 = vld [vmem:[%s9377_s10 + $0x128] sm:$0xff]  }
0x1aa7   :  { %v4559_v51 = vsel %vm4555_vm10, %v7433_v16, 8  ;;  %vm4554_vm11 = vcmp.eq.f32.partialorder %v4538_v57, %v9063_v37 }
0x1aa8   :  { %v4558_v58 = vsel %vm4554_vm11, %v7433_v16, 8  ;;  %v4577_v22 = vsel %vm1658_vm14, %v4559_v51, 2147483647  ;;  %v5074_v57 = vsel %vm2323_vm4, %v6159_v17, 0  ;;  %7195 = vrcp.f32 %v4631_v47  ;;  %v6909_v17 = vld [vmem:[%s9377_s10 + $0x120] sm:$0xff]   ;;  %v6914_v47 = vld [vmem:[%s9377_s10 + $0x198] sm:$0xff]  }
0x1aa9   :  { %v9069_v45 = vpop.xlane.xlu1 %4552  ;;  %v4579_v13 = vshra.s32 %v4577_v22, 16  ;;  %v4562_v31 = vsel %vm1658_vm14, %v4558_v58, 2147483647  ;;  %v4578_v43 = vand.u32 65535, %v4577_v22  ;;  %5147 = vmatpush1.bf16.msra.mxu0 %v5074_v57  ;;  %v6911_v57 = vld [vmem:[%s9377_s10 + $0x158] sm:$0xff]  }
0x1aaa   :  { %vm4557_vm12 = vcmp.eq.f32.partialorder %v4541_v7, %v9069_v45  ;;  %v9073_v33 = vpop.xlane.xlu0 %4549  ;;  %v4564_v27 = vshra.s32 %v4562_v31, 16  ;;  %v4563_v34 = vand.u32 65535, %v4562_v31  ;;  %v6896_v7 = vld [vmem:[%s9377_s10 + $0x1f8] sm:$0xff]   ;;  %v4633_v12 = vadd.f32 %v9069_v45, %v9011_v18 }
0x1aab   :  { %v4561_v29 = vsel %vm4557_vm12, %v7433_v16, 8  ;;  %vm4556_vm2 = vcmp.eq.f32.partialorder %v4540_v0, %v9073_v33  ;;  %v4581_v36 = vcvt.s32.f32 %v4579_v13  ;;  %v4580_v53 = vcvt.s32.f32 %v4578_v43  ;;  %6486 = vmatprep.subr.bf16.mxu0 %v6896_v7  ;;  %v6913_v7 = vld [vmem:[%s9377_s10 + $0x118] sm:$0xff]  }
0x1aac   :  { %v4560_v54 = vsel %vm4556_vm2, %v7433_v16, 8  ;;  %v4566_v9 = vcvt.s32.f32 %v4564_v27  ;;  %v4607_v1 = vsel %vm1658_vm14, %v4561_v29, 2147483647  ;;  %v4565_v35 = vcvt.s32.f32 %v4563_v34 }
0x1aad   :  { %4582 = vmin.xlane.f32.xlu1 %v4581_v36  ;;  %v4609_v42 = vshra.s32 %v4607_v1, 16  ;;  %v4592_v41 = vsel %vm1658_vm14, %v4560_v54, 2147483647  ;;  %v4608_v21 = vand.u32 65535, %v4607_v1  ;;  %v4630_v0 = vadd.f32 %v9063_v37, %v9004_v50 }
0x1aae   :  { %4567 = vmin.xlane.f32.xlu0 %v4566_v9  ;;  %v4594_v32 = vshra.s32 %v4592_v41, 16  ;;  %v4593_v19 = vand.u32 65535, %v4592_v41  ;;  %v4632_v51 = vadd.f32 %v9073_v33, %v9016_v5  ;;  %v4531_v41 = vsel %vm4527_vm1, %v9000_v15, 0.0 }
0x1aaf   :  { %v4611_v52 = vcvt.s32.f32 %v4609_v42  ;;  %v4610_v62 = vcvt.s32.f32 %v4608_v21  ;;  %7197 = vrcp.f32 %v4630_v0  ;;  %v6915_v0 = vld [vmem:[%s9377_s10 + $0x150] sm:$0xff]  }
0x1ab0   :  { %v4596_v6 = vcvt.s32.f32 %v4594_v32  ;;  %v4595_v59 = vcvt.s32.f32 %v4593_v19  ;;  %7199 = vrcp.f32 %v4633_v12  ;;  %v6916_v12 = vld [vmem:[%s9377_s10 + $0x1d0] sm:$0xff]  }
0x1ab1   :  { %4612 = vmin.xlane.f32.xlu1 %v4611_v52  ;;  %7201 = vrcp.f32 %v4632_v51  ;;  %v6917_v51 = vld [vmem:[%s9377_s10 + $0x110] sm:$0xff]  }
0x1ab2   :  { %4597 = vmin.xlane.f32.xlu0 %v4596_v6 }
0x1b36   :  { %v4583_v60 = vpop.xlane.xlu1 %4582 }
0x1b37   :  { %vm4584_vm3 = vcmp.eq.f32.partialorder %v4581_v36, %v4583_v60  ;;  %v4568_v3 = vpop.xlane.xlu0 %4567  ;;  %v4589_v58 = vcvt.f32.s32 %v4583_v60 }
0x1b38   :  { %vm4569_vm15 = vcmp.eq.f32.partialorder %v4566_v9, %v4568_v3  ;;  %v4585_v20 = vsel %vm4584_vm3, %v4580_v53, inf  ;;  %v4574_v22 = vcvt.f32.s32 %v4568_v3  ;;  %v7196_v53 = vpop.eup %7195 }
0x1b39   :  { %4586 = vmin.xlane.f32.xlu1 %v4585_v20  ;;  %v4570_v24 = vsel %vm4569_vm15, %v4565_v35, inf  ;;  %v4590_v31 = vshll.u32 %v4589_v58, 16  ;;  %v7198_v15 = vpop.eup %7197  ;;  %v6918_v58 = vld [vmem:[%s9377_s10 + $0x190] sm:$0xff]  }
0x1b3a   :  { %4571 = vmin.xlane.f32.xlu0 %v4570_v24  ;;  %v4613_v28 = vpop.xlane.xlu1 %4612  ;;  %v4575_v54 = vshll.u32 %v4574_v22, 16  ;;  %v6919_v22 = vld [vmem:[%s9377_s10 + $0x148] sm:$0xff]  }
0x1b3b   :  { %vm4614_vm13 = vcmp.eq.f32.partialorder %v4611_v52, %v4613_v28  ;;  %v4598_v56 = vpop.xlane.xlu0 %4597  ;;  %v4619_v27 = vcvt.f32.s32 %v4613_v28  ;;  %v7200_v28 = vpop.eup %7199 }
0x1b3c   :  { %vm4599_vm5 = vcmp.eq.f32.partialorder %v4596_v6, %v4598_v56  ;;  %v4615_v30 = vsel %vm4614_vm13, %v4610_v62, inf  ;;  %v4604_v9 = vcvt.f32.s32 %v4598_v56  ;;  %v4530_v6 = vsel %vm4526_vm7, %v9004_v50, 0.0  ;;  %v7202_v8 = vpop.eup %7201 }
0x1b3d   :  { %4616 = vmin.xlane.f32.xlu1 %v4615_v30  ;;  %v4600_v63 = vsel %vm4599_vm5, %v4595_v59, inf  ;;  %v4620_v43 = vshll.u32 %v4619_v27, 16  ;;  %v4533_v50 = vsel %vm4529_vm8, %v9011_v18, 0.0  ;;  %v6898_v18 = vld [vmem:[%s9377_s10 + $0x1b8] sm:$0xff]   ;;  %v6922_v27 = vld [vmem:[%s9377_s10 + $0x188] sm:$0xff]  }
0x1b3e   :  { %4601 = vmin.xlane.f32.xlu0 %v4600_v63  ;;  %v4605_v21 = vshll.u32 %v4604_v9, 16  ;;  %v6902_v63 = vld [vmem:[%s9377_s10 + $0x1b0] sm:$0xff]   ;;  %v6926_v9 = vld [vmem:[%s9377_s10 + $0x180] sm:$0xff]  }
0x1bc2   :  { %v4587_v13 = vpop.xlane.xlu1 %4586 }
0x1bc3   :  { %v4588_v29 = vcvt.f32.s32 %v4587_v13  ;;  %v4572_v36 = vpop.xlane.xlu0 %4571  ;;  %v6920_v13 = vld [vmem:[%s9377_s10 + $0x1c8] sm:$0xff]  }
0x1bc4   :  { %v4573_v1 = vcvt.f32.s32 %v4572_v36  ;;  %v6924_v36 = vld [vmem:[%s9377_s10 + $0x1c0] sm:$0xff]  }
0x1bc5   :  { %v4591_v42 = vadd.s32 %v4590_v31, %v4588_v29  ;;  %v6921_v31 = vld [vmem:[%s9377_s10 + $0x108] sm:$0xff]   ;;  %v6923_v29 = vld [vmem:[%s9377_s10 + $0x140] sm:$0xff]  }
0x1bc6   :  { %v4576_v32 = vadd.s32 %v4575_v54, %v4573_v1  ;;  %v4617_v52 = vpop.xlane.xlu1 %4616  ;;  %v6925_v54 = vld [vmem:[%s9377_s10 + $0x100] sm:$0xff]   ;;  %v9224_v1 = vpop.f32.mrf.mxu1 }
0x1bc7   :  { %vm4623_vm4 = vcmp.eq.s32.totalorder %v7433_v16, %v4591_v42  ;;  %v4618_v34 = vcvt.f32.s32 %v4617_v52  ;;  %v4602_v60 = vpop.xlane.xlu0 %4601  ;;  %v9226_v42 = vpop.f32.mrf.mxu0 }
0x1bc8   :  { %v4627_v3 = vsel %vm4623_vm4, %v9060_v48, %v4531_v41  ;;  %vm4622_vm0 = vcmp.eq.s32.totalorder %v7433_v16, %v4576_v32  ;;  %v4603_v10 = vcvt.f32.s32 %v4602_v60  ;;  %v4532_v48 = vsel %vm4528_vm9, %v9016_v5, 0.0  ;;  %v6899_v5 = vld [vmem:[%s9377_s10 + $0x170] sm:$0xff]   ;;  %v9228_v41 = vpop.f32.mrf.mxu1 }
0x1bc9   :  { %v4637_v35 = vmul.f32 %v7196_v53, %v4627_v3  ;;  %v4626_v19 = vsel %vm4622_vm0, %v9063_v37, %v4530_v6  ;;  %v4621_v20 = vadd.s32 %v4620_v43, %v4618_v34  ;;  %v6897_v37 = vld [vmem:[%s9377_s10 + $0x138] sm:$0xff]   ;;  %v9230_v32 = vpop.f32.mrf.mxu0 }
0x1bca   :  { %v4635_v24 = vmul.f32 %v7198_v15, %v4626_v19  ;;  %v4606_v39 = vadd.s32 %v4605_v21, %v4603_v10  ;;  %v9232_v52 = vpop.f32.mrf.mxu1  ;;  %v6167_v21 = vmul.f32 -1.442695, %v9224_v1  ;;  %v6168_v10 = vmul.f32 -1.442695, %v9228_v41 }
0x1bcb   :  { %vm4625_vm1 = vcmp.eq.s32.totalorder %v7433_v16, %v4621_v20  ;;  %v9234_v6 = vpop.f32.mrf.mxu0  ;;  %v6171_v15 = vmul.f32 -1.442695, %v9232_v52 }
0x1bcc   :  { %v4642_v62 = vpack.c.bf16 %v4637_v35, %v4635_v24  ;;  %v4629_v56 = vsel %vm4625_vm1, %v9069_v45, %v4533_v50  ;;  %vm4624_vm7 = vcmp.eq.s32.totalorder %v7433_v16, %v4606_v39  ;;  %v6900_v16 = vld [vmem:[%s9377_s10 + $0x1f0] sm:$0xff]   ;;  %v9236_v43 = vpop.f32.mrf.mxu1  ;;  %7203 = vpow2.f32 %v6167_v21 }
0x1bcd   :  { %v4641_v59 = vmul.f32 %v7200_v28, %v4629_v56  ;;  %v4628_v30 = vsel %vm4624_vm7, %v9073_v33, %v4532_v48  ;;  %v6901_v33 = vld [vmem:[%s9377_s10 + $0x130] sm:$0xff]   ;;  %v9238_v34 = vpop.f32.mrf.mxu0  ;;  %v6172_v35 = vmul.f32 -1.442695, %v9236_v43  ;;  %v6170_v24 = vmul.f32 -1.442695, %v9230_v32 }
0x1bce   :  { %v4639_v49 = vmul.f32 %v7202_v8, %v4628_v30  ;;  %6162 = vmatmul.mubr.msk.bf16.vlgmr.msra.gmra.mxu1 %vm1658_vm14, %v4642_v62  ;;  %6165 = vmatmul.mubr.msk.bf16.vlgmr.msra.gmra.mxu0 %vm1658_vm14, %v4642_v62  ;;  %v9240_v60 = vpop.f32.mrf.mxu1  ;;  %7205 = vpow2.f32 %v6168_v10  ;;  %v6173_v39 = vmul.f32 -1.442695, %v9234_v6  ;;  %v6174_v50 = vmul.f32 -1.442695, %v9238_v34 }
0x1bcf   :  { %5121 = vmatprep.mubr.bf16.mxu1 %v7305_v2  ;;  %5174 = vmatprep.mubr.bf16.mxu0 %v7305_v2  ;;  %v6904_v2 = vld [vmem:[%s9377_s10 + $0x1e8] sm:$0xff]   ;;  %v9242_v53 = vpop.f32.mrf.mxu0  ;;  %7207 = vpow2.f32 %v6171_v15  ;;  %v6169_v28 = vmul.f32 -1.442695, %v9226_v42  ;;  %v6175_v62 = vmul.f32 -1.442695, %v9240_v60 }
0x1bd0   :  { %v4643_v45 = vpack.c.bf16 %v4641_v59, %v4639_v49  ;;  %6459 = vmatpush3.bf16.msra.mxu1 %v6897_v37  ;;  %6487 = vmatpush3.bf16.msra.mxu0 %v6898_v18  ;;  %v9245_v3 = vpop.f32.mrf.mxu1  ;;  %7209 = vpow2.f32 %v6172_v35 }
0x1bd1   :  { %6460 = vmatprep.subr.bf16.mxu1 %v6899_v5  ;;  %6488 = vmatprep.subr.bf16.mxu0 %v6900_v16  ;;  %v9250_v19 = vpop.f32.mrf.mxu0  ;;  %7211 = vpow2.f32 %v6170_v24  ;;  %v6176_v37 = vmul.f32 -1.442695, %v9245_v3 }
0x1bd2   :  { %v9252_v20 = vpop.f32.mrf.mxu1  ;;  %7213 = vpow2.f32 %v6173_v39  ;;  %v6178_v30 = vmul.f32 -1.442695, %v9250_v19 }
0x1bd3   :  { %v9258_v48 = vpop.f32.mrf.mxu0  ;;  %v6179_v18 = vmul.f32 -1.442695, %v9252_v20  ;;  %7215 = vpow2.f32 %v6174_v50 }
0x1bd4   :  { %6461 = vmatpush3.bf16.msra.mxu1 %v6901_v33  ;;  %6489 = vmatpush3.bf16.msra.mxu0 %v6902_v63  ;;  %v9261_v56 = vpop.f32.mrf.mxu1  ;;  %7217 = vpow2.f32 %v6169_v28  ;;  %v6181_v5 = vmul.f32 -1.442695, %v9258_v48 }
0x1bd5   :  { %6462 = vmatprep.subr.bf16.mxu1 %v6903_v25  ;;  %6490 = vmatprep.subr.bf16.mxu0 %v6904_v2  ;;  %v6180_v8 = vmul.f32 -1.442695, %v9261_v56  ;;  %v9266_v59 = vpop.f32.mrf.mxu0  ;;  %7219 = vpow2.f32 %v6175_v62 }
0x1bd6   :  { %6163 = vmatmul.mubr.msk.bf16.gmra.mxu1 %vm1658_vm14, %v4643_v45  ;;  %6166 = vmatmul.mubr.msk.bf16.gmra.mxu0 %vm1658_vm14, %v4643_v45  ;;  %7221 = vpow2.f32 %v6176_v37  ;;  %v6182_v16 = vmul.f32 -1.442695, %v9266_v59  ;;  %v9271_v49 = vpop.f32.mrf.mxu1  ;;  %v6177_v45 = vmul.f32 -1.442695, %v9242_v53 }
0x1bd7   :  { %7223 = vpow2.f32 %v6179_v18  ;;  %v9274_v33 = vpop.f32.mrf.mxu0 }
0x1bd8   :  { %6463 = vmatpush3.bf16.msra.mxu1 %v6905_v14  ;;  %6491 = vmatpush3.bf16.msra.mxu0 %v6906_v55  ;;  %7225 = vpow2.f32 %v6180_v8  ;;  %v9276_v14 = vpop.f32.mrf.mxu1 }
0x1bd9   :  { %6464 = vmatprep.subr.bf16.mxu1 %v6907_v44  ;;  %6492 = vmatprep.subr.bf16.mxu0 %v6908_v4  ;;  %7227 = vpow2.f32 %v6178_v30  ;;  %v7204_v63 = vpop.eup %7203  ;;  %v9278_v55 = vpop.f32.mrf.mxu0 }
0x1bda   :  { %7229 = vpow2.f32 %v6181_v5  ;;  %v5233_v4 = vadd.f32 1.0, %v7204_v63 }
0x1bdb   :  { %v7206_v25 = vpop.eup %7205  ;;  %7231 = vpow2.f32 %v6182_v16 }
0x1bdc   :  { %6465 = vmatpush3.bf16.msra.mxu1 %v6909_v17  ;;  %6493 = vmatpush3.bf16.msra.mxu0 %v6910_v26  ;;  %v7208_v2 = vpop.eup %7207  ;;  %7233 = vpow2.f32 %v6177_v45  ;;  %v5234_v26 = vadd.f32 1.0, %v7206_v25 }
0x1bdd   :  { %6466 = vmatprep.subr.bf16.mxu1 %v6911_v57  ;;  %6494 = vmatprep.subr.bf16.mxu0 %v6912_v46  ;;  %v7210_v44 = vpop.eup %7209  ;;  %v5237_v46 = vadd.f32 1.0, %v7208_v2  ;;  %7235 = vrcp.f32 %v5233_v4 }
0x1bde   :  { %v7212_v17 = vpop.eup %7211  ;;  %7237 = vrcp.f32 %v5234_v26 }
0x1bdf   :  { %v7214_v57 = vpop.eup %7213  ;;  %7239 = vrcp.f32 %v5237_v46 }
0x1be0   :  { %6467 = vmatpush3.bf16.msra.mxu1 %v6913_v7  ;;  %6495 = vmatpush3.bf16.msra.mxu0 %v6914_v47  ;;  %v7216_v7 = vpop.eup %7215  ;;  %v5238_v47 = vadd.f32 1.0, %v7210_v44 }
0x1be1   :  { %6468 = vmatprep.subr.bf16.mxu1 %v6915_v0  ;;  %6496 = vmatprep.subr.bf16.mxu0 %v6916_v12  ;;  %v9280_v0 = vpop.f32.mrf.mxu1  ;;  %v9282_v12 = vpop.f32.mrf.mxu0 }
0x1be2   :  { %7241 = vrcp.f32 %v5238_v47 }
0x1be4   :  { %6469 = vmatpush3.bf16.msra.mxu1 %v6917_v51  ;;  %6497 = vmatpush3.bf16.msra.mxu0 %v6918_v58  ;;  %v7218_v51 = vpop.eup %7217  ;;  %v5236_v58 = vadd.f32 1.0, %v7212_v17 }
0x1be5   :  { %6470 = vmatprep.subr.bf16.mxu1 %v6919_v22  ;;  %6498 = vmatprep.subr.bf16.mxu0 %v6920_v13  ;;  %v7220_v22 = vpop.eup %7219  ;;  %v5239_v13 = vadd.f32 1.0, %v7214_v57 }
0x1be6   :  { %v5241_v10 = vadd.f32 1.0, %v7220_v22  ;;  %7243 = vrcp.f32 %v5236_v58 }
0x1be7   :  { %7245 = vrcp.f32 %v5239_v13 }
0x1be8   :  { %6471 = vmatpush3.bf16.msra.mxu1 %v6921_v31  ;;  %6499 = vmatpush3.bf16.msra.mxu0 %v6922_v27  ;;  %v7222_v31 = vpop.eup %7221  ;;  %v5240_v27 = vadd.f32 1.0, %v7216_v7 }
0x1be9   :  { %6472 = vmatprep.subr.bf16.mxu1 %v6923_v29  ;;  %6500 = vmatprep.subr.bf16.mxu0 %v6924_v36  ;;  %v7224_v29 = vpop.eup %7223  ;;  %v5235_v36 = vadd.f32 1.0, %v7218_v51  ;;  %v5242_v35 = vadd.f32 1.0, %v7222_v31 }
0x1bea   :  { %v7226_v21 = vpop.eup %7225  ;;  %v5245_v39 = vadd.f32 1.0, %v7224_v29  ;;  %7247 = vrcp.f32 %v5240_v27 }
0x1beb   :  { %v7228_v15 = vpop.eup %7227  ;;  %v5246_v28 = vadd.f32 1.0, %v7226_v21  ;;  %7249 = vrcp.f32 %v5235_v36 }
0x1bec   :  { %6473 = vmatpush3.bf16.msra.mxu1 %v6925_v54  ;;  %6501 = vmatpush3.bf16.msra.mxu0 %v6926_v9  ;;  %v9284_v54 = vpop.f32.mrf.mxu1  ;;  %v9286_v9 = vpop.f32.mrf.mxu0  ;;  %7251 = vrcp.f32 %v5241_v10  ;;  %v5244_v8 = vadd.f32 1.0, %v7228_v15 }
0x1bed   :  { %v7230_v24 = vpop.eup %7229  ;;  %7253 = vrcp.f32 %v5242_v35 }
0x1bee   :  { %v7232_v50 = vpop.eup %7231  ;;  %v9288_v62 = vpop.f32.mrf.mxu1  ;;  %v5247_v30 = vadd.f32 1.0, %v7230_v24  ;;  %7255 = vrcp.f32 %v5245_v39 }
0x1bef   :  { %v9290_v37 = vpop.f32.mrf.mxu0  ;;  %v7234_v18 = vpop.eup %7233  ;;  %v5248_v5 = vadd.f32 1.0, %v7232_v50  ;;  %7257 = vrcp.f32 %v5246_v28 }
0x1bf0   :  { %v9292_v16 = vpop.f32.mrf.mxu1  ;;  %v5243_v45 = vadd.f32 1.0, %v7234_v18  ;;  %7259 = vrcp.f32 %v5244_v8  ;;  %v7236_v25 = vpop.eup %7235 }
0x1bf1   :  { %v9294_v63 = vpop.f32.mrf.mxu0  ;;  %7261 = vrcp.f32 %v5247_v30  ;;  %v7238_v2 = vpop.eup %7237  ;;  %v5281_v13 = vmul.f32 %v7236_v25, %v9224_v1 }
0x1bf2   :  { %7263 = vrcp.f32 %v5248_v5  ;;  %v7240_v44 = vpop.eup %7239  ;;  %v9296_v4 = vpop.f32.mrf.mxu1  ;;  %v5282_v31 = vmul.f32 %v7238_v2, %v9228_v41 }
0x1bf3   :  { %7265 = vrcp.f32 %v5243_v45  ;;  %v9298_v17 = vpop.f32.mrf.mxu0  ;;  %v7242_v26 = vpop.eup %7241  ;;  %v5285_v27 = vmul.f32 %v7240_v44, %v9232_v52  ;;  %v5297_v52 = vmul.f32 %v5281_v13, %v9271_v49 }
0x1bf4   :  { %v7244_v57 = vpop.eup %7243  ;;  %v9300_v47 = vpop.f32.mrf.mxu1  ;;  %v5286_v15 = vmul.f32 %v7242_v26, %v9236_v43 }
0x1bf5   :  { %v7246_v46 = vpop.eup %7245  ;;  %v9302_v51 = vpop.f32.mrf.mxu0  ;;  %v5284_v35 = vmul.f32 %v7244_v57, %v9230_v32  ;;  %v5301_v8 = vmul.f32 %v5285_v27, %v9280_v0 }
0x1bf6   :  { %v5287_v29 = vmul.f32 %v7246_v46, %v9234_v6  ;;  %v5298_v6 = vmul.f32 %v5282_v31, %v9276_v14  ;;  %v5302_v45 = vmul.f32 %v5286_v15, %v9284_v54 }
0x1bf7   :  { %v7248_v7 = vpop.eup %7247 }
0x1bf8   :  { %v7250_v58 = vpop.eup %7249  ;;  %v5288_v24 = vmul.f32 %v7248_v7, %v9238_v34  ;;  %v5303_v30 = vmul.f32 %v5287_v29, %v9282_v12 }
0x1bf9   :  { %v7252_v22 = vpop.eup %7251  ;;  %v5283_v50 = vmul.f32 %v7250_v58, %v9226_v42  ;;  %v5300_v42 = vmul.f32 %v5284_v35, %v9278_v55 }
0x1bfa   :  { %v7254_v10 = vpop.eup %7253  ;;  %v5304_v25 = vmul.f32 %v5288_v24, %v9286_v9  ;;  %v5289_v15 = vmul.f32 %v7252_v22, %v9240_v60 }
0x1bfb   :  { %v7256_v39 = vpop.eup %7255  ;;  %v5290_v34 = vmul.f32 %v7254_v10, %v9245_v3  ;;  %v5299_v14 = vmul.f32 %v5283_v50, %v9274_v33 }
0x1bfc   :  { %v7258_v18 = vpop.eup %7257  ;;  %v5293_v49 = vmul.f32 %v7256_v39, %v9252_v20 }
0x1bfd   :  { %v7260_v41 = vpop.eup %7259  ;;  %v5294_v54 = vmul.f32 %v7258_v18, %v9261_v56 }
0x1bfe   :  { %v7262_v32 = vpop.eup %7261  ;;  %v5292_v20 = vmul.f32 %v7260_v41, %v9250_v19 }
0x1bff   :  { %v7264_v2 = vpop.eup %7263  ;;  %v5295_v55 = vmul.f32 %v7262_v32, %v9258_v48  ;;  %v5309_v48 = vmul.f32 %v5293_v49, %v9296_v4  ;;  %v5310_v60 = vmul.f32 %v5294_v54, %v9300_v47 }
0x1c00   :  { %v7266_v57 = vpop.eup %7265  ;;  %v5296_v33 = vmul.f32 %v7264_v2, %v9266_v59  ;;  %v5306_v59 = vmul.f32 %v5290_v34, %v9292_v16 }
0x1c01   :  { %v5291_v35 = vmul.f32 %v7266_v57, %v9242_v53  ;;  %v5308_v53 = vmul.f32 %v5292_v20, %v9294_v63 }
0x1c02   :  { %v5312_v22 = vmul.f32 %v5296_v33, %v9302_v51 }
0x1c8e   :  { %v5113_v36 = vpop.f32.mrf.mxu1  ;;  %v5166_v21 = vpop.f32.mrf.mxu0 }
0x1c8f   :  { %v5313_v13 = vmul.f32 %v5297_v52, %v5113_v36  ;;  %v5315_v9 = vmul.f32 %v5299_v14, %v5166_v21  ;;  %v5311_v36 = vmul.f32 %v5295_v55, %v9298_v17 }
0x1c90   :  { %v5115_v28 = vpop.f32.mrf.mxu1  ;;  %v5168_v1 = vpop.f32.mrf.mxu0 }
0x1c91   :  { %v5314_v46 = vmul.f32 %v5298_v6, %v5115_v28  ;;  %v5316_v7 = vmul.f32 %v5300_v42, %v5168_v1  ;;  %v5305_v28 = vmul.f32 %v5289_v15, %v9288_v62  ;;  %v5307_v1 = vmul.f32 %v5291_v35, %v9290_v37 }
0x1c92   :  { %v5117_v43 = vpop.f32.mrf.mxu1  ;;  %v5170_v5 = vpop.f32.mrf.mxu0 }
0x1c93   :  { %v5317_v44 = vmul.f32 %v5301_v8, %v5117_v43  ;;  %v5319_v0 = vmul.f32 %v5303_v30, %v5170_v5 }
0x1c94   :  { %v5119_v26 = vpop.f32.mrf.mxu1  ;;  %v5172_v12 = vpop.f32.mrf.mxu0 }
0x1c95   :  { %v5318_v58 = vmul.f32 %v5302_v45, %v5119_v26  ;;  %v5320_v3 = vmul.f32 %v5304_v25, %v5172_v12  ;;  %v5329_v24 = vpack.c.bf16 %v5317_v44, %v5313_v13  ;;  %v5331_v39 = vpack.c.bf16 %v5319_v0, %v5315_v9 }
0x1c96   :  { %v5123_v31 = vpop.f32.mrf.mxu1  ;;  %v5176_v27 = vpop.f32.mrf.mxu0 }
0x1c97   :  { %v5330_v29 = vpack.c.bf16 %v5318_v58, %v5314_v46  ;;  %v5332_v10 = vpack.c.bf16 %v5320_v3, %v5316_v7  ;;  %v5321_v43 = vmul.f32 %v5305_v28, %v5123_v31  ;;  %v5323_v16 = vmul.f32 %v5307_v1, %v5176_v27  ;;  %v6929_v1 = vld [vmem:[%s9380_s13 + $0x8] sm:$0xff]  }
0x1c98   :  { %v5125_v50 = vpop.f32.mrf.mxu1  ;;  %v5178_v56 = vpop.f32.mrf.mxu0 }
0x1c99   :  { %5626 = vmatprep.mubr.bf16.mxu1 %v5330_v29  ;;  %5675 = vmatprep.mubr.bf16.mxu0 %v5332_v10  ;;  %v5322_v52 = vmul.f32 %v5306_v59, %v5125_v50  ;;  %v5324_v6 = vmul.f32 %v5308_v53, %v5178_v56 }
0x1c9a   :  { %v5127_v21 = vpop.f32.mrf.mxu1  ;;  %v5180_v19 = vpop.f32.mrf.mxu0  ;;  %5627 = vmatmul.mubr.bf16.vlgmr.msra.gmra.mxu1 %v5329_v24  ;;  %5676 = vmatmul.mubr.bf16.vlgmr.msra.gmra.mxu0 %v5331_v39 }
0x1c9b   :  { %v5325_v18 = vmul.f32 %v5309_v48, %v5127_v21  ;;  %v5327_v4 = vmul.f32 %v5311_v36, %v5180_v19 }
0x1c9c   :  { %v5129_v41 = vpop.f32.mrf.mxu1  ;;  %v5182_v17 = vpop.f32.mrf.mxu0 }
0x1c9d   :  { %v5326_v8 = vmul.f32 %v5310_v60, %v5129_v41  ;;  %v5328_v30 = vmul.f32 %v5312_v22, %v5182_v17  ;;  %v5333_v32 = vpack.c.bf16 %v5325_v18, %v5321_v43  ;;  %v5335_v63 = vpack.c.bf16 %v5327_v4, %v5323_v16  ;;  %v6930_v18 = vld [vmem:[%s9380_s13] sm:$0xff]  }
0x1c9f   :  { %v5334_v5 = vpack.c.bf16 %v5326_v8, %v5322_v52  ;;  %v5336_v47 = vpack.c.bf16 %v5328_v30, %v5324_v6 }
0x1ca1   :  { %5634 = vmatprep.mubr.bf16.mxu1 %v5334_v5  ;;  %5683 = vmatprep.mubr.bf16.mxu0 %v5336_v47  ;;  %v5734_v47 = vld [vmem:[%s9379_s12] sm:$0x1]  ;;  %s7316_s12 = smov [#allocation3]  }
0x1ca2   :  { %5635 = vmatmul.mubr.bf16.gmra.mxu1 %v5333_v32  ;;  %5684 = vmatmul.mubr.bf16.gmra.mxu0 %v5335_v63 }
0x1d5a   :  { %v6474_v62 = vpop.f32.mrf.mxu1  ;;  %v6502_v37 = vpop.f32.mrf.mxu0 }
0x1d5c   :  { %v6475_v51 = vpop.f32.mrf.mxu1  ;;  %v6503_v34 = vpop.f32.mrf.mxu0 }
0x1d5d   :  { %v6476_v45 = vadd.f32 %v6475_v51, %v6474_v62  ;;  %v6504_v42 = vadd.f32 %v6503_v34, %v6502_v37  ;;  %v5735_v62 = vunpack.c.l.bf16 %v5734_v47 }
0x1d5e   :  { %v6477_v25 = vpop.f32.mrf.mxu1  ;;  %v6505_v2 = vpop.f32.mrf.mxu0 }
0x1d5f   :  { %v5678_v44 = vadd.f32 %v6504_v42, %v6476_v45  ;;  %v5739_v37 = vrot.slane %v5735_v62, %v7490_v61 }
0x1d60   :  { %v6478_v49 = vpop.f32.mrf.mxu1  ;;  %v6506_v14 = vpop.f32.mrf.mxu0 }
0x1d61   :  { %v6479_v0 = vadd.f32 %v6478_v49, %v6477_v25  ;;  %v6507_v26 = vadd.f32 %v6506_v14, %v6505_v2  ;;  %v5692_v3 = vadd.f32 %v5678_v44, %v8811_v40 }
0x1d62   :  { %v6480_v12 = vpop.f32.mrf.mxu1  ;;  %v6508_v57 = vpop.f32.mrf.mxu0 }
0x1d63   :  { %v5681_v46 = vadd.f32 %v6507_v26, %v6479_v0 }
0x1d64   :  { %v6481_v7 = vpop.f32.mrf.mxu1  ;;  %v6509_v58 = vpop.f32.mrf.mxu0 }
0x1d65   :  { %v5693_v54 = vadd.f32 %v5681_v46, %v8813_v11  ;;  %v6482_v55 = vadd.f32 %v6481_v7, %v6480_v12  ;;  %v6510_v13 = vadd.f32 %v6509_v58, %v6508_v57 }
0x1d66   :  { %v6483_v9 = vpop.f32.mrf.mxu1  ;;  %v6511_v31 = vpop.f32.mrf.mxu0 }
0x1d67   :  { %v5696_v27 = vpack.c.bf16 %v5693_v54, %v5692_v3  ;;  %v5686_v29 = vadd.f32 %v6510_v13, %v6482_v55 }
0x1d68   :  { %v6484_v20 = vpop.f32.mrf.mxu1  ;;  %v6512_v33 = vpop.f32.mrf.mxu0 }
0x1d69   :  { %v6485_v10 = vadd.f32 %v6484_v20, %v6483_v9  ;;  %v6513_v15 = vadd.f32 %v6512_v33, %v6511_v31  ;;  %v5699_v35 = vunpack.c.h.bf16 %v5696_v27  ;;  %v5698_v24 = vunpack.c.l.bf16 %v5696_v27 }
0x1d6a   :  { %v5694_v48 = vadd.f32 %v5686_v29, %v8807_v23  ;;  %v6927_v23 = vld [vmem:[%s9380_s13 + $0x18] sm:$0xff]  }
0x1d6b   :  { %v5689_v39 = vadd.f32 %v6513_v15, %v6485_v10  ;;  %v5703_v50 = vmul.f32 %v5699_v35, %v5699_v35  ;;  %v5702_v56 = vmul.f32 %v5698_v24, %v5698_v24  ;;  %6780 = vmatprep.subr.bf16.mxu1 %v6927_v23 }
0x1d6c   :  { %6781 = vmatpush3.bf16.msra.mxu1 %v6927_v23 }
0x1d6d   :  { %v5695_v40 = vadd.f32 %v5689_v39, %v8809_v38  ;;  %v5709_v11 = vsel %vm217_vm6, %v5703_v50, 0.0  ;;  %v5706_v36 = vsel %vm217_vm6, %v5702_v56, 0.0  ;;  %v6928_v38 = vld [vmem:[%s9380_s13 + $0x10] sm:$0xff]   ;;  %s5858_s13 = sshll.u32 %s7316_s12, 4  ;;  %s5859_s13 = int_to_ptr.vmem [resolvable:$true] %s5858_s13 }
0x1d6e   :  { %5710 = vadd.xlane.f32.xlu1 %v5709_v11  ;;  %5707 = vadd.xlane.f32.xlu0 %v5706_v36  ;;  %s7283_s23 = scalar_lea.vmem %s5859_s13, 256  ;;  %p7288_p1 = scmp.lt.s32.totalorder %s5859_s13, %s5859_s13 }
0x1d6f   :  { %v5697_v21 = vpack.c.bf16 %v5695_v40, %v5694_v48  ;;  %6782 = vmatprep.subr.bf16.mxu1 %v6928_v38  ;;  %p7284_p0 = scmp.ne.s32.totalorder %s5859_s13, %s7283_s23  ;;  %p7289_p2 = scmp.lt.s32.totalorder %s7283_s23, %s7283_s23 }
0x1d70   :  { %6783 = vmatpush3.bf16.msra.mxu1 %v6928_v38 }
0x1d71   :  { %v5701_v19 = vunpack.c.h.bf16 %v5697_v21  ;;  %v5700_v59 = vunpack.c.l.bf16 %v5697_v21  ;;  %6784 = vmatprep.subr.bf16.mxu1 %v6929_v1  ;;  %p7290_p3 = por %p7289_p2, %p7288_p1 }
0x1d73   :  { %v5705_v60 = vmul.f32 %v5701_v19, %v5701_v19  ;;  %v5704_v53 = vmul.f32 %v5700_v59, %v5700_v59  ;;  %p7291_p4 = pnand %p7290_p3, %p7284_p0 }
0x1d74   :  { %6785 = vmatpush3.bf16.msra.mxu1 %v6929_v1 }
0x1d75   :  { %v5715_v22 = vsel %vm217_vm6, %v5705_v60, 0.0  ;;  %v5712_v28 = vsel %vm217_vm6, %v5704_v53, 0.0  ;;  %6786 = vmatprep.subr.bf16.mxu1 %v6930_v18 }
0x1d76   :  { %5716 = vadd.xlane.f32.xlu1 %v5715_v22  ;;  %5713 = vadd.xlane.f32.xlu0 %v5712_v28 }
0x1d78   :  { %6787 = vmatpush3.bf16.msra.mxu1 %v6930_v18 }
0x1df7   :  { %v5711_v4 = vpop.xlane.xlu1 %5710  ;;  %v5708_v17 = vpop.xlane.xlu0 %5707 }
0x1df8   :  { %v5719_v41 = vmul.f32 0.015625, %v5711_v4  ;;  %v5718_v52 = vmul.f32 0.015625, %v5708_v17 }
0x1dfa   :  { %v5723_v6 = vadd.f32 1e-05, %v5719_v41  ;;  %v5722_v8 = vadd.f32 1e-05, %v5718_v52 }
0x1dfc   :  { %7267 = vrsqrt.f32 %v5723_v6 }
0x1dfd   :  { %7269 = vrsqrt.f32 %v5722_v8 }
0x1dff   :  { %v5717_v30 = vpop.xlane.xlu1 %5716  ;;  %v5714_v43 = vpop.xlane.xlu0 %5713 }
0x1e00   :  { %v5721_v16 = vmul.f32 0.015625, %v5717_v30  ;;  %v5720_v5 = vmul.f32 0.015625, %v5714_v43 }
0x1e02   :  { %v5725_v32 = vadd.f32 1e-05, %v5721_v16  ;;  %v5724_v63 = vadd.f32 1e-05, %v5720_v5 }
0x1e04   :  { %7271 = vrsqrt.f32 %v5725_v32 }
0x1e05   :  { %7273 = vrsqrt.f32 %v5724_v63 }
0x1e09   :  { %v7268_v51 = vpop.eup %7267 }
0x1e0a   :  { %v7270_v34 = vpop.eup %7269  ;;  %v5731_v45 = vmul.f32 %v7268_v51, %v5699_v35 }
0x1e0b   :  { %v5730_v42 = vmul.f32 %v7270_v34, %v5698_v24 }
0x1e0c   :  { %v5741_v25 = vmul.f32 %v5739_v37, %v5731_v45 }
0x1e0d   :  { %v5740_v2 = vmul.f32 %v5739_v37, %v5730_v42 }
0x1e0f   :  { %v5744_v49 = vpack.c.bf16 %v5741_v25, %v5740_v2 }
0x1e11   :  { %v7272_v14 = vpop.eup %7271  ;;  %6788 = vmatprep.mubr.msk.bf16.mxu1 %vm217_vm6, %v5744_v49 }
0x1e12   :  { %v7274_v44 = vpop.eup %7273  ;;  %v5733_v0 = vmul.f32 %v7272_v14, %v5701_v19 }
0x1e13   :  { %v5732_v26 = vmul.f32 %v7274_v44, %v5700_v59 }
0x1e14   :  { %v5743_v12 = vmul.f32 %v5739_v37, %v5733_v0 }
0x1e15   :  { %v5742_v57 = vmul.f32 %v5739_v37, %v5732_v26 }
0x1e17   :  { %v5745_v46 = vpack.c.bf16 %v5743_v12, %v5742_v57 }
0x1e19   :  { %6789 = vmatmul.mubr.msk.bf16.vlgmr.msra.gmra.mxu1 %vm217_vm6, %v5745_v46 }
0x1ed9   :  { %v6790_v7 = vpop.f32.mrf.mxu1 }
0x1edb   :  { %v5818_v61 = vpop.f32.mrf.mxu1 }
0x1edd   :  { %v6791_v58 = vpop.f32.mrf.mxu1 }
0x1ede   :  { %v6301_v3 = vpack.c.bf16 %v6791_v58, %v6790_v7 }
0x1edf   :  { %v5821_v54 = vpop.f32.mrf.mxu1 }
0x1ee0   :  { %6303 = vst [vmem:[#allocation3 + $0x8] sm:$0xff] %v6301_v3   ;;  %v6296_v55 = vpack.c.bf16 %v5821_v54, %v5818_v61 }
0x1ee2   :  { %6297 = vst [vmem:[#allocation3] sm:$0xff] %v6296_v55  }
0x1ee3   :  { %7294 = shalt.err (!%p7291_p4)
}
0x1ee4   :  { %s7317_s9 = smov 4  }
0x1ee5   :  { %5864 = dma.vmem_to_hbm [thread:$0]  %s5859_s13, 256, %s9381_s14, [#allocation4], %s7310_s19, %s7310_s19, %s7317_s9  }
0x1ee6   :  { %7303 = dma.done.wait [#allocation4], 256  }
0x1ee7   :  { %7304 = vsyncadd [#allocation4], 4294967040 }
0x1ee8   :  { %5868 = vsyncpa [#allocation4], 1 }

</bundles_post_ra>
